<compile_context>
chip_gen: v7x
topology: tpu7x:2x2x1
jax: 0.10.0
libtpu: 0.0.40
codegen_flags: <defaults>
</compile_context>

<pallas_src>
import functools
import math

import jax
import jax.numpy as jnp
from jax import lax
from jax.experimental import pallas as pl
from jax.experimental.pallas import tpu as pltpu


# ---------------------------------------------------------------------------
# In-kernel helpers (operate on VMEM-resident values)
# ---------------------------------------------------------------------------
def _add_ln(x, res, gamma, beta, eps):
    y = x + res
    mean = jnp.mean(y, axis=-1, keepdims=True)
    var = jnp.mean(jnp.square(y - mean), axis=-1, keepdims=True)  # biased (PyTorch LN)
    return (y - mean) * lax.rsqrt(var + eps) * gamma + beta


def _attn_core(xq, xkv, key_mask, wq, wk, wv, wo, bo, heads, scale, causal):
    """Multi-head attention for a single batch element, all heads in-kernel.

    xq: [Sq, E], xkv: [Sk, E], key_mask: [1, Sk] (1.0 = keep), weights [E, E].
    wq/wk/wv are block-diagonal (per-head hd x hd projections folded in).
    """
    Sq, E = xq.shape
    Sk = xkv.shape[0]
    hd = E // heads

    # Lane-dense Q/K/V projections: single [S,E] x [E,E] matmuls.
    q = jnp.dot(xq, wq, preferred_element_type=jnp.float32)
    k = jnp.dot(xkv, wk, preferred_element_type=jnp.float32)
    v = jnp.dot(xkv, wv, preferred_element_type=jnp.float32)

    ok = jnp.broadcast_to(key_mask > 0.0, (Sq, Sk))               # pad mask over keys
    if causal:
        row = lax.broadcasted_iota(jnp.int32, (Sq, Sk), 0)
        col = lax.broadcasted_iota(jnp.int32, (Sq, Sk), 1)
        ok = jnp.logical_and(ok, row >= col)

    dn = (((1,), (1,)), ((), ()))  # contract last dim of both (q @ k.T without transpose)
    ctx_heads = []
    for h in range(heads):                                        # static unroll
        sl = slice(h * hd, (h + 1) * hd)
        energy = lax.dot_general(q[:, sl], k[:, sl], dn,
                                 preferred_element_type=jnp.float32)   # [Sq, Sk]
        energy = jnp.where(ok, energy, jnp.float32(-1e20)) * scale     # mask, then /sqrt(E)
        energy = energy - jnp.max(energy, axis=-1, keepdims=True)
        p = jnp.exp(energy)
        inv = pl.reciprocal(jnp.sum(p, axis=-1, keepdims=True), approx=True)
        ctx_heads.append(jnp.dot(p * inv, v[:, sl],
                                 preferred_element_type=jnp.float32))  # [Sq, hd]
    ctx = jnp.concatenate(ctx_heads, axis=-1)                          # [Sq, E] lane-dense
    return jnp.dot(ctx, wo, preferred_element_type=jnp.float32) + bo   # fc_out


# ---------------------------------------------------------------------------
# Pallas kernels
# ---------------------------------------------------------------------------
def _encdec_block_kernel(xq_ref, xkv_ref, m_ref,
                         wq_ref, wk_ref, wv_ref, wo_ref, bo_ref,
                         g1_ref, be1_ref, w1_ref, bf1_ref, w2_ref, bf2_ref,
                         g2_ref, be2_ref, o_ref, *, heads, scale, causal, eps):
    """Fused TransformerBlock: attn -> fc_out -> add&LN -> FFN(ReLU) -> add&LN."""
    xq = xq_ref[...]
    attn = _attn_core(xq, xkv_ref[...], m_ref[...],
                      wq_ref[...], wk_ref[...], wv_ref[...], wo_ref[...], bo_ref[...],
                      heads, scale, causal)
    y = _add_ln(attn, xq, g1_ref[...], be1_ref[...], eps)          # dropout = identity
    h = jnp.dot(y, w1_ref[...], preferred_element_type=jnp.float32) + bf1_ref[...]
    h = jnp.maximum(h, 0.0)                                        # ReLU
    ff = jnp.dot(h, w2_ref[...], preferred_element_type=jnp.float32) + bf2_ref[...]
    o_ref[...] = _add_ln(ff, y, g2_ref[...], be2_ref[...], eps)    # dropout = identity


def _self_attn_ln_kernel(x_ref, m_ref, wq_ref, wk_ref, wv_ref, wo_ref, bo_ref,
                         g_ref, be_ref, o_ref, *, heads, scale, causal, eps):
    """Decoder masked self-attention + residual add + LayerNorm."""
    x = x_ref[...]
    attn = _attn_core(x, x, m_ref[...],
                      wq_ref[...], wk_ref[...], wv_ref[...], wo_ref[...], bo_ref[...],
                      heads, scale, causal)
    o_ref[...] = _add_ln(attn, x, g_ref[...], be_ref[...], eps)


def _out_linear_kernel(x_ref, w_ref, b_ref, o_ref):
    o_ref[...] = (jnp.dot(x_ref[...], w_ref[...], preferred_element_type=jnp.float32)
                  + b_ref[...])


# ---------------------------------------------------------------------------
# pallas_call wrappers
# ---------------------------------------------------------------------------
def _wspec(r, c):
    return pl.BlockSpec((r, c), lambda b: (0, 0))


def fused_block_pallas(xq, xkv, key_mask, p, heads, scale, causal):
    """xq: [B,Sq,E] (query + residual), xkv: [B,Sk,E], key_mask: [B,1,Sk]."""
    B, Sq, E = xq.shape
    Sk = xkv.shape[1]
    F = p["w1"].shape[1]
    ap = p["attn"]
    kernel = functools.partial(_encdec_block_kernel, heads=heads, scale=scale,
                               causal=causal, eps=1e-5)
    return pl.pallas_call(
        kernel,
        out_shape=jax.ShapeDtypeStruct((B, Sq, E), jnp.float32),
        grid=(B,),
        in_specs=[
            pl.BlockSpec((None, Sq, E), lambda b: (b, 0, 0)),   # xq
            pl.BlockSpec((None, Sk, E), lambda b: (b, 0, 0)),   # xkv
            pl.BlockSpec((None, 1, Sk), lambda b: (b, 0, 0)),   # compact key pad mask
            _wspec(E, E), _wspec(E, E), _wspec(E, E),           # wq, wk, wv (block-diag)
            _wspec(E, E), _wspec(1, E),                         # wo, bo
            _wspec(1, E), _wspec(1, E),                         # ln1 gamma/beta
            _wspec(E, F), _wspec(1, F),                         # w1, b1
            _wspec(F, E), _wspec(1, E),                         # w2, b2
            _wspec(1, E), _wspec(1, E),                         # ln2 gamma/beta
        ],
        out_specs=pl.BlockSpec((None, Sq, E), lambda b: (b, 0, 0)),
        compiler_params=pltpu.CompilerParams(dimension_semantics=("parallel",)),
    )(xq, xkv, key_mask,
      ap["wq"], ap["wk"], ap["wv"], ap["wo"], ap["bo"],
      p["ln1_g"], p["ln1_b"],
      p["w1"], p["b1"], p["w2"], p["b2"],
      p["ln2_g"], p["ln2_b"])


def self_attn_ln_pallas(x, key_mask, ap, ln_g, ln_b, heads, scale, causal):
    B, S, E = x.shape
    kernel = functools.partial(_self_attn_ln_kernel, heads=heads, scale=scale,
                               causal=causal, eps=1e-5)
    return pl.pallas_call(
        kernel,
        out_shape=jax.ShapeDtypeStruct((B, S, E), jnp.float32),
        grid=(B,),
        in_specs=[
            pl.BlockSpec((None, S, E), lambda b: (b, 0, 0)),    # x (q=k=v + residual)
            pl.BlockSpec((None, 1, S), lambda b: (b, 0, 0)),    # compact key pad mask
            _wspec(E, E), _wspec(E, E), _wspec(E, E),           # wq, wk, wv
            _wspec(E, E), _wspec(1, E),                         # wo, bo
            _wspec(1, E), _wspec(1, E),                         # ln gamma/beta
        ],
        out_specs=pl.BlockSpec((None, S, E), lambda b: (b, 0, 0)),
        compiler_params=pltpu.CompilerParams(dimension_semantics=("parallel",)),
    )(x, key_mask, ap["wq"], ap["wk"], ap["wv"], ap["wo"], ap["bo"], ln_g, ln_b)


def output_linear_pallas(x, w_pad, b_pad):
    """x: [B,S,E] @ w_pad: [E,Np] + b_pad: [1,Np]; Np is a multiple of 128."""
    B, S, E = x.shape
    Np = w_pad.shape[1]
    out = pl.pallas_call(
        _out_linear_kernel,
        out_shape=jax.ShapeDtypeStruct((B * S, Np), jnp.float32),
    )(x.reshape(B * S, E), w_pad, b_pad)
    return out.reshape(B, S, Np)


# ---------------------------------------------------------------------------
# Model forward (layer orchestration / embedding gather in plain JAX)
# ---------------------------------------------------------------------------
def transformer_forward(params, src, trg, cfg):
    E, H = cfg["embed_size"], cfg["heads"]
    scale = 1.0 / math.sqrt(E)                   # reference scales by sqrt(embed_size)
    B, Ss = src.shape
    _, St = trg.shape
    Vo = cfg["output_vocab_size"]

    # Compact key-pad masks (Sk bytes/batch instead of Sq*Sk*4).
    src_key_mask = (src != cfg["input_pad_idx"]).astype(jnp.float32).reshape(B, 1, Ss)
    trg_key_mask = (trg != cfg["output_pad_idx"]).astype(jnp.float32).reshape(B, 1, St)

    # Encoder
    enc = params["encoder"]
    # TODO(synk): embedding gather is plain-JAX glue.
    x = enc["word_emb"][src] + enc["pos_emb"][jnp.arange(Ss)][None, :, :]
    for lp in enc["layers"]:
        x = fused_block_pallas(x, x, src_key_mask, lp, H, scale, causal=False)
    enc_out = x

    # Decoder
    dec = params["decoder"]
    y = dec["word_emb"][trg] + dec["pos_emb"][jnp.arange(St)][None, :, :]
    for lp in dec["layers"]:
        q = self_attn_ln_pallas(y, trg_key_mask, lp["self_attn"],
                                lp["self_ln_g"], lp["self_ln_b"], H, scale, causal=True)
        y = fused_block_pallas(q, enc_out, src_key_mask, lp["block"], H, scale,
                               causal=False)

    # Final vocab projection (lane-dense padded N), slice back to Vo.
    logits = output_linear_pallas(y, params["out_w"], params["out_b"])
    return logits[:, :, :Vo]


# ---------------------------------------------------------------------------
# Deterministic synthetic parameter init
# ---------------------------------------------------------------------------
def init_params(key, cfg):
    E, H = cfg["embed_size"], cfg["heads"]
    hd = E // H
    F = cfg["forward_expansion"] * E
    Vi, Vo = cfg["input_vocab_size"], cfg["output_vocab_size"]
    L, Smax = cfg["Nx"], cfg["seq_max_len"]
    Vp = ((Vo + 127) // 128) * 128

    keys = iter(jax.random.split(key, 1024))

    def nrm(shape, scale=0.1):
        return scale * jax.random.normal(next(keys), shape, dtype=jnp.float32)

    eyeH = jnp.eye(H, dtype=jnp.float32)

    def attn_params():
        # Per-head shared hd x hd projections folded into block-diagonal E x E
        # weights (same math as applying the hd x hd matrix to each head slice).
        return {"wq": jnp.kron(eyeH, nrm((hd, hd))),
                "wk": jnp.kron(eyeH, nrm((hd, hd))),
                "wv": jnp.kron(eyeH, nrm((hd, hd))),
                "wo": nrm((E, E)), "bo": nrm((1, E), 0.01)}

    def block_params():
        return {"attn": attn_params(),
                "ln1_g": jnp.ones((1, E), jnp.float32),
                "ln1_b": jnp.zeros((1, E), jnp.float32),
                "w1": nrm((E, F)), "b1": nrm((1, F), 0.01),
                "w2": nrm((F, E)), "b2": nrm((1, E), 0.01),
                "ln2_g": jnp.ones((1, E), jnp.float32),
                "ln2_b": jnp.zeros((1, E), jnp.float32)}

    encoder = {"word_emb": nrm((Vi, E), 0.5), "pos_emb": nrm((Smax, E), 0.5),
               "layers": [block_params() for _ in range(L)]}
    decoder = {"word_emb": nrm((Vo, E), 0.5), "pos_emb": nrm((Smax, E), 0.5),
               "layers": [{"self_attn": attn_params(),
                           "self_ln_g": jnp.ones((1, E), jnp.float32),
                           "self_ln_b": jnp.zeros((1, E), jnp.float32),
                           "block": block_params()} for _ in range(L)]}

    # Final linear, pre-padded to a lane-dense (multiple-of-128) output width.
    out_w = jnp.pad(nrm((E, Vo)), ((0, 0), (0, Vp - Vo)))
    out_b = jnp.pad(nrm((1, Vo), 0.01), ((0, 0), (0, Vp - Vo)))
    return {"encoder": encoder, "decoder": decoder, "out_w": out_w, "out_b": out_b}


# ---------------------------------------------------------------------------
if __name__ == "__main__":
    cfg = dict(input_vocab_size=50, output_vocab_size=40,
               input_pad_idx=0, output_pad_idx=0,
               seq_max_len=16, Nx=2, heads=8,
               forward_expansion=4, embed_size=32)

    key = jax.random.PRNGKey(0)
    pk, sk, tk = jax.random.split(key, 3)
    params = init_params(pk, cfg)

    B, Ss, St = 2, 10, 8
    src = jax.random.randint(sk, (B, Ss), 1, cfg["input_vocab_size"], dtype=jnp.int32)
    trg = jax.random.randint(tk, (B, St), 1, cfg["output_vocab_size"], dtype=jnp.int32)
    # pad some trailing positions to exercise the pad masks
    src = src.at[0, 8:].set(cfg["input_pad_idx"])
    trg = trg.at[1, 6:].set(cfg["output_pad_idx"])

    fwd = jax.jit(functools.partial(transformer_forward, cfg=cfg))
    logits = fwd(params, src, trg)
    jax.block_until_ready(logits)

    assert logits.shape == (B, St, cfg["output_vocab_size"]), logits.shape
    assert bool(jnp.all(jnp.isfinite(logits)))
    print("KERNEL_OK")
</pallas_src>

<mosaic_0001>
module attributes {stable_mosaic.version = 11 : i64} {
  func.func @_encdec_block_kernel(%arg0: i32, %arg1: memref<1x10x32xf32, #tpu.memory_space<vmem>>, %arg2: memref<1x10x32xf32, #tpu.memory_space<vmem>>, %arg3: memref<1x1x10xf32, #tpu.memory_space<vmem>>, %arg4: memref<32x32xf32, #tpu.memory_space<vmem>>, %arg5: memref<32x32xf32, #tpu.memory_space<vmem>>, %arg6: memref<32x32xf32, #tpu.memory_space<vmem>>, %arg7: memref<32x32xf32, #tpu.memory_space<vmem>>, %arg8: memref<1x32xf32, #tpu.memory_space<vmem>>, %arg9: memref<1x32xf32, #tpu.memory_space<vmem>>, %arg10: memref<1x32xf32, #tpu.memory_space<vmem>>, %arg11: memref<32x128xf32, #tpu.memory_space<vmem>>, %arg12: memref<1x128xf32, #tpu.memory_space<vmem>>, %arg13: memref<128x32xf32, #tpu.memory_space<vmem>>, %arg14: memref<1x32xf32, #tpu.memory_space<vmem>>, %arg15: memref<1x32xf32, #tpu.memory_space<vmem>>, %arg16: memref<1x32xf32, #tpu.memory_space<vmem>>, %arg17: memref<1x10x32xf32, #tpu.memory_space<vmem>>) attributes {dimension_semantics = [#tpu.dimension_semantics<parallel>], iteration_bounds = array<i64: 2>, scalar_prefetch = 0 : i64, scratch_operands = 0 : i64, tpu.core_type = #tpu.core_type<tc>, window_params = [{transform_indices = @transform_0, window_bounds = array<i64: 1, 10, 32>}, {transform_indices = @transform_1, window_bounds = array<i64: 1, 10, 32>}, {transform_indices = @transform_2, window_bounds = array<i64: 1, 1, 10>}, {pipeline_mode = #tpu.pipeline_mode<synchronous>, transform_indices = @transform_3, window_bounds = array<i64: 32, 32>}, {pipeline_mode = #tpu.pipeline_mode<synchronous>, transform_indices = @transform_4, window_bounds = array<i64: 32, 32>}, {pipeline_mode = #tpu.pipeline_mode<synchronous>, transform_indices = @transform_5, window_bounds = array<i64: 32, 32>}, {pipeline_mode = #tpu.pipeline_mode<synchronous>, transform_indices = @transform_6, window_bounds = array<i64: 32, 32>}, {pipeline_mode = #tpu.pipeline_mode<synchronous>, transform_indices = @transform_7, window_bounds = array<i64: 1, 32>}, {pipeline_mode = #tpu.pipeline_mode<synchronous>, transform_indices = @transform_8, window_bounds = array<i64: 1, 32>}, {pipeline_mode = #tpu.pipeline_mode<synchronous>, transform_indices = @transform_9, window_bounds = array<i64: 1, 32>}, {pipeline_mode = #tpu.pipeline_mode<synchronous>, transform_indices = @transform_10, window_bounds = array<i64: 32, 128>}, {pipeline_mode = #tpu.pipeline_mode<synchronous>, transform_indices = @transform_11, window_bounds = array<i64: 1, 128>}, {pipeline_mode = #tpu.pipeline_mode<synchronous>, transform_indices = @transform_12, window_bounds = array<i64: 128, 32>}, {pipeline_mode = #tpu.pipeline_mode<synchronous>, transform_indices = @transform_13, window_bounds = array<i64: 1, 32>}, {pipeline_mode = #tpu.pipeline_mode<synchronous>, transform_indices = @transform_14, window_bounds = array<i64: 1, 32>}, {pipeline_mode = #tpu.pipeline_mode<synchronous>, transform_indices = @transform_15, window_bounds = array<i64: 1, 32>}, {transform_indices = @transform_16, window_bounds = array<i64: 1, 10, 32>}]} {
    %c0 = arith.constant 0 : index
    %c0_0 = arith.constant 0 : index
    %c0_1 = arith.constant 0 : index
    %0 = vector.load %arg1[%c0, %c0_0, %c0_1] : memref<1x10x32xf32, #tpu.memory_space<vmem>>, vector<1x10x32xf32>
    %1 = vector.shape_cast %0 : vector<1x10x32xf32> to vector<10x32xf32>
    %c0_2 = arith.constant 0 : index
    %c0_3 = arith.constant 0 : index
    %c0_4 = arith.constant 0 : index
    %2 = vector.load %arg2[%c0_2, %c0_3, %c0_4] : memref<1x10x32xf32, #tpu.memory_space<vmem>>, vector<1x10x32xf32>
    %3 = vector.shape_cast %2 : vector<1x10x32xf32> to vector<10x32xf32>
    %c0_5 = arith.constant 0 : index
    %c0_6 = arith.constant 0 : index
    %c0_7 = arith.constant 0 : index
    %4 = vector.load %arg3[%c0_5, %c0_6, %c0_7] : memref<1x1x10xf32, #tpu.memory_space<vmem>>, vector<1x1x10xf32>
    %5 = vector.shape_cast %4 : vector<1x1x10xf32> to vector<1x10xf32>
    %c0_8 = arith.constant 0 : index
    %c0_9 = arith.constant 0 : index
    %6 = vector.load %arg4[%c0_8, %c0_9] : memref<32x32xf32, #tpu.memory_space<vmem>>, vector<32x32xf32>
    %c0_10 = arith.constant 0 : index
    %c0_11 = arith.constant 0 : index
    %7 = vector.load %arg5[%c0_10, %c0_11] : memref<32x32xf32, #tpu.memory_space<vmem>>, vector<32x32xf32>
    %c0_12 = arith.constant 0 : index
    %c0_13 = arith.constant 0 : index
    %8 = vector.load %arg6[%c0_12, %c0_13] : memref<32x32xf32, #tpu.memory_space<vmem>>, vector<32x32xf32>
    %c0_14 = arith.constant 0 : index
    %c0_15 = arith.constant 0 : index
    %9 = vector.load %arg7[%c0_14, %c0_15] : memref<32x32xf32, #tpu.memory_space<vmem>>, vector<32x32xf32>
    %c0_16 = arith.constant 0 : index
    %c0_17 = arith.constant 0 : index
    %10 = vector.load %arg8[%c0_16, %c0_17] : memref<1x32xf32, #tpu.memory_space<vmem>>, vector<1x32xf32>
    %cst = arith.constant dense<0.000000e+00> : vector<10x32xf32>
    %11 = tpu.matmul %1, %6, %cst {dimension_numbers = #tpu.dot_dimension_numbers<[1], [0], [0], [1], [0, 0, 1, 1], [], []>} : vector<10x32xf32>, vector<32x32xf32>, vector<10x32xf32> -> vector<10x32xf32>
    %cst_18 = arith.constant dense<0.000000e+00> : vector<10x32xf32>
    %12 = tpu.matmul %3, %7, %cst_18 {dimension_numbers = #tpu.dot_dimension_numbers<[1], [0], [0], [1], [0, 0, 1, 1], [], []>} : vector<10x32xf32>, vector<32x32xf32>, vector<10x32xf32> -> vector<10x32xf32>
    %cst_19 = arith.constant dense<0.000000e+00> : vector<10x32xf32>
    %13 = tpu.matmul %3, %8, %cst_19 {dimension_numbers = #tpu.dot_dimension_numbers<[1], [0], [0], [1], [0, 0, 1, 1], [], []>} : vector<10x32xf32>, vector<32x32xf32>, vector<10x32xf32> -> vector<10x32xf32>
    %cst_20 = arith.constant 0.000000e+00 : f32
    %14 = vector.broadcast %cst_20 : f32 to vector<1x10xf32>
    %15 = arith.cmpf ogt, %5, %14 : vector<1x10xf32>
    %16 = vector.shape_cast %15 : vector<1x10xi1> to vector<1x10xi1>
    %17 = vector.broadcast %16 : vector<1x10xi1> to vector<10x10xi1>
    %18 = vector.extract_strided_slice %11 {offsets = [0, 0], sizes = [10, 4], strides = [1, 1]} : vector<10x32xf32> to vector<10x4xf32>
    %19 = vector.extract_strided_slice %12 {offsets = [0, 0], sizes = [10, 4], strides = [1, 1]} : vector<10x32xf32> to vector<10x4xf32>
    %cst_21 = arith.constant dense<0.000000e+00> : vector<10x10xf32>
    %20 = tpu.matmul %18, %19, %cst_21 {dimension_numbers = #tpu.dot_dimension_numbers<[1], [1], [0], [0], [0, 0, 1, 0], [], []>} : vector<10x4xf32>, vector<10x4xf32>, vector<10x10xf32> -> vector<10x10xf32>
    %cst_22 = arith.constant -1.000000e+20 : f32
    %21 = vector.broadcast %cst_22 : f32 to vector<10x10xf32>
    %22 = arith.select %17, %20, %21 : vector<10x10xi1>, vector<10x10xf32>
    %cst_23 = arith.constant 0.176776692 : f32
    %23 = vector.broadcast %cst_23 : f32 to vector<10x10xf32>
    %24 = arith.mulf %22, %23 : vector<10x10xf32>
    %cst_24 = arith.constant dense<0xFF800000> : vector<10xf32>
    %25 = vector.multi_reduction <maximumf>, %24, %cst_24 [1] : vector<10x10xf32> to vector<10xf32>
    %26 = vector.shape_cast %25 : vector<10xf32> to vector<10x1xf32>
    %27 = vector.broadcast %26 : vector<10x1xf32> to vector<10x10xf32>
    %28 = arith.subf %24, %27 : vector<10x10xf32>
    %29 = math.exp %28 : vector<10x10xf32>
    %cst_25 = arith.constant dense<0.000000e+00> : vector<10xf32>
    %30 = vector.multi_reduction <add>, %29, %cst_25 [1] : vector<10x10xf32> to vector<10xf32>
    %31 = vector.shape_cast %30 : vector<10xf32> to vector<10x1xf32>
    %32 = tpu.reciprocal %31 {approx = true} : vector<10x1xf32> -> vector<10x1xf32>
    %33 = vector.broadcast %32 : vector<10x1xf32> to vector<10x10xf32>
    %34 = arith.mulf %29, %33 : vector<10x10xf32>
    %35 = vector.extract_strided_slice %13 {offsets = [0, 0], sizes = [10, 4], strides = [1, 1]} : vector<10x32xf32> to vector<10x4xf32>
    %cst_26 = arith.constant dense<0.000000e+00> : vector<10x4xf32>
    %36 = tpu.matmul %34, %35, %cst_26 {dimension_numbers = #tpu.dot_dimension_numbers<[1], [0], [0], [1], [0, 0, 1, 1], [], []>} : vector<10x10xf32>, vector<10x4xf32>, vector<10x4xf32> -> vector<10x4xf32>
    %37 = vector.extract_strided_slice %11 {offsets = [0, 4], sizes = [10, 4], strides = [1, 1]} : vector<10x32xf32> to vector<10x4xf32>
    %38 = vector.extract_strided_slice %12 {offsets = [0, 4], sizes = [10, 4], strides = [1, 1]} : vector<10x32xf32> to vector<10x4xf32>
    %cst_27 = arith.constant dense<0.000000e+00> : vector<10x10xf32>
    %39 = tpu.matmul %37, %38, %cst_27 {dimension_numbers = #tpu.dot_dimension_numbers<[1], [1], [0], [0], [0, 0, 1, 0], [], []>} : vector<10x4xf32>, vector<10x4xf32>, vector<10x10xf32> -> vector<10x10xf32>
    %cst_28 = arith.constant -1.000000e+20 : f32
    %40 = vector.broadcast %cst_28 : f32 to vector<10x10xf32>
    %41 = arith.select %17, %39, %40 : vector<10x10xi1>, vector<10x10xf32>
    %cst_29 = arith.constant 0.176776692 : f32
    %42 = vector.broadcast %cst_29 : f32 to vector<10x10xf32>
    %43 = arith.mulf %41, %42 : vector<10x10xf32>
    %cst_30 = arith.constant dense<0xFF800000> : vector<10xf32>
    %44 = vector.multi_reduction <maximumf>, %43, %cst_30 [1] : vector<10x10xf32> to vector<10xf32>
    %45 = vector.shape_cast %44 : vector<10xf32> to vector<10x1xf32>
    %46 = vector.broadcast %45 : vector<10x1xf32> to vector<10x10xf32>
    %47 = arith.subf %43, %46 : vector<10x10xf32>
    %48 = math.exp %47 : vector<10x10xf32>
    %cst_31 = arith.constant dense<0.000000e+00> : vector<10xf32>
    %49 = vector.multi_reduction <add>, %48, %cst_31 [1] : vector<10x10xf32> to vector<10xf32>
    %50 = vector.shape_cast %49 : vector<10xf32> to vector<10x1xf32>
    %51 = tpu.reciprocal %50 {approx = true} : vector<10x1xf32> -> vector<10x1xf32>
    %52 = vector.broadcast %51 : vector<10x1xf32> to vector<10x10xf32>
    %53 = arith.mulf %48, %52 : vector<10x10xf32>
    %54 = vector.extract_strided_slice %13 {offsets = [0, 4], sizes = [10, 4], strides = [1, 1]} : vector<10x32xf32> to vector<10x4xf32>
    %cst_32 = arith.constant dense<0.000000e+00> : vector<10x4xf32>
    %55 = tpu.matmul %53, %54, %cst_32 {dimension_numbers = #tpu.dot_dimension_numbers<[1], [0], [0], [1], [0, 0, 1, 1], [], []>} : vector<10x10xf32>, vector<10x4xf32>, vector<10x4xf32> -> vector<10x4xf32>
    %56 = vector.extract_strided_slice %11 {offsets = [0, 8], sizes = [10, 4], strides = [1, 1]} : vector<10x32xf32> to vector<10x4xf32>
    %57 = vector.extract_strided_slice %12 {offsets = [0, 8], sizes = [10, 4], strides = [1, 1]} : vector<10x32xf32> to vector<10x4xf32>
    %cst_33 = arith.constant dense<0.000000e+00> : vector<10x10xf32>
    %58 = tpu.matmul %56, %57, %cst_33 {dimension_numbers = #tpu.dot_dimension_numbers<[1], [1], [0], [0], [0, 0, 1, 0], [], []>} : vector<10x4xf32>, vector<10x4xf32>, vector<10x10xf32> -> vector<10x10xf32>
    %cst_34 = arith.constant -1.000000e+20 : f32
    %59 = vector.broadcast %cst_34 : f32 to vector<10x10xf32>
    %60 = arith.select %17, %58, %59 : vector<10x10xi1>, vector<10x10xf32>
    %cst_35 = arith.constant 0.176776692 : f32
    %61 = vector.broadcast %cst_35 : f32 to vector<10x10xf32>
    %62 = arith.mulf %60, %61 : vector<10x10xf32>
    %cst_36 = arith.constant dense<0xFF800000> : vector<10xf32>
    %63 = vector.multi_reduction <maximumf>, %62, %cst_36 [1] : vector<10x10xf32> to vector<10xf32>
    %64 = vector.shape_cast %63 : vector<10xf32> to vector<10x1xf32>
    %65 = vector.broadcast %64 : vector<10x1xf32> to vector<10x10xf32>
    %66 = arith.subf %62, %65 : vector<10x10xf32>
    %67 = math.exp %66 : vector<10x10xf32>
    %cst_37 = arith.constant dense<0.000000e+00> : vector<10xf32>
    %68 = vector.multi_reduction <add>, %67, %cst_37 [1] : vector<10x10xf32> to vector<10xf32>
    %69 = vector.shape_cast %68 : vector<10xf32> to vector<10x1xf32>
    %70 = tpu.reciprocal %69 {approx = true} : vector<10x1xf32> -> vector<10x1xf32>
    %71 = vector.broadcast %70 : vector<10x1xf32> to vector<10x10xf32>
    %72 = arith.mulf %67, %71 : vector<10x10xf32>
    %73 = vector.extract_strided_slice %13 {offsets = [0, 8], sizes = [10, 4], strides = [1, 1]} : vector<10x32xf32> to vector<10x4xf32>
    %cst_38 = arith.constant dense<0.000000e+00> : vector<10x4xf32>
    %74 = tpu.matmul %72, %73, %cst_38 {dimension_numbers = #tpu.dot_dimension_numbers<[1], [0], [0], [1], [0, 0, 1, 1], [], []>} : vector<10x10xf32>, vector<10x4xf32>, vector<10x4xf32> -> vector<10x4xf32>
    %75 = vector.extract_strided_slice %11 {offsets = [0, 12], sizes = [10, 4], strides = [1, 1]} : vector<10x32xf32> to vector<10x4xf32>
    %76 = vector.extract_strided_slice %12 {offsets = [0, 12], sizes = [10, 4], strides = [1, 1]} : vector<10x32xf32> to vector<10x4xf32>
    %cst_39 = arith.constant dense<0.000000e+00> : vector<10x10xf32>
    %77 = tpu.matmul %75, %76, %cst_39 {dimension_numbers = #tpu.dot_dimension_numbers<[1], [1], [0], [0], [0, 0, 1, 0], [], []>} : vector<10x4xf32>, vector<10x4xf32>, vector<10x10xf32> -> vector<10x10xf32>
    %cst_40 = arith.constant -1.000000e+20 : f32
    %78 = vector.broadcast %cst_40 : f32 to vector<10x10xf32>
    %79 = arith.select %17, %77, %78 : vector<10x10xi1>, vector<10x10xf32>
    %cst_41 = arith.constant 0.176776692 : f32
    %80 = vector.broadcast %cst_41 : f32 to vector<10x10xf32>
    %81 = arith.mulf %79, %80 : vector<10x10xf32>
    %cst_42 = arith.constant dense<0xFF800000> : vector<10xf32>
    %82 = vector.multi_reduction <maximumf>, %81, %cst_42 [1] : vector<10x10xf32> to vector<10xf32>
    %83 = vector.shape_cast %82 : vector<10xf32> to vector<10x1xf32>
    %84 = vector.broadcast %83 : vector<10x1xf32> to vector<10x10xf32>
    %85 = arith.subf %81, %84 : vector<10x10xf32>
    %86 = math.exp %85 : vector<10x10xf32>
    %cst_43 = arith.constant dense<0.000000e+00> : vector<10xf32>
    %87 = vector.multi_reduction <add>, %86, %cst_43 [1] : vector<10x10xf32> to vector<10xf32>
    %88 = vector.shape_cast %87 : vector<10xf32> to vector<10x1xf32>
    %89 = tpu.reciprocal %88 {approx = true} : vector<10x1xf32> -> vector<10x1xf32>
    %90 = vector.broadcast %89 : vector<10x1xf32> to vector<10x10xf32>
    %91 = arith.mulf %86, %90 : vector<10x10xf32>
    %92 = vector.extract_strided_slice %13 {offsets = [0, 12], sizes = [10, 4], strides = [1, 1]} : vector<10x32xf32> to vector<10x4xf32>
    %cst_44 = arith.constant dense<0.000000e+00> : vector<10x4xf32>
    %93 = tpu.matmul %91, %92, %cst_44 {dimension_numbers = #tpu.dot_dimension_numbers<[1], [0], [0], [1], [0, 0, 1, 1], [], []>} : vector<10x10xf32>, vector<10x4xf32>, vector<10x4xf32> -> vector<10x4xf32>
    %94 = vector.extract_strided_slice %11 {offsets = [0, 16], sizes = [10, 4], strides = [1, 1]} : vector<10x32xf32> to vector<10x4xf32>
    %95 = vector.extract_strided_slice %12 {offsets = [0, 16], sizes = [10, 4], strides = [1, 1]} : vector<10x32xf32> to vector<10x4xf32>
    %cst_45 = arith.constant dense<0.000000e+00> : vector<10x10xf32>
    %96 = tpu.matmul %94, %95, %cst_45 {dimension_numbers = #tpu.dot_dimension_numbers<[1], [1], [0], [0], [0, 0, 1, 0], [], []>} : vector<10x4xf32>, vector<10x4xf32>, vector<10x10xf32> -> vector<10x10xf32>
    %cst_46 = arith.constant -1.000000e+20 : f32
    %97 = vector.broadcast %cst_46 : f32 to vector<10x10xf32>
    %98 = arith.select %17, %96, %97 : vector<10x10xi1>, vector<10x10xf32>
    %cst_47 = arith.constant 0.176776692 : f32
    %99 = vector.broadcast %cst_47 : f32 to vector<10x10xf32>
    %100 = arith.mulf %98, %99 : vector<10x10xf32>
    %cst_48 = arith.constant dense<0xFF800000> : vector<10xf32>
    %101 = vector.multi_reduction <maximumf>, %100, %cst_48 [1] : vector<10x10xf32> to vector<10xf32>
    %102 = vector.shape_cast %101 : vector<10xf32> to vector<10x1xf32>
    %103 = vector.broadcast %102 : vector<10x1xf32> to vector<10x10xf32>
    %104 = arith.subf %100, %103 : vector<10x10xf32>
    %105 = math.exp %104 : vector<10x10xf32>
    %cst_49 = arith.constant dense<0.000000e+00> : vector<10xf32>
    %106 = vector.multi_reduction <add>, %105, %cst_49 [1] : vector<10x10xf32> to vector<10xf32>
    %107 = vector.shape_cast %106 : vector<10xf32> to vector<10x1xf32>
    %108 = tpu.reciprocal %107 {approx = true} : vector<10x1xf32> -> vector<10x1xf32>
    %109 = vector.broadcast %108 : vector<10x1xf32> to vector<10x10xf32>
    %110 = arith.mulf %105, %109 : vector<10x10xf32>
    %111 = vector.extract_strided_slice %13 {offsets = [0, 16], sizes = [10, 4], strides = [1, 1]} : vector<10x32xf32> to vector<10x4xf32>
    %cst_50 = arith.constant dense<0.000000e+00> : vector<10x4xf32>
    %112 = tpu.matmul %110, %111, %cst_50 {dimension_numbers = #tpu.dot_dimension_numbers<[1], [0], [0], [1], [0, 0, 1, 1], [], []>} : vector<10x10xf32>, vector<10x4xf32>, vector<10x4xf32> -> vector<10x4xf32>
    %113 = vector.extract_strided_slice %11 {offsets = [0, 20], sizes = [10, 4], strides = [1, 1]} : vector<10x32xf32> to vector<10x4xf32>
    %114 = vector.extract_strided_slice %12 {offsets = [0, 20], sizes = [10, 4], strides = [1, 1]} : vector<10x32xf32> to vector<10x4xf32>
    %cst_51 = arith.constant dense<0.000000e+00> : vector<10x10xf32>
    %115 = tpu.matmul %113, %114, %cst_51 {dimension_numbers = #tpu.dot_dimension_numbers<[1], [1], [0], [0], [0, 0, 1, 0], [], []>} : vector<10x4xf32>, vector<10x4xf32>, vector<10x10xf32> -> vector<10x10xf32>
    %cst_52 = arith.constant -1.000000e+20 : f32
    %116 = vector.broadcast %cst_52 : f32 to vector<10x10xf32>
    %117 = arith.select %17, %115, %116 : vector<10x10xi1>, vector<10x10xf32>
    %cst_53 = arith.constant 0.176776692 : f32
    %118 = vector.broadcast %cst_53 : f32 to vector<10x10xf32>
    %119 = arith.mulf %117, %118 : vector<10x10xf32>
    %cst_54 = arith.constant dense<0xFF800000> : vector<10xf32>
    %120 = vector.multi_reduction <maximumf>, %119, %cst_54 [1] : vector<10x10xf32> to vector<10xf32>
    %121 = vector.shape_cast %120 : vector<10xf32> to vector<10x1xf32>
    %122 = vector.broadcast %121 : vector<10x1xf32> to vector<10x10xf32>
    %123 = arith.subf %119, %122 : vector<10x10xf32>
    %124 = math.exp %123 : vector<10x10xf32>
    %cst_55 = arith.constant dense<0.000000e+00> : vector<10xf32>
    %125 = vector.multi_reduction <add>, %124, %cst_55 [1] : vector<10x10xf32> to vector<10xf32>
    %126 = vector.shape_cast %125 : vector<10xf32> to vector<10x1xf32>
    %127 = tpu.reciprocal %126 {approx = true} : vector<10x1xf32> -> vector<10x1xf32>
    %128 = vector.broadcast %127 : vector<10x1xf32> to vector<10x10xf32>
    %129 = arith.mulf %124, %128 : vector<10x10xf32>
    %130 = vector.extract_strided_slice %13 {offsets = [0, 20], sizes = [10, 4], strides = [1, 1]} : vector<10x32xf32> to vector<10x4xf32>
    %cst_56 = arith.constant dense<0.000000e+00> : vector<10x4xf32>
    %131 = tpu.matmul %129, %130, %cst_56 {dimension_numbers = #tpu.dot_dimension_numbers<[1], [0], [0], [1], [0, 0, 1, 1], [], []>} : vector<10x10xf32>, vector<10x4xf32>, vector<10x4xf32> -> vector<10x4xf32>
    %132 = vector.extract_strided_slice %11 {offsets = [0, 24], sizes = [10, 4], strides = [1, 1]} : vector<10x32xf32> to vector<10x4xf32>
    %133 = vector.extract_strided_slice %12 {offsets = [0, 24], sizes = [10, 4], strides = [1, 1]} : vector<10x32xf32> to vector<10x4xf32>
    %cst_57 = arith.constant dense<0.000000e+00> : vector<10x10xf32>
    %134 = tpu.matmul %132, %133, %cst_57 {dimension_numbers = #tpu.dot_dimension_numbers<[1], [1], [0], [0], [0, 0, 1, 0], [], []>} : vector<10x4xf32>, vector<10x4xf32>, vector<10x10xf32> -> vector<10x10xf32>
    %cst_58 = arith.constant -1.000000e+20 : f32
    %135 = vector.broadcast %cst_58 : f32 to vector<10x10xf32>
    %136 = arith.select %17, %134, %135 : vector<10x10xi1>, vector<10x10xf32>
    %cst_59 = arith.constant 0.176776692 : f32
    %137 = vector.broadcast %cst_59 : f32 to vector<10x10xf32>
    %138 = arith.mulf %136, %137 : vector<10x10xf32>
    %cst_60 = arith.constant dense<0xFF800000> : vector<10xf32>
    %139 = vector.multi_reduction <maximumf>, %138, %cst_60 [1] : vector<10x10xf32> to vector<10xf32>
    %140 = vector.shape_cast %139 : vector<10xf32> to vector<10x1xf32>
    %141 = vector.broadcast %140 : vector<10x1xf32> to vector<10x10xf32>
    %142 = arith.subf %138, %141 : vector<10x10xf32>
    %143 = math.exp %142 : vector<10x10xf32>
    %cst_61 = arith.constant dense<0.000000e+00> : vector<10xf32>
    %144 = vector.multi_reduction <add>, %143, %cst_61 [1] : vector<10x10xf32> to vector<10xf32>
    %145 = vector.shape_cast %144 : vector<10xf32> to vector<10x1xf32>
    %146 = tpu.reciprocal %145 {approx = true} : vector<10x1xf32> -> vector<10x1xf32>
    %147 = vector.broadcast %146 : vector<10x1xf32> to vector<10x10xf32>
    %148 = arith.mulf %143, %147 : vector<10x10xf32>
    %149 = vector.extract_strided_slice %13 {offsets = [0, 24], sizes = [10, 4], strides = [1, 1]} : vector<10x32xf32> to vector<10x4xf32>
    %cst_62 = arith.constant dense<0.000000e+00> : vector<10x4xf32>
    %150 = tpu.matmul %148, %149, %cst_62 {dimension_numbers = #tpu.dot_dimension_numbers<[1], [0], [0], [1], [0, 0, 1, 1], [], []>} : vector<10x10xf32>, vector<10x4xf32>, vector<10x4xf32> -> vector<10x4xf32>
    %151 = vector.extract_strided_slice %11 {offsets = [0, 28], sizes = [10, 4], strides = [1, 1]} : vector<10x32xf32> to vector<10x4xf32>
    %152 = vector.extract_strided_slice %12 {offsets = [0, 28], sizes = [10, 4], strides = [1, 1]} : vector<10x32xf32> to vector<10x4xf32>
    %cst_63 = arith.constant dense<0.000000e+00> : vector<10x10xf32>
    %153 = tpu.matmul %151, %152, %cst_63 {dimension_numbers = #tpu.dot_dimension_numbers<[1], [1], [0], [0], [0, 0, 1, 0], [], []>} : vector<10x4xf32>, vector<10x4xf32>, vector<10x10xf32> -> vector<10x10xf32>
    %cst_64 = arith.constant -1.000000e+20 : f32
    %154 = vector.broadcast %cst_64 : f32 to vector<10x10xf32>
    %155 = arith.select %17, %153, %154 : vector<10x10xi1>, vector<10x10xf32>
    %cst_65 = arith.constant 0.176776692 : f32
    %156 = vector.broadcast %cst_65 : f32 to vector<10x10xf32>
    %157 = arith.mulf %155, %156 : vector<10x10xf32>
    %cst_66 = arith.constant dense<0xFF800000> : vector<10xf32>
    %158 = vector.multi_reduction <maximumf>, %157, %cst_66 [1] : vector<10x10xf32> to vector<10xf32>
    %159 = vector.shape_cast %158 : vector<10xf32> to vector<10x1xf32>
    %160 = vector.broadcast %159 : vector<10x1xf32> to vector<10x10xf32>
    %161 = arith.subf %157, %160 : vector<10x10xf32>
    %162 = math.exp %161 : vector<10x10xf32>
    %cst_67 = arith.constant dense<0.000000e+00> : vector<10xf32>
    %163 = vector.multi_reduction <add>, %162, %cst_67 [1] : vector<10x10xf32> to vector<10xf32>
    %164 = vector.shape_cast %163 : vector<10xf32> to vector<10x1xf32>
    %165 = tpu.reciprocal %164 {approx = true} : vector<10x1xf32> -> vector<10x1xf32>
    %166 = vector.broadcast %165 : vector<10x1xf32> to vector<10x10xf32>
    %167 = arith.mulf %162, %166 : vector<10x10xf32>
    %168 = vector.extract_strided_slice %13 {offsets = [0, 28], sizes = [10, 4], strides = [1, 1]} : vector<10x32xf32> to vector<10x4xf32>
    %cst_68 = arith.constant dense<0.000000e+00> : vector<10x4xf32>
    %169 = tpu.matmul %167, %168, %cst_68 {dimension_numbers = #tpu.dot_dimension_numbers<[1], [0], [0], [1], [0, 0, 1, 1], [], []>} : vector<10x10xf32>, vector<10x4xf32>, vector<10x4xf32> -> vector<10x4xf32>
    %170 = tpu.concatenate %36, %55, %74, %93, %112, %131, %150, %169 in 1 : vector<10x4xf32>, vector<10x4xf32>, vector<10x4xf32>, vector<10x4xf32>, vector<10x4xf32>, vector<10x4xf32>, vector<10x4xf32>, vector<10x4xf32> -> vector<10x32xf32>
    %cst_69 = arith.constant dense<0.000000e+00> : vector<10x32xf32>
    %171 = tpu.matmul %170, %9, %cst_69 {dimension_numbers = #tpu.dot_dimension_numbers<[1], [0], [0], [1], [0, 0, 1, 1], [], []>} : vector<10x32xf32>, vector<32x32xf32>, vector<10x32xf32> -> vector<10x32xf32>
    %172 = vector.broadcast %10 : vector<1x32xf32> to vector<10x32xf32>
    %173 = arith.addf %171, %172 : vector<10x32xf32>
    %c0_70 = arith.constant 0 : index
    %c0_71 = arith.constant 0 : index
    %174 = vector.load %arg9[%c0_70, %c0_71] : memref<1x32xf32, #tpu.memory_space<vmem>>, vector<1x32xf32>
    %c0_72 = arith.constant 0 : index
    %c0_73 = arith.constant 0 : index
    %175 = vector.load %arg10[%c0_72, %c0_73] : memref<1x32xf32, #tpu.memory_space<vmem>>, vector<1x32xf32>
    %176 = arith.addf %173, %1 : vector<10x32xf32>
    %cst_74 = arith.constant dense<0.000000e+00> : vector<10xf32>
    %177 = vector.multi_reduction <add>, %176, %cst_74 [1] : vector<10x32xf32> to vector<10xf32>
    %178 = vector.shape_cast %177 : vector<10xf32> to vector<10x1xf32>
    %cst_75 = arith.constant 3.200000e+01 : f32
    %179 = vector.broadcast %cst_75 : f32 to vector<10x1xf32>
    %180 = arith.divf %178, %179 : vector<10x1xf32>
    %181 = vector.broadcast %180 : vector<10x1xf32> to vector<10x32xf32>
    %182 = arith.subf %176, %181 : vector<10x32xf32>
    %183 = arith.mulf %182, %182 : vector<10x32xf32>
    %cst_76 = arith.constant dense<0.000000e+00> : vector<10xf32>
    %184 = vector.multi_reduction <add>, %183, %cst_76 [1] : vector<10x32xf32> to vector<10xf32>
    %185 = vector.shape_cast %184 : vector<10xf32> to vector<10x1xf32>
    %cst_77 = arith.constant 3.200000e+01 : f32
    %186 = vector.broadcast %cst_77 : f32 to vector<10x1xf32>
    %187 = arith.divf %185, %186 : vector<10x1xf32>
    %188 = vector.broadcast %180 : vector<10x1xf32> to vector<10x32xf32>
    %189 = arith.subf %176, %188 : vector<10x32xf32>
    %cst_78 = arith.constant 9.99999974E-6 : f32
    %190 = vector.broadcast %cst_78 : f32 to vector<10x1xf32>
    %191 = arith.addf %187, %190 : vector<10x1xf32>
    %192 = math.rsqrt %191 : vector<10x1xf32>
    %193 = vector.broadcast %192 : vector<10x1xf32> to vector<10x32xf32>
    %194 = arith.mulf %189, %193 : vector<10x32xf32>
    %195 = vector.broadcast %174 : vector<1x32xf32> to vector<10x32xf32>
    %196 = arith.mulf %194, %195 : vector<10x32xf32>
    %197 = vector.broadcast %175 : vector<1x32xf32> to vector<10x32xf32>
    %198 = arith.addf %196, %197 : vector<10x32xf32>
    %c0_79 = arith.constant 0 : index
    %c0_80 = arith.constant 0 : index
    %199 = vector.load %arg11[%c0_79, %c0_80] : memref<32x128xf32, #tpu.memory_space<vmem>>, vector<32x128xf32>
    %cst_81 = arith.constant dense<0.000000e+00> : vector<10x128xf32>
    %200 = tpu.matmul %198, %199, %cst_81 {dimension_numbers = #tpu.dot_dimension_numbers<[1], [0], [0], [1], [0, 0, 1, 1], [], []>} : vector<10x32xf32>, vector<32x128xf32>, vector<10x128xf32> -> vector<10x128xf32>
    %c0_82 = arith.constant 0 : index
    %c0_83 = arith.constant 0 : index
    %201 = vector.load %arg12[%c0_82, %c0_83] : memref<1x128xf32, #tpu.memory_space<vmem>>, vector<1x128xf32>
    %202 = vector.broadcast %201 : vector<1x128xf32> to vector<10x128xf32>
    %203 = arith.addf %200, %202 : vector<10x128xf32>
    %cst_84 = arith.constant 0.000000e+00 : f32
    %204 = vector.broadcast %cst_84 : f32 to vector<10x128xf32>
    %205 = arith.maximumf %203, %204 : vector<10x128xf32>
    %c0_85 = arith.constant 0 : index
    %c0_86 = arith.constant 0 : index
    %206 = vector.load %arg13[%c0_85, %c0_86] : memref<128x32xf32, #tpu.memory_space<vmem>>, vector<128x32xf32>
    %cst_87 = arith.constant dense<0.000000e+00> : vector<10x32xf32>
    %207 = tpu.matmul %205, %206, %cst_87 {dimension_numbers = #tpu.dot_dimension_numbers<[1], [0], [0], [1], [0, 0, 1, 1], [], []>} : vector<10x128xf32>, vector<128x32xf32>, vector<10x32xf32> -> vector<10x32xf32>
    %c0_88 = arith.constant 0 : index
    %c0_89 = arith.constant 0 : index
    %208 = vector.load %arg14[%c0_88, %c0_89] : memref<1x32xf32, #tpu.memory_space<vmem>>, vector<1x32xf32>
    %209 = vector.broadcast %208 : vector<1x32xf32> to vector<10x32xf32>
    %210 = arith.addf %207, %209 : vector<10x32xf32>
    %c0_90 = arith.constant 0 : index
    %c0_91 = arith.constant 0 : index
    %211 = vector.load %arg15[%c0_90, %c0_91] : memref<1x32xf32, #tpu.memory_space<vmem>>, vector<1x32xf32>
    %c0_92 = arith.constant 0 : index
    %c0_93 = arith.constant 0 : index
    %212 = vector.load %arg16[%c0_92, %c0_93] : memref<1x32xf32, #tpu.memory_space<vmem>>, vector<1x32xf32>
    %213 = arith.addf %210, %198 : vector<10x32xf32>
    %cst_94 = arith.constant dense<0.000000e+00> : vector<10xf32>
    %214 = vector.multi_reduction <add>, %213, %cst_94 [1] : vector<10x32xf32> to vector<10xf32>
    %215 = vector.shape_cast %214 : vector<10xf32> to vector<10x1xf32>
    %cst_95 = arith.constant 3.200000e+01 : f32
    %216 = vector.broadcast %cst_95 : f32 to vector<10x1xf32>
    %217 = arith.divf %215, %216 : vector<10x1xf32>
    %218 = vector.broadcast %217 : vector<10x1xf32> to vector<10x32xf32>
    %219 = arith.subf %213, %218 : vector<10x32xf32>
    %220 = arith.mulf %219, %219 : vector<10x32xf32>
    %cst_96 = arith.constant dense<0.000000e+00> : vector<10xf32>
    %221 = vector.multi_reduction <add>, %220, %cst_96 [1] : vector<10x32xf32> to vector<10xf32>
    %222 = vector.shape_cast %221 : vector<10xf32> to vector<10x1xf32>
    %cst_97 = arith.constant 3.200000e+01 : f32
    %223 = vector.broadcast %cst_97 : f32 to vector<10x1xf32>
    %224 = arith.divf %222, %223 : vector<10x1xf32>
    %225 = vector.broadcast %217 : vector<10x1xf32> to vector<10x32xf32>
    %226 = arith.subf %213, %225 : vector<10x32xf32>
    %cst_98 = arith.constant 9.99999974E-6 : f32
    %227 = vector.broadcast %cst_98 : f32 to vector<10x1xf32>
    %228 = arith.addf %224, %227 : vector<10x1xf32>
    %229 = math.rsqrt %228 : vector<10x1xf32>
    %230 = vector.broadcast %229 : vector<10x1xf32> to vector<10x32xf32>
    %231 = arith.mulf %226, %230 : vector<10x32xf32>
    %232 = vector.broadcast %211 : vector<1x32xf32> to vector<10x32xf32>
    %233 = arith.mulf %231, %232 : vector<10x32xf32>
    %234 = vector.broadcast %212 : vector<1x32xf32> to vector<10x32xf32>
    %235 = arith.addf %233, %234 : vector<10x32xf32>
    %c0_99 = arith.constant 0 : index
    %c0_100 = arith.constant 0 : index
    %c0_101 = arith.constant 0 : index
    %236 = vector.load %arg17[%c0_99, %c0_100, %c0_101] : memref<1x10x32xf32, #tpu.memory_space<vmem>>, vector<1x10x32xf32>
    %237 = vector.shape_cast %236 : vector<1x10x32xf32> to vector<10x32xf32>
    %238 = vector.shape_cast %235 : vector<10x32xf32> to vector<1x10x32xf32>
    tpu.vector_store %arg17[%c0_99, %c0_100, %c0_101], %238 {strides = array<i32>} : memref<1x10x32xf32, #tpu.memory_space<vmem>>, vector<1x10x32xf32>,
    return
  }
  func.func @transform_0(%arg0: i32) -> (i32, i32, i32) {
    %c0_i32 = arith.constant 0 : i32
    %c0_i32_0 = arith.constant 0 : i32
    %c0_i32_1 = arith.constant 0 : i32
    return %arg0, %c0_i32, %c0_i32_0 : i32, i32, i32
  }
  func.func @transform_1(%arg0: i32) -> (i32, i32, i32) {
    %c0_i32 = arith.constant 0 : i32
    %c0_i32_0 = arith.constant 0 : i32
    %c0_i32_1 = arith.constant 0 : i32
    return %arg0, %c0_i32, %c0_i32_0 : i32, i32, i32
  }
  func.func @transform_2(%arg0: i32) -> (i32, i32, i32) {
    %c0_i32 = arith.constant 0 : i32
    %c0_i32_0 = arith.constant 0 : i32
    %c0_i32_1 = arith.constant 0 : i32
    return %arg0, %c0_i32, %c0_i32_0 : i32, i32, i32
  }
  func.func @transform_3(%arg0: i32) -> (i32, i32) {
    %c0_i32 = arith.constant 0 : i32
    %c0_i32_0 = arith.constant 0 : i32
    %c0_i32_1 = arith.constant 0 : i32
    return %c0_i32, %c0_i32_0 : i32, i32
  }
  func.func @transform_4(%arg0: i32) -> (i32, i32) {
    %c0_i32 = arith.constant 0 : i32
    %c0_i32_0 = arith.constant 0 : i32
    %c0_i32_1 = arith.constant 0 : i32
    return %c0_i32, %c0_i32_0 : i32, i32
  }
  func.func @transform_5(%arg0: i32) -> (i32, i32) {
    %c0_i32 = arith.constant 0 : i32
    %c0_i32_0 = arith.constant 0 : i32
    %c0_i32_1 = arith.constant 0 : i32
    return %c0_i32, %c0_i32_0 : i32, i32
  }
  func.func @transform_6(%arg0: i32) -> (i32, i32) {
    %c0_i32 = arith.constant 0 : i32
    %c0_i32_0 = arith.constant 0 : i32
    %c0_i32_1 = arith.constant 0 : i32
    return %c0_i32, %c0_i32_0 : i32, i32
  }
  func.func @transform_7(%arg0: i32) -> (i32, i32) {
    %c0_i32 = arith.constant 0 : i32
    %c0_i32_0 = arith.constant 0 : i32
    %c0_i32_1 = arith.constant 0 : i32
    return %c0_i32, %c0_i32_0 : i32, i32
  }
  func.func @transform_8(%arg0: i32) -> (i32, i32) {
    %c0_i32 = arith.constant 0 : i32
    %c0_i32_0 = arith.constant 0 : i32
    %c0_i32_1 = arith.constant 0 : i32
    return %c0_i32, %c0_i32_0 : i32, i32
  }
  func.func @transform_9(%arg0: i32) -> (i32, i32) {
    %c0_i32 = arith.constant 0 : i32
    %c0_i32_0 = arith.constant 0 : i32
    %c0_i32_1 = arith.constant 0 : i32
    return %c0_i32, %c0_i32_0 : i32, i32
  }
  func.func @transform_10(%arg0: i32) -> (i32, i32) {
    %c0_i32 = arith.constant 0 : i32
    %c0_i32_0 = arith.constant 0 : i32
    %c0_i32_1 = arith.constant 0 : i32
    return %c0_i32, %c0_i32_0 : i32, i32
  }
  func.func @transform_11(%arg0: i32) -> (i32, i32) {
    %c0_i32 = arith.constant 0 : i32
    %c0_i32_0 = arith.constant 0 : i32
    %c0_i32_1 = arith.constant 0 : i32
    return %c0_i32, %c0_i32_0 : i32, i32
  }
  func.func @transform_12(%arg0: i32) -> (i32, i32) {
    %c0_i32 = arith.constant 0 : i32
    %c0_i32_0 = arith.constant 0 : i32
    %c0_i32_1 = arith.constant 0 : i32
    return %c0_i32, %c0_i32_0 : i32, i32
  }
  func.func @transform_13(%arg0: i32) -> (i32, i32) {
    %c0_i32 = arith.constant 0 : i32
    %c0_i32_0 = arith.constant 0 : i32
    %c0_i32_1 = arith.constant 0 : i32
    return %c0_i32, %c0_i32_0 : i32, i32
  }
  func.func @transform_14(%arg0: i32) -> (i32, i32) {
    %c0_i32 = arith.constant 0 : i32
    %c0_i32_0 = arith.constant 0 : i32
    %c0_i32_1 = arith.constant 0 : i32
    return %c0_i32, %c0_i32_0 : i32, i32
  }
  func.func @transform_15(%arg0: i32) -> (i32, i32) {
    %c0_i32 = arith.constant 0 : i32
    %c0_i32_0 = arith.constant 0 : i32
    %c0_i32_1 = arith.constant 0 : i32
    return %c0_i32, %c0_i32_0 : i32, i32
  }
  func.func @transform_16(%arg0: i32) -> (i32, i32, i32) {
    %c0_i32 = arith.constant 0 : i32
    %c0_i32_0 = arith.constant 0 : i32
    %c0_i32_1 = arith.constant 0 : i32
    return %arg0, %c0_i32, %c0_i32_0 : i32, i32, i32
  }
}

module attributes {stable_mosaic.version = 11 : i64} {
  func.func @_self_attn_ln_kernel(%arg0: i32, %arg1: memref<1x8x32xf32, #tpu.memory_space<vmem>>, %arg2: memref<1x1x8xf32, #tpu.memory_space<vmem>>, %arg3: memref<32x32xf32, #tpu.memory_space<vmem>>, %arg4: memref<32x32xf32, #tpu.memory_space<vmem>>, %arg5: memref<32x32xf32, #tpu.memory_space<vmem>>, %arg6: memref<32x32xf32, #tpu.memory_space<vmem>>, %arg7: memref<1x32xf32, #tpu.memory_space<vmem>>, %arg8: memref<1x32xf32, #tpu.memory_space<vmem>>, %arg9: memref<1x32xf32, #tpu.memory_space<vmem>>, %arg10: memref<1x8x32xf32, #tpu.memory_space<vmem>>) attributes {dimension_semantics = [#tpu.dimension_semantics<parallel>], iteration_bounds = array<i64: 2>, scalar_prefetch = 0 : i64, scratch_operands = 0 : i64, tpu.core_type = #tpu.core_type<tc>, window_params = [{transform_indices = @transform_0, window_bounds = array<i64: 1, 8, 32>}, {transform_indices = @transform_1, window_bounds = array<i64: 1, 1, 8>}, {pipeline_mode = #tpu.pipeline_mode<synchronous>, transform_indices = @transform_2, window_bounds = array<i64: 32, 32>}, {pipeline_mode = #tpu.pipeline_mode<synchronous>, transform_indices = @transform_3, window_bounds = array<i64: 32, 32>}, {pipeline_mode = #tpu.pipeline_mode<synchronous>, transform_indices = @transform_4, window_bounds = array<i64: 32, 32>}, {pipeline_mode = #tpu.pipeline_mode<synchronous>, transform_indices = @transform_5, window_bounds = array<i64: 32, 32>}, {pipeline_mode = #tpu.pipeline_mode<synchronous>, transform_indices = @transform_6, window_bounds = array<i64: 1, 32>}, {pipeline_mode = #tpu.pipeline_mode<synchronous>, transform_indices = @transform_7, window_bounds = array<i64: 1, 32>}, {pipeline_mode = #tpu.pipeline_mode<synchronous>, transform_indices = @transform_8, window_bounds = array<i64: 1, 32>}, {transform_indices = @transform_9, window_bounds = array<i64: 1, 8, 32>}]} {
    %c0 = arith.constant 0 : index
    %c0_0 = arith.constant 0 : index
    %c0_1 = arith.constant 0 : index
    %0 = vector.load %arg1[%c0, %c0_0, %c0_1] : memref<1x8x32xf32, #tpu.memory_space<vmem>>, vector<1x8x32xf32>
    %1 = vector.shape_cast %0 : vector<1x8x32xf32> to vector<8x32xf32>
    %c0_2 = arith.constant 0 : index
    %c0_3 = arith.constant 0 : index
    %c0_4 = arith.constant 0 : index
    %2 = vector.load %arg2[%c0_2, %c0_3, %c0_4] : memref<1x1x8xf32, #tpu.memory_space<vmem>>, vector<1x1x8xf32>
    %3 = vector.shape_cast %2 : vector<1x1x8xf32> to vector<1x8xf32>
    %c0_5 = arith.constant 0 : index
    %c0_6 = arith.constant 0 : index
    %4 = vector.load %arg3[%c0_5, %c0_6] : memref<32x32xf32, #tpu.memory_space<vmem>>, vector<32x32xf32>
    %c0_7 = arith.constant 0 : index
    %c0_8 = arith.constant 0 : index
    %5 = vector.load %arg4[%c0_7, %c0_8] : memref<32x32xf32, #tpu.memory_space<vmem>>, vector<32x32xf32>
    %c0_9 = arith.constant 0 : index
    %c0_10 = arith.constant 0 : index
    %6 = vector.load %arg5[%c0_9, %c0_10] : memref<32x32xf32, #tpu.memory_space<vmem>>, vector<32x32xf32>
    %c0_11 = arith.constant 0 : index
    %c0_12 = arith.constant 0 : index
    %7 = vector.load %arg6[%c0_11, %c0_12] : memref<32x32xf32, #tpu.memory_space<vmem>>, vector<32x32xf32>
    %c0_13 = arith.constant 0 : index
    %c0_14 = arith.constant 0 : index
    %8 = vector.load %arg7[%c0_13, %c0_14] : memref<1x32xf32, #tpu.memory_space<vmem>>, vector<1x32xf32>
    %cst = arith.constant dense<0.000000e+00> : vector<8x32xf32>
    %9 = tpu.matmul %1, %4, %cst {dimension_numbers = #tpu.dot_dimension_numbers<[1], [0], [0], [1], [0, 0, 1, 1], [], []>} : vector<8x32xf32>, vector<32x32xf32>, vector<8x32xf32> -> vector<8x32xf32>
    %cst_15 = arith.constant dense<0.000000e+00> : vector<8x32xf32>
    %10 = tpu.matmul %1, %5, %cst_15 {dimension_numbers = #tpu.dot_dimension_numbers<[1], [0], [0], [1], [0, 0, 1, 1], [], []>} : vector<8x32xf32>, vector<32x32xf32>, vector<8x32xf32> -> vector<8x32xf32>
    %cst_16 = arith.constant dense<0.000000e+00> : vector<8x32xf32>
    %11 = tpu.matmul %1, %6, %cst_16 {dimension_numbers = #tpu.dot_dimension_numbers<[1], [0], [0], [1], [0, 0, 1, 1], [], []>} : vector<8x32xf32>, vector<32x32xf32>, vector<8x32xf32> -> vector<8x32xf32>
    %cst_17 = arith.constant 0.000000e+00 : f32
    %12 = vector.broadcast %cst_17 : f32 to vector<1x8xf32>
    %13 = arith.cmpf ogt, %3, %12 : vector<1x8xf32>
    %14 = vector.shape_cast %13 : vector<1x8xi1> to vector<1x8xi1>
    %15 = vector.broadcast %14 : vector<1x8xi1> to vector<8x8xi1>
    %16 = tpu.iota {dimensions = array<i32: 0>} : vector<8x8xi32>
    %17 = tpu.iota {dimensions = array<i32: 1>} : vector<8x8xi32>
    %18 = arith.cmpi sge, %16, %17 : vector<8x8xi32>
    %19 = arith.andi %15, %18 : vector<8x8xi1>
    %20 = vector.extract_strided_slice %9 {offsets = [0, 0], sizes = [8, 4], strides = [1, 1]} : vector<8x32xf32> to vector<8x4xf32>
    %21 = vector.extract_strided_slice %10 {offsets = [0, 0], sizes = [8, 4], strides = [1, 1]} : vector<8x32xf32> to vector<8x4xf32>
    %cst_18 = arith.constant dense<0.000000e+00> : vector<8x8xf32>
    %22 = tpu.matmul %20, %21, %cst_18 {dimension_numbers = #tpu.dot_dimension_numbers<[1], [1], [0], [0], [0, 0, 1, 0], [], []>} : vector<8x4xf32>, vector<8x4xf32>, vector<8x8xf32> -> vector<8x8xf32>
    %cst_19 = arith.constant -1.000000e+20 : f32
    %23 = vector.broadcast %cst_19 : f32 to vector<8x8xf32>
    %24 = arith.select %19, %22, %23 : vector<8x8xi1>, vector<8x8xf32>
    %cst_20 = arith.constant 0.176776692 : f32
    %25 = vector.broadcast %cst_20 : f32 to vector<8x8xf32>
    %26 = arith.mulf %24, %25 : vector<8x8xf32>
    %cst_21 = arith.constant dense<0xFF800000> : vector<8xf32>
    %27 = vector.multi_reduction <maximumf>, %26, %cst_21 [1] : vector<8x8xf32> to vector<8xf32>
    %28 = vector.shape_cast %27 : vector<8xf32> to vector<8x1xf32>
    %29 = vector.broadcast %28 : vector<8x1xf32> to vector<8x8xf32>
    %30 = arith.subf %26, %29 : vector<8x8xf32>
    %31 = math.exp %30 : vector<8x8xf32>
    %cst_22 = arith.constant dense<0.000000e+00> : vector<8xf32>
    %32 = vector.multi_reduction <add>, %31, %cst_22 [1] : vector<8x8xf32> to vector<8xf32>
    %33 = vector.shape_cast %32 : vector<8xf32> to vector<8x1xf32>
    %34 = tpu.reciprocal %33 {approx = true} : vector<8x1xf32> -> vector<8x1xf32>
    %35 = vector.broadcast %34 : vector<8x1xf32> to vector<8x8xf32>
    %36 = arith.mulf %31, %35 : vector<8x8xf32>
    %37 = vector.extract_strided_slice %11 {offsets = [0, 0], sizes = [8, 4], strides = [1, 1]} : vector<8x32xf32> to vector<8x4xf32>
    %cst_23 = arith.constant dense<0.000000e+00> : vector<8x4xf32>
    %38 = tpu.matmul %36, %37, %cst_23 {dimension_numbers = #tpu.dot_dimension_numbers<[1], [0], [0], [1], [0, 0, 1, 1], [], []>} : vector<8x8xf32>, vector<8x4xf32>, vector<8x4xf32> -> vector<8x4xf32>
    %39 = vector.extract_strided_slice %9 {offsets = [0, 4], sizes = [8, 4], strides = [1, 1]} : vector<8x32xf32> to vector<8x4xf32>
    %40 = vector.extract_strided_slice %10 {offsets = [0, 4], sizes = [8, 4], strides = [1, 1]} : vector<8x32xf32> to vector<8x4xf32>
    %cst_24 = arith.constant dense<0.000000e+00> : vector<8x8xf32>
    %41 = tpu.matmul %39, %40, %cst_24 {dimension_numbers = #tpu.dot_dimension_numbers<[1], [1], [0], [0], [0, 0, 1, 0], [], []>} : vector<8x4xf32>, vector<8x4xf32>, vector<8x8xf32> -> vector<8x8xf32>
    %cst_25 = arith.constant -1.000000e+20 : f32
    %42 = vector.broadcast %cst_25 : f32 to vector<8x8xf32>
    %43 = arith.select %19, %41, %42 : vector<8x8xi1>, vector<8x8xf32>
    %cst_26 = arith.constant 0.176776692 : f32
    %44 = vector.broadcast %cst_26 : f32 to vector<8x8xf32>
    %45 = arith.mulf %43, %44 : vector<8x8xf32>
    %cst_27 = arith.constant dense<0xFF800000> : vector<8xf32>
    %46 = vector.multi_reduction <maximumf>, %45, %cst_27 [1] : vector<8x8xf32> to vector<8xf32>
    %47 = vector.shape_cast %46 : vector<8xf32> to vector<8x1xf32>
    %48 = vector.broadcast %47 : vector<8x1xf32> to vector<8x8xf32>
    %49 = arith.subf %45, %48 : vector<8x8xf32>
    %50 = math.exp %49 : vector<8x8xf32>
    %cst_28 = arith.constant dense<0.000000e+00> : vector<8xf32>
    %51 = vector.multi_reduction <add>, %50, %cst_28 [1] : vector<8x8xf32> to vector<8xf32>
    %52 = vector.shape_cast %51 : vector<8xf32> to vector<8x1xf32>
    %53 = tpu.reciprocal %52 {approx = true} : vector<8x1xf32> -> vector<8x1xf32>
    %54 = vector.broadcast %53 : vector<8x1xf32> to vector<8x8xf32>
    %55 = arith.mulf %50, %54 : vector<8x8xf32>
    %56 = vector.extract_strided_slice %11 {offsets = [0, 4], sizes = [8, 4], strides = [1, 1]} : vector<8x32xf32> to vector<8x4xf32>
    %cst_29 = arith.constant dense<0.000000e+00> : vector<8x4xf32>
    %57 = tpu.matmul %55, %56, %cst_29 {dimension_numbers = #tpu.dot_dimension_numbers<[1], [0], [0], [1], [0, 0, 1, 1], [], []>} : vector<8x8xf32>, vector<8x4xf32>, vector<8x4xf32> -> vector<8x4xf32>
    %58 = vector.extract_strided_slice %9 {offsets = [0, 8], sizes = [8, 4], strides = [1, 1]} : vector<8x32xf32> to vector<8x4xf32>
    %59 = vector.extract_strided_slice %10 {offsets = [0, 8], sizes = [8, 4], strides = [1, 1]} : vector<8x32xf32> to vector<8x4xf32>
    %cst_30 = arith.constant dense<0.000000e+00> : vector<8x8xf32>
    %60 = tpu.matmul %58, %59, %cst_30 {dimension_numbers = #tpu.dot_dimension_numbers<[1], [1], [0], [0], [0, 0, 1, 0], [], []>} : vector<8x4xf32>, vector<8x4xf32>, vector<8x8xf32> -> vector<8x8xf32>
    %cst_31 = arith.constant -1.000000e+20 : f32
    %61 = vector.broadcast %cst_31 : f32 to vector<8x8xf32>
    %62 = arith.select %19, %60, %61 : vector<8x8xi1>, vector<8x8xf32>
    %cst_32 = arith.constant 0.176776692 : f32
    %63 = vector.broadcast %cst_32 : f32 to vector<8x8xf32>
    %64 = arith.mulf %62, %63 : vector<8x8xf32>
    %cst_33 = arith.constant dense<0xFF800000> : vector<8xf32>
    %65 = vector.multi_reduction <maximumf>, %64, %cst_33 [1] : vector<8x8xf32> to vector<8xf32>
    %66 = vector.shape_cast %65 : vector<8xf32> to vector<8x1xf32>
    %67 = vector.broadcast %66 : vector<8x1xf32> to vector<8x8xf32>
    %68 = arith.subf %64, %67 : vector<8x8xf32>
    %69 = math.exp %68 : vector<8x8xf32>
    %cst_34 = arith.constant dense<0.000000e+00> : vector<8xf32>
    %70 = vector.multi_reduction <add>, %69, %cst_34 [1] : vector<8x8xf32> to vector<8xf32>
    %71 = vector.shape_cast %70 : vector<8xf32> to vector<8x1xf32>
    %72 = tpu.reciprocal %71 {approx = true} : vector<8x1xf32> -> vector<8x1xf32>
    %73 = vector.broadcast %72 : vector<8x1xf32> to vector<8x8xf32>
    %74 = arith.mulf %69, %73 : vector<8x8xf32>
    %75 = vector.extract_strided_slice %11 {offsets = [0, 8], sizes = [8, 4], strides = [1, 1]} : vector<8x32xf32> to vector<8x4xf32>
    %cst_35 = arith.constant dense<0.000000e+00> : vector<8x4xf32>
    %76 = tpu.matmul %74, %75, %cst_35 {dimension_numbers = #tpu.dot_dimension_numbers<[1], [0], [0], [1], [0, 0, 1, 1], [], []>} : vector<8x8xf32>, vector<8x4xf32>, vector<8x4xf32> -> vector<8x4xf32>
    %77 = vector.extract_strided_slice %9 {offsets = [0, 12], sizes = [8, 4], strides = [1, 1]} : vector<8x32xf32> to vector<8x4xf32>
    %78 = vector.extract_strided_slice %10 {offsets = [0, 12], sizes = [8, 4], strides = [1, 1]} : vector<8x32xf32> to vector<8x4xf32>
    %cst_36 = arith.constant dense<0.000000e+00> : vector<8x8xf32>
    %79 = tpu.matmul %77, %78, %cst_36 {dimension_numbers = #tpu.dot_dimension_numbers<[1], [1], [0], [0], [0, 0, 1, 0], [], []>} : vector<8x4xf32>, vector<8x4xf32>, vector<8x8xf32> -> vector<8x8xf32>
    %cst_37 = arith.constant -1.000000e+20 : f32
    %80 = vector.broadcast %cst_37 : f32 to vector<8x8xf32>
    %81 = arith.select %19, %79, %80 : vector<8x8xi1>, vector<8x8xf32>
    %cst_38 = arith.constant 0.176776692 : f32
    %82 = vector.broadcast %cst_38 : f32 to vector<8x8xf32>
    %83 = arith.mulf %81, %82 : vector<8x8xf32>
    %cst_39 = arith.constant dense<0xFF800000> : vector<8xf32>
    %84 = vector.multi_reduction <maximumf>, %83, %cst_39 [1] : vector<8x8xf32> to vector<8xf32>
    %85 = vector.shape_cast %84 : vector<8xf32> to vector<8x1xf32>
    %86 = vector.broadcast %85 : vector<8x1xf32> to vector<8x8xf32>
    %87 = arith.subf %83, %86 : vector<8x8xf32>
    %88 = math.exp %87 : vector<8x8xf32>
    %cst_40 = arith.constant dense<0.000000e+00> : vector<8xf32>
    %89 = vector.multi_reduction <add>, %88, %cst_40 [1] : vector<8x8xf32> to vector<8xf32>
    %90 = vector.shape_cast %89 : vector<8xf32> to vector<8x1xf32>
    %91 = tpu.reciprocal %90 {approx = true} : vector<8x1xf32> -> vector<8x1xf32>
    %92 = vector.broadcast %91 : vector<8x1xf32> to vector<8x8xf32>
    %93 = arith.mulf %88, %92 : vector<8x8xf32>
    %94 = vector.extract_strided_slice %11 {offsets = [0, 12], sizes = [8, 4], strides = [1, 1]} : vector<8x32xf32> to vector<8x4xf32>
    %cst_41 = arith.constant dense<0.000000e+00> : vector<8x4xf32>
    %95 = tpu.matmul %93, %94, %cst_41 {dimension_numbers = #tpu.dot_dimension_numbers<[1], [0], [0], [1], [0, 0, 1, 1], [], []>} : vector<8x8xf32>, vector<8x4xf32>, vector<8x4xf32> -> vector<8x4xf32>
    %96 = vector.extract_strided_slice %9 {offsets = [0, 16], sizes = [8, 4], strides = [1, 1]} : vector<8x32xf32> to vector<8x4xf32>
    %97 = vector.extract_strided_slice %10 {offsets = [0, 16], sizes = [8, 4], strides = [1, 1]} : vector<8x32xf32> to vector<8x4xf32>
    %cst_42 = arith.constant dense<0.000000e+00> : vector<8x8xf32>
    %98 = tpu.matmul %96, %97, %cst_42 {dimension_numbers = #tpu.dot_dimension_numbers<[1], [1], [0], [0], [0, 0, 1, 0], [], []>} : vector<8x4xf32>, vector<8x4xf32>, vector<8x8xf32> -> vector<8x8xf32>
    %cst_43 = arith.constant -1.000000e+20 : f32
    %99 = vector.broadcast %cst_43 : f32 to vector<8x8xf32>
    %100 = arith.select %19, %98, %99 : vector<8x8xi1>, vector<8x8xf32>
    %cst_44 = arith.constant 0.176776692 : f32
    %101 = vector.broadcast %cst_44 : f32 to vector<8x8xf32>
    %102 = arith.mulf %100, %101 : vector<8x8xf32>
    %cst_45 = arith.constant dense<0xFF800000> : vector<8xf32>
    %103 = vector.multi_reduction <maximumf>, %102, %cst_45 [1] : vector<8x8xf32> to vector<8xf32>
    %104 = vector.shape_cast %103 : vector<8xf32> to vector<8x1xf32>
    %105 = vector.broadcast %104 : vector<8x1xf32> to vector<8x8xf32>
    %106 = arith.subf %102, %105 : vector<8x8xf32>
    %107 = math.exp %106 : vector<8x8xf32>
    %cst_46 = arith.constant dense<0.000000e+00> : vector<8xf32>
    %108 = vector.multi_reduction <add>, %107, %cst_46 [1] : vector<8x8xf32> to vector<8xf32>
    %109 = vector.shape_cast %108 : vector<8xf32> to vector<8x1xf32>
    %110 = tpu.reciprocal %109 {approx = true} : vector<8x1xf32> -> vector<8x1xf32>
    %111 = vector.broadcast %110 : vector<8x1xf32> to vector<8x8xf32>
    %112 = arith.mulf %107, %111 : vector<8x8xf32>
    %113 = vector.extract_strided_slice %11 {offsets = [0, 16], sizes = [8, 4], strides = [1, 1]} : vector<8x32xf32> to vector<8x4xf32>
    %cst_47 = arith.constant dense<0.000000e+00> : vector<8x4xf32>
    %114 = tpu.matmul %112, %113, %cst_47 {dimension_numbers = #tpu.dot_dimension_numbers<[1], [0], [0], [1], [0, 0, 1, 1], [], []>} : vector<8x8xf32>, vector<8x4xf32>, vector<8x4xf32> -> vector<8x4xf32>
    %115 = vector.extract_strided_slice %9 {offsets = [0, 20], sizes = [8, 4], strides = [1, 1]} : vector<8x32xf32> to vector<8x4xf32>
    %116 = vector.extract_strided_slice %10 {offsets = [0, 20], sizes = [8, 4], strides = [1, 1]} : vector<8x32xf32> to vector<8x4xf32>
    %cst_48 = arith.constant dense<0.000000e+00> : vector<8x8xf32>
    %117 = tpu.matmul %115, %116, %cst_48 {dimension_numbers = #tpu.dot_dimension_numbers<[1], [1], [0], [0], [0, 0, 1, 0], [], []>} : vector<8x4xf32>, vector<8x4xf32>, vector<8x8xf32> -> vector<8x8xf32>
    %cst_49 = arith.constant -1.000000e+20 : f32
    %118 = vector.broadcast %cst_49 : f32 to vector<8x8xf32>
    %119 = arith.select %19, %117, %118 : vector<8x8xi1>, vector<8x8xf32>
    %cst_50 = arith.constant 0.176776692 : f32
    %120 = vector.broadcast %cst_50 : f32 to vector<8x8xf32>
    %121 = arith.mulf %119, %120 : vector<8x8xf32>
    %cst_51 = arith.constant dense<0xFF800000> : vector<8xf32>
    %122 = vector.multi_reduction <maximumf>, %121, %cst_51 [1] : vector<8x8xf32> to vector<8xf32>
    %123 = vector.shape_cast %122 : vector<8xf32> to vector<8x1xf32>
    %124 = vector.broadcast %123 : vector<8x1xf32> to vector<8x8xf32>
    %125 = arith.subf %121, %124 : vector<8x8xf32>
    %126 = math.exp %125 : vector<8x8xf32>
    %cst_52 = arith.constant dense<0.000000e+00> : vector<8xf32>
    %127 = vector.multi_reduction <add>, %126, %cst_52 [1] : vector<8x8xf32> to vector<8xf32>
    %128 = vector.shape_cast %127 : vector<8xf32> to vector<8x1xf32>
    %129 = tpu.reciprocal %128 {approx = true} : vector<8x1xf32> -> vector<8x1xf32>
    %130 = vector.broadcast %129 : vector<8x1xf32> to vector<8x8xf32>
    %131 = arith.mulf %126, %130 : vector<8x8xf32>
    %132 = vector.extract_strided_slice %11 {offsets = [0, 20], sizes = [8, 4], strides = [1, 1]} : vector<8x32xf32> to vector<8x4xf32>
    %cst_53 = arith.constant dense<0.000000e+00> : vector<8x4xf32>
    %133 = tpu.matmul %131, %132, %cst_53 {dimension_numbers = #tpu.dot_dimension_numbers<[1], [0], [0], [1], [0, 0, 1, 1], [], []>} : vector<8x8xf32>, vector<8x4xf32>, vector<8x4xf32> -> vector<8x4xf32>
    %134 = vector.extract_strided_slice %9 {offsets = [0, 24], sizes = [8, 4], strides = [1, 1]} : vector<8x32xf32> to vector<8x4xf32>
    %135 = vector.extract_strided_slice %10 {offsets = [0, 24], sizes = [8, 4], strides = [1, 1]} : vector<8x32xf32> to vector<8x4xf32>
    %cst_54 = arith.constant dense<0.000000e+00> : vector<8x8xf32>
    %136 = tpu.matmul %134, %135, %cst_54 {dimension_numbers = #tpu.dot_dimension_numbers<[1], [1], [0], [0], [0, 0, 1, 0], [], []>} : vector<8x4xf32>, vector<8x4xf32>, vector<8x8xf32> -> vector<8x8xf32>
    %cst_55 = arith.constant -1.000000e+20 : f32
    %137 = vector.broadcast %cst_55 : f32 to vector<8x8xf32>
    %138 = arith.select %19, %136, %137 : vector<8x8xi1>, vector<8x8xf32>
    %cst_56 = arith.constant 0.176776692 : f32
    %139 = vector.broadcast %cst_56 : f32 to vector<8x8xf32>
    %140 = arith.mulf %138, %139 : vector<8x8xf32>
    %cst_57 = arith.constant dense<0xFF800000> : vector<8xf32>
    %141 = vector.multi_reduction <maximumf>, %140, %cst_57 [1] : vector<8x8xf32> to vector<8xf32>
    %142 = vector.shape_cast %141 : vector<8xf32> to vector<8x1xf32>
    %143 = vector.broadcast %142 : vector<8x1xf32> to vector<8x8xf32>
    %144 = arith.subf %140, %143 : vector<8x8xf32>
    %145 = math.exp %144 : vector<8x8xf32>
    %cst_58 = arith.constant dense<0.000000e+00> : vector<8xf32>
    %146 = vector.multi_reduction <add>, %145, %cst_58 [1] : vector<8x8xf32> to vector<8xf32>
    %147 = vector.shape_cast %146 : vector<8xf32> to vector<8x1xf32>
    %148 = tpu.reciprocal %147 {approx = true} : vector<8x1xf32> -> vector<8x1xf32>
    %149 = vector.broadcast %148 : vector<8x1xf32> to vector<8x8xf32>
    %150 = arith.mulf %145, %149 : vector<8x8xf32>
    %151 = vector.extract_strided_slice %11 {offsets = [0, 24], sizes = [8, 4], strides = [1, 1]} : vector<8x32xf32> to vector<8x4xf32>
    %cst_59 = arith.constant dense<0.000000e+00> : vector<8x4xf32>
    %152 = tpu.matmul %150, %151, %cst_59 {dimension_numbers = #tpu.dot_dimension_numbers<[1], [0], [0], [1], [0, 0, 1, 1], [], []>} : vector<8x8xf32>, vector<8x4xf32>, vector<8x4xf32> -> vector<8x4xf32>
    %153 = vector.extract_strided_slice %9 {offsets = [0, 28], sizes = [8, 4], strides = [1, 1]} : vector<8x32xf32> to vector<8x4xf32>
    %154 = vector.extract_strided_slice %10 {offsets = [0, 28], sizes = [8, 4], strides = [1, 1]} : vector<8x32xf32> to vector<8x4xf32>
    %cst_60 = arith.constant dense<0.000000e+00> : vector<8x8xf32>
    %155 = tpu.matmul %153, %154, %cst_60 {dimension_numbers = #tpu.dot_dimension_numbers<[1], [1], [0], [0], [0, 0, 1, 0], [], []>} : vector<8x4xf32>, vector<8x4xf32>, vector<8x8xf32> -> vector<8x8xf32>
    %cst_61 = arith.constant -1.000000e+20 : f32
    %156 = vector.broadcast %cst_61 : f32 to vector<8x8xf32>
    %157 = arith.select %19, %155, %156 : vector<8x8xi1>, vector<8x8xf32>
    %cst_62 = arith.constant 0.176776692 : f32
    %158 = vector.broadcast %cst_62 : f32 to vector<8x8xf32>
    %159 = arith.mulf %157, %158 : vector<8x8xf32>
    %cst_63 = arith.constant dense<0xFF800000> : vector<8xf32>
    %160 = vector.multi_reduction <maximumf>, %159, %cst_63 [1] : vector<8x8xf32> to vector<8xf32>
    %161 = vector.shape_cast %160 : vector<8xf32> to vector<8x1xf32>
    %162 = vector.broadcast %161 : vector<8x1xf32> to vector<8x8xf32>
    %163 = arith.subf %159, %162 : vector<8x8xf32>
    %164 = math.exp %163 : vector<8x8xf32>
    %cst_64 = arith.constant dense<0.000000e+00> : vector<8xf32>
    %165 = vector.multi_reduction <add>, %164, %cst_64 [1] : vector<8x8xf32> to vector<8xf32>
    %166 = vector.shape_cast %165 : vector<8xf32> to vector<8x1xf32>
    %167 = tpu.reciprocal %166 {approx = true} : vector<8x1xf32> -> vector<8x1xf32>
    %168 = vector.broadcast %167 : vector<8x1xf32> to vector<8x8xf32>
    %169 = arith.mulf %164, %168 : vector<8x8xf32>
    %170 = vector.extract_strided_slice %11 {offsets = [0, 28], sizes = [8, 4], strides = [1, 1]} : vector<8x32xf32> to vector<8x4xf32>
    %cst_65 = arith.constant dense<0.000000e+00> : vector<8x4xf32>
    %171 = tpu.matmul %169, %170, %cst_65 {dimension_numbers = #tpu.dot_dimension_numbers<[1], [0], [0], [1], [0, 0, 1, 1], [], []>} : vector<8x8xf32>, vector<8x4xf32>, vector<8x4xf32> -> vector<8x4xf32>
    %172 = tpu.concatenate %38, %57, %76, %95, %114, %133, %152, %171 in 1 : vector<8x4xf32>, vector<8x4xf32>, vector<8x4xf32>, vector<8x4xf32>, vector<8x4xf32>, vector<8x4xf32>, vector<8x4xf32>, vector<8x4xf32> -> vector<8x32xf32>
    %cst_66 = arith.constant dense<0.000000e+00> : vector<8x32xf32>
    %173 = tpu.matmul %172, %7, %cst_66 {dimension_numbers = #tpu.dot_dimension_numbers<[1], [0], [0], [1], [0, 0, 1, 1], [], []>} : vector<8x32xf32>, vector<32x32xf32>, vector<8x32xf32> -> vector<8x32xf32>
    %174 = vector.broadcast %8 : vector<1x32xf32> to vector<8x32xf32>
    %175 = arith.addf %173, %174 : vector<8x32xf32>
    %c0_67 = arith.constant 0 : index
    %c0_68 = arith.constant 0 : index
    %176 = vector.load %arg8[%c0_67, %c0_68] : memref<1x32xf32, #tpu.memory_space<vmem>>, vector<1x32xf32>
    %c0_69 = arith.constant 0 : index
    %c0_70 = arith.constant 0 : index
    %177 = vector.load %arg9[%c0_69, %c0_70] : memref<1x32xf32, #tpu.memory_space<vmem>>, vector<1x32xf32>
    %178 = arith.addf %175, %1 : vector<8x32xf32>
    %cst_71 = arith.constant dense<0.000000e+00> : vector<8xf32>
    %179 = vector.multi_reduction <add>, %178, %cst_71 [1] : vector<8x32xf32> to vector<8xf32>
    %180 = vector.shape_cast %179 : vector<8xf32> to vector<8x1xf32>
    %cst_72 = arith.constant 3.200000e+01 : f32
    %181 = vector.broadcast %cst_72 : f32 to vector<8x1xf32>
    %182 = arith.divf %180, %181 : vector<8x1xf32>
    %183 = vector.broadcast %182 : vector<8x1xf32> to vector<8x32xf32>
    %184 = arith.subf %178, %183 : vector<8x32xf32>
    %185 = arith.mulf %184, %184 : vector<8x32xf32>
    %cst_73 = arith.constant dense<0.000000e+00> : vector<8xf32>
    %186 = vector.multi_reduction <add>, %185, %cst_73 [1] : vector<8x32xf32> to vector<8xf32>
    %187 = vector.shape_cast %186 : vector<8xf32> to vector<8x1xf32>
    %cst_74 = arith.constant 3.200000e+01 : f32
    %188 = vector.broadcast %cst_74 : f32 to vector<8x1xf32>
    %189 = arith.divf %187, %188 : vector<8x1xf32>
    %190 = vector.broadcast %182 : vector<8x1xf32> to vector<8x32xf32>
    %191 = arith.subf %178, %190 : vector<8x32xf32>
    %cst_75 = arith.constant 9.99999974E-6 : f32
    %192 = vector.broadcast %cst_75 : f32 to vector<8x1xf32>
    %193 = arith.addf %189, %192 : vector<8x1xf32>
    %194 = math.rsqrt %193 : vector<8x1xf32>
    %195 = vector.broadcast %194 : vector<8x1xf32> to vector<8x32xf32>
    %196 = arith.mulf %191, %195 : vector<8x32xf32>
    %197 = vector.broadcast %176 : vector<1x32xf32> to vector<8x32xf32>
    %198 = arith.mulf %196, %197 : vector<8x32xf32>
    %199 = vector.broadcast %177 : vector<1x32xf32> to vector<8x32xf32>
    %200 = arith.addf %198, %199 : vector<8x32xf32>
    %c0_76 = arith.constant 0 : index
    %c0_77 = arith.constant 0 : index
    %c0_78 = arith.constant 0 : index
    %201 = vector.load %arg10[%c0_76, %c0_77, %c0_78] : memref<1x8x32xf32, #tpu.memory_space<vmem>>, vector<1x8x32xf32>
    %202 = vector.shape_cast %201 : vector<1x8x32xf32> to vector<8x32xf32>
    %203 = vector.shape_cast %200 : vector<8x32xf32> to vector<1x8x32xf32>
    tpu.vector_store %arg10[%c0_76, %c0_77, %c0_78], %203 {strides = array<i32>} : memref<1x8x32xf32, #tpu.memory_space<vmem>>, vector<1x8x32xf32>,
    return
  }
  func.func @transform_0(%arg0: i32) -> (i32, i32, i32) {
    %c0_i32 = arith.constant 0 : i32
    %c0_i32_0 = arith.constant 0 : i32
    %c0_i32_1 = arith.constant 0 : i32
    return %arg0, %c0_i32, %c0_i32_0 : i32, i32, i32
  }
  func.func @transform_1(%arg0: i32) -> (i32, i32, i32) {
    %c0_i32 = arith.constant 0 : i32
    %c0_i32_0 = arith.constant 0 : i32
    %c0_i32_1 = arith.constant 0 : i32
    return %arg0, %c0_i32, %c0_i32_0 : i32, i32, i32
  }
  func.func @transform_2(%arg0: i32) -> (i32, i32) {
    %c0_i32 = arith.constant 0 : i32
    %c0_i32_0 = arith.constant 0 : i32
    %c0_i32_1 = arith.constant 0 : i32
    return %c0_i32, %c0_i32_0 : i32, i32
  }
  func.func @transform_3(%arg0: i32) -> (i32, i32) {
    %c0_i32 = arith.constant 0 : i32
    %c0_i32_0 = arith.constant 0 : i32
    %c0_i32_1 = arith.constant 0 : i32
    return %c0_i32, %c0_i32_0 : i32, i32
  }
  func.func @transform_4(%arg0: i32) -> (i32, i32) {
    %c0_i32 = arith.constant 0 : i32
    %c0_i32_0 = arith.constant 0 : i32
    %c0_i32_1 = arith.constant 0 : i32
    return %c0_i32, %c0_i32_0 : i32, i32
  }
  func.func @transform_5(%arg0: i32) -> (i32, i32) {
    %c0_i32 = arith.constant 0 : i32
    %c0_i32_0 = arith.constant 0 : i32
    %c0_i32_1 = arith.constant 0 : i32
    return %c0_i32, %c0_i32_0 : i32, i32
  }
  func.func @transform_6(%arg0: i32) -> (i32, i32) {
    %c0_i32 = arith.constant 0 : i32
    %c0_i32_0 = arith.constant 0 : i32
    %c0_i32_1 = arith.constant 0 : i32
    return %c0_i32, %c0_i32_0 : i32, i32
  }
  func.func @transform_7(%arg0: i32) -> (i32, i32) {
    %c0_i32 = arith.constant 0 : i32
    %c0_i32_0 = arith.constant 0 : i32
    %c0_i32_1 = arith.constant 0 : i32
    return %c0_i32, %c0_i32_0 : i32, i32
  }
  func.func @transform_8(%arg0: i32) -> (i32, i32) {
    %c0_i32 = arith.constant 0 : i32
    %c0_i32_0 = arith.constant 0 : i32
    %c0_i32_1 = arith.constant 0 : i32
    return %c0_i32, %c0_i32_0 : i32, i32
  }
  func.func @transform_9(%arg0: i32) -> (i32, i32, i32) {
    %c0_i32 = arith.constant 0 : i32
    %c0_i32_0 = arith.constant 0 : i32
    %c0_i32_1 = arith.constant 0 : i32
    return %arg0, %c0_i32, %c0_i32_0 : i32, i32, i32
  }
}

module attributes {stable_mosaic.version = 11 : i64} {
  func.func @_out_linear_kernel(%arg0: memref<16x32xf32, #tpu.memory_space<vmem>>, %arg1: memref<32x128xf32, #tpu.memory_space<vmem>>, %arg2: memref<1x128xf32, #tpu.memory_space<vmem>>, %arg3: memref<16x128xf32, #tpu.memory_space<vmem>>) attributes {dimension_semantics = [], scalar_prefetch = 0 : i64, scratch_operands = 0 : i64, tpu.core_type = #tpu.core_type<tc>} {
    %c0 = arith.constant 0 : index
    %c0_0 = arith.constant 0 : index
    %0 = vector.load %arg0[%c0, %c0_0] : memref<16x32xf32, #tpu.memory_space<vmem>>, vector<16x32xf32>
    %c0_1 = arith.constant 0 : index
    %c0_2 = arith.constant 0 : index
    %1 = vector.load %arg1[%c0_1, %c0_2] : memref<32x128xf32, #tpu.memory_space<vmem>>, vector<32x128xf32>
    %cst = arith.constant dense<0.000000e+00> : vector<16x128xf32>
    %2 = tpu.matmul %0, %1, %cst {dimension_numbers = #tpu.dot_dimension_numbers<[1], [0], [0], [1], [0, 0, 1, 1], [], []>} : vector<16x32xf32>, vector<32x128xf32>, vector<16x128xf32> -> vector<16x128xf32>
    %c0_3 = arith.constant 0 : index
    %c0_4 = arith.constant 0 : index
    %3 = vector.load %arg2[%c0_3, %c0_4] : memref<1x128xf32, #tpu.memory_space<vmem>>, vector<1x128xf32>
    %4 = vector.broadcast %3 : vector<1x128xf32> to vector<16x128xf32>
    %5 = arith.addf %2, %4 : vector<16x128xf32>
    %c0_5 = arith.constant 0 : index
    %c0_6 = arith.constant 0 : index
    %6 = vector.load %arg3[%c0_5, %c0_6] : memref<16x128xf32, #tpu.memory_space<vmem>>, vector<16x128xf32>
    tpu.vector_store %arg3[%c0_5, %c0_6], %5 {strides = array<i32>} : memref<16x128xf32, #tpu.memory_space<vmem>>, vector<16x128xf32>,
    return
  }
}

module attributes {stable_mosaic.version = 11 : i64} {
  func.func @_encdec_block_kernel(%arg0: i32, %arg1: memref<1x8x32xf32, #tpu.memory_space<vmem>>, %arg2: memref<1x10x32xf32, #tpu.memory_space<vmem>>, %arg3: memref<1x1x10xf32, #tpu.memory_space<vmem>>, %arg4: memref<32x32xf32, #tpu.memory_space<vmem>>, %arg5: memref<32x32xf32, #tpu.memory_space<vmem>>, %arg6: memref<32x32xf32, #tpu.memory_space<vmem>>, %arg7: memref<32x32xf32, #tpu.memory_space<vmem>>, %arg8: memref<1x32xf32, #tpu.memory_space<vmem>>, %arg9: memref<1x32xf32, #tpu.memory_space<vmem>>, %arg10: memref<1x32xf32, #tpu.memory_space<vmem>>, %arg11: memref<32x128xf32, #tpu.memory_space<vmem>>, %arg12: memref<1x128xf32, #tpu.memory_space<vmem>>, %arg13: memref<128x32xf32, #tpu.memory_space<vmem>>, %arg14: memref<1x32xf32, #tpu.memory_space<vmem>>, %arg15: memref<1x32xf32, #tpu.memory_space<vmem>>, %arg16: memref<1x32xf32, #tpu.memory_space<vmem>>, %arg17: memref<1x8x32xf32, #tpu.memory_space<vmem>>) attributes {dimension_semantics = [#tpu.dimension_semantics<parallel>], iteration_bounds = array<i64: 2>, scalar_prefetch = 0 : i64, scratch_operands = 0 : i64, tpu.core_type = #tpu.core_type<tc>, window_params = [{transform_indices = @transform_0, window_bounds = array<i64: 1, 8, 32>}, {transform_indices = @transform_1, window_bounds = array<i64: 1, 10, 32>}, {transform_indices = @transform_2, window_bounds = array<i64: 1, 1, 10>}, {pipeline_mode = #tpu.pipeline_mode<synchronous>, transform_indices = @transform_3, window_bounds = array<i64: 32, 32>}, {pipeline_mode = #tpu.pipeline_mode<synchronous>, transform_indices = @transform_4, window_bounds = array<i64: 32, 32>}, {pipeline_mode = #tpu.pipeline_mode<synchronous>, transform_indices = @transform_5, window_bounds = array<i64: 32, 32>}, {pipeline_mode = #tpu.pipeline_mode<synchronous>, transform_indices = @transform_6, window_bounds = array<i64: 32, 32>}, {pipeline_mode = #tpu.pipeline_mode<synchronous>, transform_indices = @transform_7, window_bounds = array<i64: 1, 32>}, {pipeline_mode = #tpu.pipeline_mode<synchronous>, transform_indices = @transform_8, window_bounds = array<i64: 1, 32>}, {pipeline_mode = #tpu.pipeline_mode<synchronous>, transform_indices = @transform_9, window_bounds = array<i64: 1, 32>}, {pipeline_mode = #tpu.pipeline_mode<synchronous>, transform_indices = @transform_10, window_bounds = array<i64: 32, 128>}, {pipeline_mode = #tpu.pipeline_mode<synchronous>, transform_indices = @transform_11, window_bounds = array<i64: 1, 128>}, {pipeline_mode = #tpu.pipeline_mode<synchronous>, transform_indices = @transform_12, window_bounds = array<i64: 128, 32>}, {pipeline_mode = #tpu.pipeline_mode<synchronous>, transform_indices = @transform_13, window_bounds = array<i64: 1, 32>}, {pipeline_mode = #tpu.pipeline_mode<synchronous>, transform_indices = @transform_14, window_bounds = array<i64: 1, 32>}, {pipeline_mode = #tpu.pipeline_mode<synchronous>, transform_indices = @transform_15, window_bounds = array<i64: 1, 32>}, {transform_indices = @transform_16, window_bounds = array<i64: 1, 8, 32>}]} {
    %c0 = arith.constant 0 : index
    %c0_0 = arith.constant 0 : index
    %c0_1 = arith.constant 0 : index
    %0 = vector.load %arg1[%c0, %c0_0, %c0_1] : memref<1x8x32xf32, #tpu.memory_space<vmem>>, vector<1x8x32xf32>
    %1 = vector.shape_cast %0 : vector<1x8x32xf32> to vector<8x32xf32>
    %c0_2 = arith.constant 0 : index
    %c0_3 = arith.constant 0 : index
    %c0_4 = arith.constant 0 : index
    %2 = vector.load %arg2[%c0_2, %c0_3, %c0_4] : memref<1x10x32xf32, #tpu.memory_space<vmem>>, vector<1x10x32xf32>
    %3 = vector.shape_cast %2 : vector<1x10x32xf32> to vector<10x32xf32>
    %c0_5 = arith.constant 0 : index
    %c0_6 = arith.constant 0 : index
    %c0_7 = arith.constant 0 : index
    %4 = vector.load %arg3[%c0_5, %c0_6, %c0_7] : memref<1x1x10xf32, #tpu.memory_space<vmem>>, vector<1x1x10xf32>
    %5 = vector.shape_cast %4 : vector<1x1x10xf32> to vector<1x10xf32>
    %c0_8 = arith.constant 0 : index
    %c0_9 = arith.constant 0 : index
    %6 = vector.load %arg4[%c0_8, %c0_9] : memref<32x32xf32, #tpu.memory_space<vmem>>, vector<32x32xf32>
    %c0_10 = arith.constant 0 : index
    %c0_11 = arith.constant 0 : index
    %7 = vector.load %arg5[%c0_10, %c0_11] : memref<32x32xf32, #tpu.memory_space<vmem>>, vector<32x32xf32>
    %c0_12 = arith.constant 0 : index
    %c0_13 = arith.constant 0 : index
    %8 = vector.load %arg6[%c0_12, %c0_13] : memref<32x32xf32, #tpu.memory_space<vmem>>, vector<32x32xf32>
    %c0_14 = arith.constant 0 : index
    %c0_15 = arith.constant 0 : index
    %9 = vector.load %arg7[%c0_14, %c0_15] : memref<32x32xf32, #tpu.memory_space<vmem>>, vector<32x32xf32>
    %c0_16 = arith.constant 0 : index
    %c0_17 = arith.constant 0 : index
    %10 = vector.load %arg8[%c0_16, %c0_17] : memref<1x32xf32, #tpu.memory_space<vmem>>, vector<1x32xf32>
    %cst = arith.constant dense<0.000000e+00> : vector<8x32xf32>
    %11 = tpu.matmul %1, %6, %cst {dimension_numbers = #tpu.dot_dimension_numbers<[1], [0], [0], [1], [0, 0, 1, 1], [], []>} : vector<8x32xf32>, vector<32x32xf32>, vector<8x32xf32> -> vector<8x32xf32>
    %cst_18 = arith.constant dense<0.000000e+00> : vector<10x32xf32>
    %12 = tpu.matmul %3, %7, %cst_18 {dimension_numbers = #tpu.dot_dimension_numbers<[1], [0], [0], [1], [0, 0, 1, 1], [], []>} : vector<10x32xf32>, vector<32x32xf32>, vector<10x32xf32> -> vector<10x32xf32>
    %cst_19 = arith.constant dense<0.000000e+00> : vector<10x32xf32>
    %13 = tpu.matmul %3, %8, %cst_19 {dimension_numbers = #tpu.dot_dimension_numbers<[1], [0], [0], [1], [0, 0, 1, 1], [], []>} : vector<10x32xf32>, vector<32x32xf32>, vector<10x32xf32> -> vector<10x32xf32>
    %cst_20 = arith.constant 0.000000e+00 : f32
    %14 = vector.broadcast %cst_20 : f32 to vector<1x10xf32>
    %15 = arith.cmpf ogt, %5, %14 : vector<1x10xf32>
    %16 = vector.shape_cast %15 : vector<1x10xi1> to vector<1x10xi1>
    %17 = vector.broadcast %16 : vector<1x10xi1> to vector<8x10xi1>
    %18 = vector.extract_strided_slice %11 {offsets = [0, 0], sizes = [8, 4], strides = [1, 1]} : vector<8x32xf32> to vector<8x4xf32>
    %19 = vector.extract_strided_slice %12 {offsets = [0, 0], sizes = [10, 4], strides = [1, 1]} : vector<10x32xf32> to vector<10x4xf32>
    %cst_21 = arith.constant dense<0.000000e+00> : vector<8x10xf32>
    %20 = tpu.matmul %18, %19, %cst_21 {dimension_numbers = #tpu.dot_dimension_numbers<[1], [1], [0], [0], [0, 0, 1, 0], [], []>} : vector<8x4xf32>, vector<10x4xf32>, vector<8x10xf32> -> vector<8x10xf32>
    %cst_22 = arith.constant -1.000000e+20 : f32
    %21 = vector.broadcast %cst_22 : f32 to vector<8x10xf32>
    %22 = arith.select %17, %20, %21 : vector<8x10xi1>, vector<8x10xf32>
    %cst_23 = arith.constant 0.176776692 : f32
    %23 = vector.broadcast %cst_23 : f32 to vector<8x10xf32>
    %24 = arith.mulf %22, %23 : vector<8x10xf32>
    %cst_24 = arith.constant dense<0xFF800000> : vector<8xf32>
    %25 = vector.multi_reduction <maximumf>, %24, %cst_24 [1] : vector<8x10xf32> to vector<8xf32>
    %26 = vector.shape_cast %25 : vector<8xf32> to vector<8x1xf32>
    %27 = vector.broadcast %26 : vector<8x1xf32> to vector<8x10xf32>
    %28 = arith.subf %24, %27 : vector<8x10xf32>
    %29 = math.exp %28 : vector<8x10xf32>
    %cst_25 = arith.constant dense<0.000000e+00> : vector<8xf32>
    %30 = vector.multi_reduction <add>, %29, %cst_25 [1] : vector<8x10xf32> to vector<8xf32>
    %31 = vector.shape_cast %30 : vector<8xf32> to vector<8x1xf32>
    %32 = tpu.reciprocal %31 {approx = true} : vector<8x1xf32> -> vector<8x1xf32>
    %33 = vector.broadcast %32 : vector<8x1xf32> to vector<8x10xf32>
    %34 = arith.mulf %29, %33 : vector<8x10xf32>
    %35 = vector.extract_strided_slice %13 {offsets = [0, 0], sizes = [10, 4], strides = [1, 1]} : vector<10x32xf32> to vector<10x4xf32>
    %cst_26 = arith.constant dense<0.000000e+00> : vector<8x4xf32>
    %36 = tpu.matmul %34, %35, %cst_26 {dimension_numbers = #tpu.dot_dimension_numbers<[1], [0], [0], [1], [0, 0, 1, 1], [], []>} : vector<8x10xf32>, vector<10x4xf32>, vector<8x4xf32> -> vector<8x4xf32>
    %37 = vector.extract_strided_slice %11 {offsets = [0, 4], sizes = [8, 4], strides = [1, 1]} : vector<8x32xf32> to vector<8x4xf32>
    %38 = vector.extract_strided_slice %12 {offsets = [0, 4], sizes = [10, 4], strides = [1, 1]} : vector<10x32xf32> to vector<10x4xf32>
    %cst_27 = arith.constant dense<0.000000e+00> : vector<8x10xf32>
    %39 = tpu.matmul %37, %38, %cst_27 {dimension_numbers = #tpu.dot_dimension_numbers<[1], [1], [0], [0], [0, 0, 1, 0], [], []>} : vector<8x4xf32>, vector<10x4xf32>, vector<8x10xf32> -> vector<8x10xf32>
    %cst_28 = arith.constant -1.000000e+20 : f32
    %40 = vector.broadcast %cst_28 : f32 to vector<8x10xf32>
    %41 = arith.select %17, %39, %40 : vector<8x10xi1>, vector<8x10xf32>
    %cst_29 = arith.constant 0.176776692 : f32
    %42 = vector.broadcast %cst_29 : f32 to vector<8x10xf32>
    %43 = arith.mulf %41, %42 : vector<8x10xf32>
    %cst_30 = arith.constant dense<0xFF800000> : vector<8xf32>
    %44 = vector.multi_reduction <maximumf>, %43, %cst_30 [1] : vector<8x10xf32> to vector<8xf32>
    %45 = vector.shape_cast %44 : vector<8xf32> to vector<8x1xf32>
    %46 = vector.broadcast %45 : vector<8x1xf32> to vector<8x10xf32>
    %47 = arith.subf %43, %46 : vector<8x10xf32>
    %48 = math.exp %47 : vector<8x10xf32>
    %cst_31 = arith.constant dense<0.000000e+00> : vector<8xf32>
    %49 = vector.multi_reduction <add>, %48, %cst_31 [1] : vector<8x10xf32> to vector<8xf32>
    %50 = vector.shape_cast %49 : vector<8xf32> to vector<8x1xf32>
    %51 = tpu.reciprocal %50 {approx = true} : vector<8x1xf32> -> vector<8x1xf32>
    %52 = vector.broadcast %51 : vector<8x1xf32> to vector<8x10xf32>
    %53 = arith.mulf %48, %52 : vector<8x10xf32>
    %54 = vector.extract_strided_slice %13 {offsets = [0, 4], sizes = [10, 4], strides = [1, 1]} : vector<10x32xf32> to vector<10x4xf32>
    %cst_32 = arith.constant dense<0.000000e+00> : vector<8x4xf32>
    %55 = tpu.matmul %53, %54, %cst_32 {dimension_numbers = #tpu.dot_dimension_numbers<[1], [0], [0], [1], [0, 0, 1, 1], [], []>} : vector<8x10xf32>, vector<10x4xf32>, vector<8x4xf32> -> vector<8x4xf32>
    %56 = vector.extract_strided_slice %11 {offsets = [0, 8], sizes = [8, 4], strides = [1, 1]} : vector<8x32xf32> to vector<8x4xf32>
    %57 = vector.extract_strided_slice %12 {offsets = [0, 8], sizes = [10, 4], strides = [1, 1]} : vector<10x32xf32> to vector<10x4xf32>
    %cst_33 = arith.constant dense<0.000000e+00> : vector<8x10xf32>
    %58 = tpu.matmul %56, %57, %cst_33 {dimension_numbers = #tpu.dot_dimension_numbers<[1], [1], [0], [0], [0, 0, 1, 0], [], []>} : vector<8x4xf32>, vector<10x4xf32>, vector<8x10xf32> -> vector<8x10xf32>
    %cst_34 = arith.constant -1.000000e+20 : f32
    %59 = vector.broadcast %cst_34 : f32 to vector<8x10xf32>
    %60 = arith.select %17, %58, %59 : vector<8x10xi1>, vector<8x10xf32>
    %cst_35 = arith.constant 0.176776692 : f32
    %61 = vector.broadcast %cst_35 : f32 to vector<8x10xf32>
    %62 = arith.mulf %60, %61 : vector<8x10xf32>
    %cst_36 = arith.constant dense<0xFF800000> : vector<8xf32>
    %63 = vector.multi_reduction <maximumf>, %62, %cst_36 [1] : vector<8x10xf32> to vector<8xf32>
    %64 = vector.shape_cast %63 : vector<8xf32> to vector<8x1xf32>
    %65 = vector.broadcast %64 : vector<8x1xf32> to vector<8x10xf32>
    %66 = arith.subf %62, %65 : vector<8x10xf32>
    %67 = math.exp %66 : vector<8x10xf32>
    %cst_37 = arith.constant dense<0.000000e+00> : vector<8xf32>
    %68 = vector.multi_reduction <add>, %67, %cst_37 [1] : vector<8x10xf32> to vector<8xf32>
    %69 = vector.shape_cast %68 : vector<8xf32> to vector<8x1xf32>
    %70 = tpu.reciprocal %69 {approx = true} : vector<8x1xf32> -> vector<8x1xf32>
    %71 = vector.broadcast %70 : vector<8x1xf32> to vector<8x10xf32>
    %72 = arith.mulf %67, %71 : vector<8x10xf32>
    %73 = vector.extract_strided_slice %13 {offsets = [0, 8], sizes = [10, 4], strides = [1, 1]} : vector<10x32xf32> to vector<10x4xf32>
    %cst_38 = arith.constant dense<0.000000e+00> : vector<8x4xf32>
    %74 = tpu.matmul %72, %73, %cst_38 {dimension_numbers = #tpu.dot_dimension_numbers<[1], [0], [0], [1], [0, 0, 1, 1], [], []>} : vector<8x10xf32>, vector<10x4xf32>, vector<8x4xf32> -> vector<8x4xf32>
    %75 = vector.extract_strided_slice %11 {offsets = [0, 12], sizes = [8, 4], strides = [1, 1]} : vector<8x32xf32> to vector<8x4xf32>
    %76 = vector.extract_strided_slice %12 {offsets = [0, 12], sizes = [10, 4], strides = [1, 1]} : vector<10x32xf32> to vector<10x4xf32>
    %cst_39 = arith.constant dense<0.000000e+00> : vector<8x10xf32>
    %77 = tpu.matmul %75, %76, %cst_39 {dimension_numbers = #tpu.dot_dimension_numbers<[1], [1], [0], [0], [0, 0, 1, 0], [], []>} : vector<8x4xf32>, vector<10x4xf32>, vector<8x10xf32> -> vector<8x10xf32>
    %cst_40 = arith.constant -1.000000e+20 : f32
    %78 = vector.broadcast %cst_40 : f32 to vector<8x10xf32>
    %79 = arith.select %17, %77, %78 : vector<8x10xi1>, vector<8x10xf32>
    %cst_41 = arith.constant 0.176776692 : f32
    %80 = vector.broadcast %cst_41 : f32 to vector<8x10xf32>
    %81 = arith.mulf %79, %80 : vector<8x10xf32>
    %cst_42 = arith.constant dense<0xFF800000> : vector<8xf32>
    %82 = vector.multi_reduction <maximumf>, %81, %cst_42 [1] : vector<8x10xf32> to vector<8xf32>
    %83 = vector.shape_cast %82 : vector<8xf32> to vector<8x1xf32>
    %84 = vector.broadcast %83 : vector<8x1xf32> to vector<8x10xf32>
    %85 = arith.subf %81, %84 : vector<8x10xf32>
    %86 = math.exp %85 : vector<8x10xf32>
    %cst_43 = arith.constant dense<0.000000e+00> : vector<8xf32>
    %87 = vector.multi_reduction <add>, %86, %cst_43 [1] : vector<8x10xf32> to vector<8xf32>
    %88 = vector.shape_cast %87 : vector<8xf32> to vector<8x1xf32>
    %89 = tpu.reciprocal %88 {approx = true} : vector<8x1xf32> -> vector<8x1xf32>
    %90 = vector.broadcast %89 : vector<8x1xf32> to vector<8x10xf32>
    %91 = arith.mulf %86, %90 : vector<8x10xf32>
    %92 = vector.extract_strided_slice %13 {offsets = [0, 12], sizes = [10, 4], strides = [1, 1]} : vector<10x32xf32> to vector<10x4xf32>
    %cst_44 = arith.constant dense<0.000000e+00> : vector<8x4xf32>
    %93 = tpu.matmul %91, %92, %cst_44 {dimension_numbers = #tpu.dot_dimension_numbers<[1], [0], [0], [1], [0, 0, 1, 1], [], []>} : vector<8x10xf32>, vector<10x4xf32>, vector<8x4xf32> -> vector<8x4xf32>
    %94 = vector.extract_strided_slice %11 {offsets = [0, 16], sizes = [8, 4], strides = [1, 1]} : vector<8x32xf32> to vector<8x4xf32>
    %95 = vector.extract_strided_slice %12 {offsets = [0, 16], sizes = [10, 4], strides = [1, 1]} : vector<10x32xf32> to vector<10x4xf32>
    %cst_45 = arith.constant dense<0.000000e+00> : vector<8x10xf32>
    %96 = tpu.matmul %94, %95, %cst_45 {dimension_numbers = #tpu.dot_dimension_numbers<[1], [1], [0], [0], [0, 0, 1, 0], [], []>} : vector<8x4xf32>, vector<10x4xf32>, vector<8x10xf32> -> vector<8x10xf32>
    %cst_46 = arith.constant -1.000000e+20 : f32
    %97 = vector.broadcast %cst_46 : f32 to vector<8x10xf32>
    %98 = arith.select %17, %96, %97 : vector<8x10xi1>, vector<8x10xf32>
    %cst_47 = arith.constant 0.176776692 : f32
    %99 = vector.broadcast %cst_47 : f32 to vector<8x10xf32>
    %100 = arith.mulf %98, %99 : vector<8x10xf32>
    %cst_48 = arith.constant dense<0xFF800000> : vector<8xf32>
    %101 = vector.multi_reduction <maximumf>, %100, %cst_48 [1] : vector<8x10xf32> to vector<8xf32>
    %102 = vector.shape_cast %101 : vector<8xf32> to vector<8x1xf32>
    %103 = vector.broadcast %102 : vector<8x1xf32> to vector<8x10xf32>
    %104 = arith.subf %100, %103 : vector<8x10xf32>
    %105 = math.exp %104 : vector<8x10xf32>
    %cst_49 = arith.constant dense<0.000000e+00> : vector<8xf32>
    %106 = vector.multi_reduction <add>, %105, %cst_49 [1] : vector<8x10xf32> to vector<8xf32>
    %107 = vector.shape_cast %106 : vector<8xf32> to vector<8x1xf32>
    %108 = tpu.reciprocal %107 {approx = true} : vector<8x1xf32> -> vector<8x1xf32>
    %109 = vector.broadcast %108 : vector<8x1xf32> to vector<8x10xf32>
    %110 = arith.mulf %105, %109 : vector<8x10xf32>
    %111 = vector.extract_strided_slice %13 {offsets = [0, 16], sizes = [10, 4], strides = [1, 1]} : vector<10x32xf32> to vector<10x4xf32>
    %cst_50 = arith.constant dense<0.000000e+00> : vector<8x4xf32>
    %112 = tpu.matmul %110, %111, %cst_50 {dimension_numbers = #tpu.dot_dimension_numbers<[1], [0], [0], [1], [0, 0, 1, 1], [], []>} : vector<8x10xf32>, vector<10x4xf32>, vector<8x4xf32> -> vector<8x4xf32>
    %113 = vector.extract_strided_slice %11 {offsets = [0, 20], sizes = [8, 4], strides = [1, 1]} : vector<8x32xf32> to vector<8x4xf32>
    %114 = vector.extract_strided_slice %12 {offsets = [0, 20], sizes = [10, 4], strides = [1, 1]} : vector<10x32xf32> to vector<10x4xf32>
    %cst_51 = arith.constant dense<0.000000e+00> : vector<8x10xf32>
    %115 = tpu.matmul %113, %114, %cst_51 {dimension_numbers = #tpu.dot_dimension_numbers<[1], [1], [0], [0], [0, 0, 1, 0], [], []>} : vector<8x4xf32>, vector<10x4xf32>, vector<8x10xf32> -> vector<8x10xf32>
    %cst_52 = arith.constant -1.000000e+20 : f32
    %116 = vector.broadcast %cst_52 : f32 to vector<8x10xf32>
    %117 = arith.select %17, %115, %116 : vector<8x10xi1>, vector<8x10xf32>
    %cst_53 = arith.constant 0.176776692 : f32
    %118 = vector.broadcast %cst_53 : f32 to vector<8x10xf32>
    %119 = arith.mulf %117, %118 : vector<8x10xf32>
    %cst_54 = arith.constant dense<0xFF800000> : vector<8xf32>
    %120 = vector.multi_reduction <maximumf>, %119, %cst_54 [1] : vector<8x10xf32> to vector<8xf32>
    %121 = vector.shape_cast %120 : vector<8xf32> to vector<8x1xf32>
    %122 = vector.broadcast %121 : vector<8x1xf32> to vector<8x10xf32>
    %123 = arith.subf %119, %122 : vector<8x10xf32>
    %124 = math.exp %123 : vector<8x10xf32>
    %cst_55 = arith.constant dense<0.000000e+00> : vector<8xf32>
    %125 = vector.multi_reduction <add>, %124, %cst_55 [1] : vector<8x10xf32> to vector<8xf32>
    %126 = vector.shape_cast %125 : vector<8xf32> to vector<8x1xf32>
    %127 = tpu.reciprocal %126 {approx = true} : vector<8x1xf32> -> vector<8x1xf32>
    %128 = vector.broadcast %127 : vector<8x1xf32> to vector<8x10xf32>
    %129 = arith.mulf %124, %128 : vector<8x10xf32>
    %130 = vector.extract_strided_slice %13 {offsets = [0, 20], sizes = [10, 4], strides = [1, 1]} : vector<10x32xf32> to vector<10x4xf32>
    %cst_56 = arith.constant dense<0.000000e+00> : vector<8x4xf32>
    %131 = tpu.matmul %129, %130, %cst_56 {dimension_numbers = #tpu.dot_dimension_numbers<[1], [0], [0], [1], [0, 0, 1, 1], [], []>} : vector<8x10xf32>, vector<10x4xf32>, vector<8x4xf32> -> vector<8x4xf32>
    %132 = vector.extract_strided_slice %11 {offsets = [0, 24], sizes = [8, 4], strides = [1, 1]} : vector<8x32xf32> to vector<8x4xf32>
    %133 = vector.extract_strided_slice %12 {offsets = [0, 24], sizes = [10, 4], strides = [1, 1]} : vector<10x32xf32> to vector<10x4xf32>
    %cst_57 = arith.constant dense<0.000000e+00> : vector<8x10xf32>
    %134 = tpu.matmul %132, %133, %cst_57 {dimension_numbers = #tpu.dot_dimension_numbers<[1], [1], [0], [0], [0, 0, 1, 0], [], []>} : vector<8x4xf32>, vector<10x4xf32>, vector<8x10xf32> -> vector<8x10xf32>
    %cst_58 = arith.constant -1.000000e+20 : f32
    %135 = vector.broadcast %cst_58 : f32 to vector<8x10xf32>
    %136 = arith.select %17, %134, %135 : vector<8x10xi1>, vector<8x10xf32>
    %cst_59 = arith.constant 0.176776692 : f32
    %137 = vector.broadcast %cst_59 : f32 to vector<8x10xf32>
    %138 = arith.mulf %136, %137 : vector<8x10xf32>
    %cst_60 = arith.constant dense<0xFF800000> : vector<8xf32>
    %139 = vector.multi_reduction <maximumf>, %138, %cst_60 [1] : vector<8x10xf32> to vector<8xf32>
    %140 = vector.shape_cast %139 : vector<8xf32> to vector<8x1xf32>
    %141 = vector.broadcast %140 : vector<8x1xf32> to vector<8x10xf32>
    %142 = arith.subf %138, %141 : vector<8x10xf32>
    %143 = math.exp %142 : vector<8x10xf32>
    %cst_61 = arith.constant dense<0.000000e+00> : vector<8xf32>
    %144 = vector.multi_reduction <add>, %143, %cst_61 [1] : vector<8x10xf32> to vector<8xf32>
    %145 = vector.shape_cast %144 : vector<8xf32> to vector<8x1xf32>
    %146 = tpu.reciprocal %145 {approx = true} : vector<8x1xf32> -> vector<8x1xf32>
    %147 = vector.broadcast %146 : vector<8x1xf32> to vector<8x10xf32>
    %148 = arith.mulf %143, %147 : vector<8x10xf32>
    %149 = vector.extract_strided_slice %13 {offsets = [0, 24], sizes = [10, 4], strides = [1, 1]} : vector<10x32xf32> to vector<10x4xf32>
    %cst_62 = arith.constant dense<0.000000e+00> : vector<8x4xf32>
    %150 = tpu.matmul %148, %149, %cst_62 {dimension_numbers = #tpu.dot_dimension_numbers<[1], [0], [0], [1], [0, 0, 1, 1], [], []>} : vector<8x10xf32>, vector<10x4xf32>, vector<8x4xf32> -> vector<8x4xf32>
    %151 = vector.extract_strided_slice %11 {offsets = [0, 28], sizes = [8, 4], strides = [1, 1]} : vector<8x32xf32> to vector<8x4xf32>
    %152 = vector.extract_strided_slice %12 {offsets = [0, 28], sizes = [10, 4], strides = [1, 1]} : vector<10x32xf32> to vector<10x4xf32>
    %cst_63 = arith.constant dense<0.000000e+00> : vector<8x10xf32>
    %153 = tpu.matmul %151, %152, %cst_63 {dimension_numbers = #tpu.dot_dimension_numbers<[1], [1], [0], [0], [0, 0, 1, 0], [], []>} : vector<8x4xf32>, vector<10x4xf32>, vector<8x10xf32> -> vector<8x10xf32>
    %cst_64 = arith.constant -1.000000e+20 : f32
    %154 = vector.broadcast %cst_64 : f32 to vector<8x10xf32>
    %155 = arith.select %17, %153, %154 : vector<8x10xi1>, vector<8x10xf32>
    %cst_65 = arith.constant 0.176776692 : f32
    %156 = vector.broadcast %cst_65 : f32 to vector<8x10xf32>
    %157 = arith.mulf %155, %156 : vector<8x10xf32>
    %cst_66 = arith.constant dense<0xFF800000> : vector<8xf32>
    %158 = vector.multi_reduction <maximumf>, %157, %cst_66 [1] : vector<8x10xf32> to vector<8xf32>
    %159 = vector.shape_cast %158 : vector<8xf32> to vector<8x1xf32>
    %160 = vector.broadcast %159 : vector<8x1xf32> to vector<8x10xf32>
    %161 = arith.subf %157, %160 : vector<8x10xf32>
    %162 = math.exp %161 : vector<8x10xf32>
    %cst_67 = arith.constant dense<0.000000e+00> : vector<8xf32>
    %163 = vector.multi_reduction <add>, %162, %cst_67 [1] : vector<8x10xf32> to vector<8xf32>
    %164 = vector.shape_cast %163 : vector<8xf32> to vector<8x1xf32>
    %165 = tpu.reciprocal %164 {approx = true} : vector<8x1xf32> -> vector<8x1xf32>
    %166 = vector.broadcast %165 : vector<8x1xf32> to vector<8x10xf32>
    %167 = arith.mulf %162, %166 : vector<8x10xf32>
    %168 = vector.extract_strided_slice %13 {offsets = [0, 28], sizes = [10, 4], strides = [1, 1]} : vector<10x32xf32> to vector<10x4xf32>
    %cst_68 = arith.constant dense<0.000000e+00> : vector<8x4xf32>
    %169 = tpu.matmul %167, %168, %cst_68 {dimension_numbers = #tpu.dot_dimension_numbers<[1], [0], [0], [1], [0, 0, 1, 1], [], []>} : vector<8x10xf32>, vector<10x4xf32>, vector<8x4xf32> -> vector<8x4xf32>
    %170 = tpu.concatenate %36, %55, %74, %93, %112, %131, %150, %169 in 1 : vector<8x4xf32>, vector<8x4xf32>, vector<8x4xf32>, vector<8x4xf32>, vector<8x4xf32>, vector<8x4xf32>, vector<8x4xf32>, vector<8x4xf32> -> vector<8x32xf32>
    %cst_69 = arith.constant dense<0.000000e+00> : vector<8x32xf32>
    %171 = tpu.matmul %170, %9, %cst_69 {dimension_numbers = #tpu.dot_dimension_numbers<[1], [0], [0], [1], [0, 0, 1, 1], [], []>} : vector<8x32xf32>, vector<32x32xf32>, vector<8x32xf32> -> vector<8x32xf32>
    %172 = vector.broadcast %10 : vector<1x32xf32> to vector<8x32xf32>
    %173 = arith.addf %171, %172 : vector<8x32xf32>
    %c0_70 = arith.constant 0 : index
    %c0_71 = arith.constant 0 : index
    %174 = vector.load %arg9[%c0_70, %c0_71] : memref<1x32xf32, #tpu.memory_space<vmem>>, vector<1x32xf32>
    %c0_72 = arith.constant 0 : index
    %c0_73 = arith.constant 0 : index
    %175 = vector.load %arg10[%c0_72, %c0_73] : memref<1x32xf32, #tpu.memory_space<vmem>>, vector<1x32xf32>
    %176 = arith.addf %173, %1 : vector<8x32xf32>
    %cst_74 = arith.constant dense<0.000000e+00> : vector<8xf32>
    %177 = vector.multi_reduction <add>, %176, %cst_74 [1] : vector<8x32xf32> to vector<8xf32>
    %178 = vector.shape_cast %177 : vector<8xf32> to vector<8x1xf32>
    %cst_75 = arith.constant 3.200000e+01 : f32
    %179 = vector.broadcast %cst_75 : f32 to vector<8x1xf32>
    %180 = arith.divf %178, %179 : vector<8x1xf32>
    %181 = vector.broadcast %180 : vector<8x1xf32> to vector<8x32xf32>
    %182 = arith.subf %176, %181 : vector<8x32xf32>
    %183 = arith.mulf %182, %182 : vector<8x32xf32>
    %cst_76 = arith.constant dense<0.000000e+00> : vector<8xf32>
    %184 = vector.multi_reduction <add>, %183, %cst_76 [1] : vector<8x32xf32> to vector<8xf32>
    %185 = vector.shape_cast %184 : vector<8xf32> to vector<8x1xf32>
    %cst_77 = arith.constant 3.200000e+01 : f32
    %186 = vector.broadcast %cst_77 : f32 to vector<8x1xf32>
    %187 = arith.divf %185, %186 : vector<8x1xf32>
    %188 = vector.broadcast %180 : vector<8x1xf32> to vector<8x32xf32>
    %189 = arith.subf %176, %188 : vector<8x32xf32>
    %cst_78 = arith.constant 9.99999974E-6 : f32
    %190 = vector.broadcast %cst_78 : f32 to vector<8x1xf32>
    %191 = arith.addf %187, %190 : vector<8x1xf32>
    %192 = math.rsqrt %191 : vector<8x1xf32>
    %193 = vector.broadcast %192 : vector<8x1xf32> to vector<8x32xf32>
    %194 = arith.mulf %189, %193 : vector<8x32xf32>
    %195 = vector.broadcast %174 : vector<1x32xf32> to vector<8x32xf32>
    %196 = arith.mulf %194, %195 : vector<8x32xf32>
    %197 = vector.broadcast %175 : vector<1x32xf32> to vector<8x32xf32>
    %198 = arith.addf %196, %197 : vector<8x32xf32>
    %c0_79 = arith.constant 0 : index
    %c0_80 = arith.constant 0 : index
    %199 = vector.load %arg11[%c0_79, %c0_80] : memref<32x128xf32, #tpu.memory_space<vmem>>, vector<32x128xf32>
    %cst_81 = arith.constant dense<0.000000e+00> : vector<8x128xf32>
    %200 = tpu.matmul %198, %199, %cst_81 {dimension_numbers = #tpu.dot_dimension_numbers<[1], [0], [0], [1], [0, 0, 1, 1], [], []>} : vector<8x32xf32>, vector<32x128xf32>, vector<8x128xf32> -> vector<8x128xf32>
    %c0_82 = arith.constant 0 : index
    %c0_83 = arith.constant 0 : index
    %201 = vector.load %arg12[%c0_82, %c0_83] : memref<1x128xf32, #tpu.memory_space<vmem>>, vector<1x128xf32>
    %202 = vector.broadcast %201 : vector<1x128xf32> to vector<8x128xf32>
    %203 = arith.addf %200, %202 : vector<8x128xf32>
    %cst_84 = arith.constant 0.000000e+00 : f32
    %204 = vector.broadcast %cst_84 : f32 to vector<8x128xf32>
    %205 = arith.maximumf %203, %204 : vector<8x128xf32>
    %c0_85 = arith.constant 0 : index
    %c0_86 = arith.constant 0 : index
    %206 = vector.load %arg13[%c0_85, %c0_86] : memref<128x32xf32, #tpu.memory_space<vmem>>, vector<128x32xf32>
    %cst_87 = arith.constant dense<0.000000e+00> : vector<8x32xf32>
    %207 = tpu.matmul %205, %206, %cst_87 {dimension_numbers = #tpu.dot_dimension_numbers<[1], [0], [0], [1], [0, 0, 1, 1], [], []>} : vector<8x128xf32>, vector<128x32xf32>, vector<8x32xf32> -> vector<8x32xf32>
    %c0_88 = arith.constant 0 : index
    %c0_89 = arith.constant 0 : index
    %208 = vector.load %arg14[%c0_88, %c0_89] : memref<1x32xf32, #tpu.memory_space<vmem>>, vector<1x32xf32>
    %209 = vector.broadcast %208 : vector<1x32xf32> to vector<8x32xf32>
    %210 = arith.addf %207, %209 : vector<8x32xf32>
    %c0_90 = arith.constant 0 : index
    %c0_91 = arith.constant 0 : index
    %211 = vector.load %arg15[%c0_90, %c0_91] : memref<1x32xf32, #tpu.memory_space<vmem>>, vector<1x32xf32>
    %c0_92 = arith.constant 0 : index
    %c0_93 = arith.constant 0 : index
    %212 = vector.load %arg16[%c0_92, %c0_93] : memref<1x32xf32, #tpu.memory_space<vmem>>, vector<1x32xf32>
    %213 = arith.addf %210, %198 : vector<8x32xf32>
    %cst_94 = arith.constant dense<0.000000e+00> : vector<8xf32>
    %214 = vector.multi_reduction <add>, %213, %cst_94 [1] : vector<8x32xf32> to vector<8xf32>
    %215 = vector.shape_cast %214 : vector<8xf32> to vector<8x1xf32>
    %cst_95 = arith.constant 3.200000e+01 : f32
    %216 = vector.broadcast %cst_95 : f32 to vector<8x1xf32>
    %217 = arith.divf %215, %216 : vector<8x1xf32>
    %218 = vector.broadcast %217 : vector<8x1xf32> to vector<8x32xf32>
    %219 = arith.subf %213, %218 : vector<8x32xf32>
    %220 = arith.mulf %219, %219 : vector<8x32xf32>
    %cst_96 = arith.constant dense<0.000000e+00> : vector<8xf32>
    %221 = vector.multi_reduction <add>, %220, %cst_96 [1] : vector<8x32xf32> to vector<8xf32>
    %222 = vector.shape_cast %221 : vector<8xf32> to vector<8x1xf32>
    %cst_97 = arith.constant 3.200000e+01 : f32
    %223 = vector.broadcast %cst_97 : f32 to vector<8x1xf32>
    %224 = arith.divf %222, %223 : vector<8x1xf32>
    %225 = vector.broadcast %217 : vector<8x1xf32> to vector<8x32xf32>
    %226 = arith.subf %213, %225 : vector<8x32xf32>
    %cst_98 = arith.constant 9.99999974E-6 : f32
    %227 = vector.broadcast %cst_98 : f32 to vector<8x1xf32>
    %228 = arith.addf %224, %227 : vector<8x1xf32>
    %229 = math.rsqrt %228 : vector<8x1xf32>
    %230 = vector.broadcast %229 : vector<8x1xf32> to vector<8x32xf32>
    %231 = arith.mulf %226, %230 : vector<8x32xf32>
    %232 = vector.broadcast %211 : vector<1x32xf32> to vector<8x32xf32>
    %233 = arith.mulf %231, %232 : vector<8x32xf32>
    %234 = vector.broadcast %212 : vector<1x32xf32> to vector<8x32xf32>
    %235 = arith.addf %233, %234 : vector<8x32xf32>
    %c0_99 = arith.constant 0 : index
    %c0_100 = arith.constant 0 : index
    %c0_101 = arith.constant 0 : index
    %236 = vector.load %arg17[%c0_99, %c0_100, %c0_101] : memref<1x8x32xf32, #tpu.memory_space<vmem>>, vector<1x8x32xf32>
    %237 = vector.shape_cast %236 : vector<1x8x32xf32> to vector<8x32xf32>
    %238 = vector.shape_cast %235 : vector<8x32xf32> to vector<1x8x32xf32>
    tpu.vector_store %arg17[%c0_99, %c0_100, %c0_101], %238 {strides = array<i32>} : memref<1x8x32xf32, #tpu.memory_space<vmem>>, vector<1x8x32xf32>,
    return
  }
  func.func @transform_0(%arg0: i32) -> (i32, i32, i32) {
    %c0_i32 = arith.constant 0 : i32
    %c0_i32_0 = arith.constant 0 : i32
    %c0_i32_1 = arith.constant 0 : i32
    return %arg0, %c0_i32, %c0_i32_0 : i32, i32, i32
  }
  func.func @transform_1(%arg0: i32) -> (i32, i32, i32) {
    %c0_i32 = arith.constant 0 : i32
    %c0_i32_0 = arith.constant 0 : i32
    %c0_i32_1 = arith.constant 0 : i32
    return %arg0, %c0_i32, %c0_i32_0 : i32, i32, i32
  }
  func.func @transform_2(%arg0: i32) -> (i32, i32, i32) {
    %c0_i32 = arith.constant 0 : i32
    %c0_i32_0 = arith.constant 0 : i32
    %c0_i32_1 = arith.constant 0 : i32
    return %arg0, %c0_i32, %c0_i32_0 : i32, i32, i32
  }
  func.func @transform_3(%arg0: i32) -> (i32, i32) {
    %c0_i32 = arith.constant 0 : i32
    %c0_i32_0 = arith.constant 0 : i32
    %c0_i32_1 = arith.constant 0 : i32
    return %c0_i32, %c0_i32_0 : i32, i32
  }
  func.func @transform_4(%arg0: i32) -> (i32, i32) {
    %c0_i32 = arith.constant 0 : i32
    %c0_i32_0 = arith.constant 0 : i32
    %c0_i32_1 = arith.constant 0 : i32
    return %c0_i32, %c0_i32_0 : i32, i32
  }
  func.func @transform_5(%arg0: i32) -> (i32, i32) {
    %c0_i32 = arith.constant 0 : i32
    %c0_i32_0 = arith.constant 0 : i32
    %c0_i32_1 = arith.constant 0 : i32
    return %c0_i32, %c0_i32_0 : i32, i32
  }
  func.func @transform_6(%arg0: i32) -> (i32, i32) {
    %c0_i32 = arith.constant 0 : i32
    %c0_i32_0 = arith.constant 0 : i32
    %c0_i32_1 = arith.constant 0 : i32
    return %c0_i32, %c0_i32_0 : i32, i32
  }
  func.func @transform_7(%arg0: i32) -> (i32, i32) {
    %c0_i32 = arith.constant 0 : i32
    %c0_i32_0 = arith.constant 0 : i32
    %c0_i32_1 = arith.constant 0 : i32
    return %c0_i32, %c0_i32_0 : i32, i32
  }
  func.func @transform_8(%arg0: i32) -> (i32, i32) {
    %c0_i32 = arith.constant 0 : i32
    %c0_i32_0 = arith.constant 0 : i32
    %c0_i32_1 = arith.constant 0 : i32
    return %c0_i32, %c0_i32_0 : i32, i32
  }
  func.func @transform_9(%arg0: i32) -> (i32, i32) {
    %c0_i32 = arith.constant 0 : i32
    %c0_i32_0 = arith.constant 0 : i32
    %c0_i32_1 = arith.constant 0 : i32
    return %c0_i32, %c0_i32_0 : i32, i32
  }
  func.func @transform_10(%arg0: i32) -> (i32, i32) {
    %c0_i32 = arith.constant 0 : i32
    %c0_i32_0 = arith.constant 0 : i32
    %c0_i32_1 = arith.constant 0 : i32
    return %c0_i32, %c0_i32_0 : i32, i32
  }
  func.func @transform_11(%arg0: i32) -> (i32, i32) {
    %c0_i32 = arith.constant 0 : i32
    %c0_i32_0 = arith.constant 0 : i32
    %c0_i32_1 = arith.constant 0 : i32
    return %c0_i32, %c0_i32_0 : i32, i32
  }
  func.func @transform_12(%arg0: i32) -> (i32, i32) {
    %c0_i32 = arith.constant 0 : i32
    %c0_i32_0 = arith.constant 0 : i32
    %c0_i32_1 = arith.constant 0 : i32
    return %c0_i32, %c0_i32_0 : i32, i32
  }
  func.func @transform_13(%arg0: i32) -> (i32, i32) {
    %c0_i32 = arith.constant 0 : i32
    %c0_i32_0 = arith.constant 0 : i32
    %c0_i32_1 = arith.constant 0 : i32
    return %c0_i32, %c0_i32_0 : i32, i32
  }
  func.func @transform_14(%arg0: i32) -> (i32, i32) {
    %c0_i32 = arith.constant 0 : i32
    %c0_i32_0 = arith.constant 0 : i32
    %c0_i32_1 = arith.constant 0 : i32
    return %c0_i32, %c0_i32_0 : i32, i32
  }
  func.func @transform_15(%arg0: i32) -> (i32, i32) {
    %c0_i32 = arith.constant 0 : i32
    %c0_i32_0 = arith.constant 0 : i32
    %c0_i32_1 = arith.constant 0 : i32
    return %c0_i32, %c0_i32_0 : i32, i32
  }
  func.func @transform_16(%arg0: i32) -> (i32, i32, i32) {
    %c0_i32 = arith.constant 0 : i32
    %c0_i32_0 = arith.constant 0 : i32
    %c0_i32_1 = arith.constant 0 : i32
    return %arg0, %c0_i32, %c0_i32_0 : i32, i32, i32
  }
}

</mosaic_0001>

<bundles_post_ra>
// kernel: transformer_forward.13
= control target key start
LH: loop header
LB: loop body
LE: loop exit
PB: predicated region body
PF: predicated region fallthrough
CT: control target
= control target key end

     0   :  { %vm28_vm0 = vcmask 261120   ;;  %s239_s0 = inlined_call_operand.vmem [shape: f32[16,32], index: 0, kind: input, shape index: {}]   ;;  %s240_s1 = inlined_call_operand.vmem [shape: f32[32,128], index: 1, kind: input, shape index: {}]   ;;  %s241_s2 = inlined_call_operand.vmem [shape: f32[1,128], index: 2, kind: input, shape index: {}]   ;;  %s242_s3 = inlined_call_operand.hbm [shape: f32[16,128], index: 3, kind: output, shape index: {}]  }
   0x1   :  { %v17_v0 = vld [vmem:[%s240_s1] sm:$0xff]  ;;  %v18_v1 = vld [vmem:[%s240_s1 + $0x8] sm:$0xff]  ;;  %v19_v2 = vld [vmem:[%s240_s1 + $0x10] sm:$0xff] }
   0x2   :  { %v148_v3 = vpack.c.bf16 %v18_v1, %v17_v0  ;;  %v20_v4 = vld [vmem:[%s240_s1 + $0x18] sm:$0xff]  ;;  %v15_v5 = vld [vmem:[%s239_s0] sm:$0xff] }
   0x3   :  { %v152_v6 = vpack.c.bf16 %v20_v4, %v19_v2  ;;  %145 = vmatprep.mubr.msk.f32.mxu0 %vm28_vm0, %v15_v5 }
   0x4   :  { %8 = vsyncpa [#allocation3], 0  ;;  %149 = vmatprep.subr.bf16.mxu0 %v148_v3  ;;  %v16_v7 = vld [vmem:[%s239_s0 + $0x8] sm:$0xff]  ;;  %v128_v8 = vld [vmem:[%s241_s2] ss:$0 sm:$0xff]  ;;  %s183_s1 = smov [#allocation2]  }
   0x5   :  { %151 = vmatpush3.bf16.msra.mxu0 %v148_v3  ;;  %s117_s26 = sshll.u32 %s183_s1, 4  ;;  %s118_s26 = int_to_ptr.vmem [resolvable:$true] %s117_s26 }
   0x6   :  { %153 = vmatprep.subr.bf16.mxu0 %v152_v6  ;;  %s159_s27 = scalar_lea.vmem %s118_s26, 256  ;;  %p164_p1 = scmp.lt.s32.totalorder %s118_s26, %s118_s26 }
   0x7   :  { %p160_p0 = scmp.ne.s32.totalorder %s118_s26, %s159_s27  ;;  %p165_p2 = scmp.lt.s32.totalorder %s159_s27, %s159_s27 }
   0x9   :  { %155 = vmatpush3.bf16.msra.mxu0 %v152_v6  ;;  %p166_p3 = por %p165_p2, %p164_p1 }
   0xb   :  { %p167_p4 = pnand %p166_p3, %p160_p0 }
   0xc   :  { %146 = vmatmul.mubr.msk.f32.vlgmr.msra.gmra.mrb[0].mxu0 %vm28_vm0, %v16_v7 }
  0xdf   :  { %v147_v9 = vpop.f32.mrb[0].mxu0 }
  0xe0   :  { %v107_v10 = vadd.f32 %v147_v9, %v128_v8  ;;  %v101_v11 = vpop.f32.mrb[1].mxu0 }
  0xe1   :  { %v102_v12 = vadd.f32 %v128_v8, %v101_v11 }
  0xe2   :  { %111 = vst [vmem:[#allocation2 + $0x8] sm:$0xff] %v107_v10 }
  0xe3   :  { %110 = vst [vmem:[#allocation2] sm:$0xff] %v102_v12 }
  0xe4   :  { %170 = shalt.err (!%p167_p4)
}
  0xe5   :  { %s171_s2 = scalar_lea.hbm %s242_s3, 256 }
  0xe6   :  { %p172_p5 = scmp.ne.s32.totalorder %s242_s3, %s171_s2  ;;  %p175_p6 = scmp.lt.u32.totalorder %s171_s2, %s242_s3 }
  0xe8   :  { %p177_p7 = pnand %p175_p6, %p172_p5 }
  0xea   :  { %180 = shalt.err (!%p177_p7)
}
  0xeb   :  { %s184_s6 = smov 128   ;;  %s185_s7 = smov 8  }
  0xec   :  { %123 = dma.vmem_to_hbm [thread:$0]  %s118_s26, 256, %s242_s3, [#allocation3], %s184_s6, %s184_s6, %s185_s7  }
  0xed   :  { %181 = dma.done.wait [#allocation3], 256  }
  0xee   :  { %182 = vsyncadd [#allocation3], 4294967040 }
  0xef   :  { %127 = vsyncpa [#allocation3], 1 }

// kernel: transformer_forward.9
= control target key start
LH: loop header
LB: loop body
LE: loop exit
PB: predicated region body
PF: predicated region fallthrough
CT: control target
= control target key end

     0   :  { %s2511_s30 = smov 0   ;;  %s2813_s0 = inlined_call_operand.vmem [shape: f32[2,8,32], index: 0, kind: input, shape index: {}]   ;;  %s2814_s1 = inlined_call_operand.vmem [shape: f32[2,1,8], index: 1, kind: input, shape index: {}]   ;;  %s2815_s2 = inlined_call_operand.vmem [shape: f32[32,32], index: 2, kind: input, shape index: {}]   ;;  %s2816_s3 = inlined_call_operand.vmem [shape: f32[32,32], index: 3, kind: input, shape index: {}]   ;;  %s2817_s4 = inlined_call_operand.vmem [shape: f32[32,32], index: 4, kind: input, shape index: {}]   ;;  %s2818_s5 = inlined_call_operand.vmem [shape: f32[32,32], index: 5, kind: input, shape index: {}]   ;;  %s2819_s6 = inlined_call_operand.vmem [shape: f32[1,32], index: 6, kind: input, shape index: {}]   ;;  %s2820_s7 = inlined_call_operand.vmem [shape: f32[1,32], index: 7, kind: input, shape index: {}]   ;;  %s2821_s8 = inlined_call_operand.vmem [shape: f32[1,32], index: 8, kind: input, shape index: {}]   ;;  %s2822_s9 = inlined_call_operand.vmem [shape: f32[2,8,32], index: 9, kind: output, shape index: {}]  }
   0x1 LB: > { %s2135_s10 = sadd.s32 4294967295, %s2441_s30   ;;  %p2139_p0 = scmp.ge.s32.totalorder %s2441_s30, 1  ;;  %s2441_s30 = sphi %s2511_s30, %s19_s30  }
   0x2   : > { %p294_p1 = scmp.lt.s32.totalorder %s2441_s30, 3 }
   0x4   : > { %p295_p2 = pnand %p2139_p0, %p294_p1 }
   0x5   : > { %v348_v0 = vld [vmem:[%s2816_s3] sm:$0xff] (!%p295_p2)  ;;  %v349_v1 = vld [vmem:[%s2816_s3 + $0x8] sm:$0xff] (!%p295_p2)  ;;  %v2443_v3 = vmov (!%p295_p2), 0.0|0.0   ;;  %v350_v6 = vld [vmem:[%s2816_s3 + $0x10] sm:$0xff] (!%p295_p2)  ;;  %p331_p3 = scmp.lt.s32.totalorder (!%p295_p2), %s2135_s10, 1  ;;  %vm2444_vm0 = vmmov (!%p295_p2), 0   ;;  %v577_v25 = vlaneseq (!%p295_p2) }
   0x6   : > { %298 = sbr.rel (%p295_p2) target bundleno = 2239 (0x8bf), region = 56  ;;  %v344_v2 = vld [vmem:[%s2815_s2] sm:$0xff] (!%p295_p2)  ;;  %2357 = vmatprep.subr.bf16.mxu1 (!%p295_p2), %v2443_v3  ;;  %v2358_v4 = vpack.c.bf16 (!%p295_p2), %v349_v1, %v348_v0  ;;  %2351 = vmatprep.subr.bf16.mxu0 (!%p295_p2), %v2443_v3  ;;  %v345_v5 = vld [vmem:[%s2815_s2 + $0x8] sm:$0xff] (!%p295_p2)  ;;  %v351_v7 = vld [vmem:[%s2816_s3 + $0x18] sm:$0xff] (!%p295_p2)  ;;  %v2445_v11 = vmov (!%p295_p2), 0.0   ;;  %vm361_vm1 = vcmask (!%p295_p2), 261120  }
   0x7   : > { %v2352_v8 = vpack.c.bf16 (!%p295_p2), %v345_v5, %v344_v2  ;;  %v346_v9 = vld [vmem:[%s2815_s2 + $0x10] sm:$0xff] (!%p295_p2)  ;;  %v347_v10 = vld [vmem:[%s2815_s2 + $0x18] sm:$0xff] (!%p295_p2)  ;;  %2246 = vmatprep.mubr.msk.f32.mxu1 (!%p295_p2), %vm2444_vm0, %v2445_v11  ;;  %2235 = vmatprep.mubr.msk.f32.mxu0 (!%p295_p2), %vm2444_vm0, %v2445_v11  ;;  %v2361_v12 = vpack.c.bf16 (!%p295_p2), %v351_v7, %v350_v6  ;;  %vm588_vm2 = vcmask (!%p295_p2), 31744   ;;  %s2446_s12 = smov (!%p295_p2), 124   ;;  %s2447_s13 = smov (!%p295_p2), 120   ;;  %v352_v19 = vld [vmem:[%s2817_s4] sm:$0xff] (!%p295_p2) }
   0x8   : > { %2359 = vmatpush3.bf16.msra.mxu1 (!%p295_p2), %v2358_v4  ;;  %v2355_v13 = vpack.c.bf16 (!%p295_p2), %v347_v10, %v346_v9  ;;  %s2448_s14 = smov (!%p295_p2), 116   ;;  %s2449_s15 = smov (!%p295_p2), 112   ;;  %v353_v20 = vld [vmem:[%s2817_s4 + $0x8] sm:$0xff] (!%p295_p2)  ;;  %v354_v21 = vld [vmem:[%s2817_s4 + $0x10] sm:$0xff] (!%p295_p2)  ;;  %v355_v23 = vld [vmem:[%s2817_s4 + $0x18] sm:$0xff] (!%p295_p2)  ;;  %v578_v27 = vshrl.u32 (!%p295_p2), %v577_v25, 7 }
   0x9   : > { %2353 = vmatpush3.bf16.msra.mxu0 (!%p295_p2), %v2352_v8  ;;  %2360 = vmatprep.subr.bf16.mxu1 (!%p295_p2), %v2443_v3  ;;  %s2450_s16 = smov (!%p295_p2), 108   ;;  %s2451_s17 = smov (!%p295_p2), 104   ;;  %v2364_v22 = vpack.c.bf16 (!%p295_p2), %v353_v20, %v352_v19  ;;  %v2367_v24 = vpack.c.bf16 (!%p295_p2), %v355_v23, %v354_v21  ;;  %v2453_v29 = vmov (!%p295_p2), 0   ;;  %v585_v32 = vand.u32 (!%p295_p2), 127, %v577_v25 }
   0xa   : > { %2354 = vmatprep.subr.bf16.mxu0 (!%p295_p2), %v2443_v3  ;;  %s2452_s18 = smov (!%p295_p2), 100   ;;  %v579_v28 = vsub.s32 (!%p295_p2), 0, %v578_v27  ;;  %vm667_vm7 = vcmask (!%p295_p2), 64512   ;;  %s2456_s22 = smov (!%p295_p2), 12   ;;  %vm1952_vm8 = vcmask (!%p295_p2), 97280   ;;  %vm1954_vm9 = vcmask (!%p295_p2), 130048  }
   0xb   : > { %vm586_vm5 = vcmp.ge.s32.totalorder (!%p295_p2), %v578_v27, %v585_v32  ;;  %s2457_s23 = smov (!%p295_p2), 16   ;;  %s2458_s24 = smov (!%p295_p2), 20   ;;  %vm1956_vm10 = vcmask (!%p295_p2), 162816   ;;  %vm1958_vm11 = vcmask (!%p295_p2), 195584   ;;  %vm1960_vm12 = vcmask (!%p295_p2), 228352  }
   0xc   : > { %2362 = vmatpush3.bf16.msra.mxu1 (!%p295_p2), %v2361_v12  ;;  %s2459_s25 = smov (!%p295_p2), 24   ;;  %s2460_s26 = smov (!%p295_p2), 28  }
   0xd   : > { %s2826_s10 = smov (!%p331_p3, %s2135_s10), 1  ;;  %2356 = vmatpush3.bf16.msra.mxu0 %v2355_v13  ;;  %2260 = vmatprep.subr.mxu1 %v2445_v11 }
   0xe   : > { %s2140_s27 = sshll.u32 %s2826_s10, 3  ;;  %2363 = vmatprep.subr.bf16.mxu0 %v2443_v3 }
   0xf   : > { %s334_s11 = scalar_lea.vmem %s2813_s0, %s2140_s27 }
  0x10   : > { %v2559_v14 = vld [vmem:[%s334_s11] sm:$0xff]  ;;  %s337_s11 = scalar_lea.vmem %s2814_s1, %s2826_s10 }
  0x11   : > { %2247 = vmatmul.mubr.msk.f32.vlgmr.msra.gmra.mrb[0].mxu1 %vm361_vm1, %v2559_v14  ;;  %2236 = vmatmul.mubr.msk.f32.vlgmr.msra.gmra.mrb[0].mxu0 %vm361_vm1, %v2559_v14  ;;  %v343_v26 = vld [vmem:[%s337_s11] sm:$0x1] }
  0x12   : > { %2262 = vmatprep.mubr.msk.f32.mxu1 %vm2444_vm0, %v2445_v11  ;;  %2257 = vmatprep.mubr.msk.f32.mxu0 %vm2444_vm0, %v2445_v11  ;;  %vm575_vm3 = vcmp.gt.f32.partialorder %v343_v26, 0.0 }
  0x13   : > { %2365 = vmatpush3.bf16.msra.mxu0 %v2364_v22  ;;  %v576_v30 = vsel %vm575_vm3, 1, %v2453_v29 }
  0x14   : > { %2366 = vmatprep.subr.bf16.mxu0 %v2443_v3  ;;  %v580_v31 = vrot.slane %v576_v30, %v579_v28 }
  0x16   : > { %vm581_vm4 = vcmp.eq.s32.totalorder %v580_v31, 1 }
  0x17   : > { %2368 = vmatpush3.bf16.msra.mxu0 %v2367_v24  ;;  %vm2624_vm6 = vmand %vm581_vm4, %vm586_vm5 }
  0x18   : > { %2280 = vmatprep.subr.mxu0 %v2445_v11 }
  0x1a   : > { %2258 = vmatmul.mubr.msk.f32.vlgmr.msra.gmra.mrb[2].mxu0 %vm361_vm1, %v2559_v14 }
  0x1b   : > { %2282 = vmatprep.mubr.msk.f32.mxu0 %vm2444_vm0, %v2445_v11 }
  0xe4   : > { %v2571_v15 = vpop.f32.mrb[0].mxu1  ;;  %v2577_v17 = vpop.f32.mrb[0].mxu0 }
  0xe5   : > { %754 = vrot.lane.b32.xlu1 %v2571_v15, %s2446_s12  ;;  %v2248_v16 = vpop.f32.mrb[1].mxu1  ;;  %2261 = vmatpush3.xpose.msk.msra.mxu1 %vm588_vm2, %v2571_v15  ;;  %v2237_v18 = vpop.f32.mrb[1].mxu0 }
  0xe6   : > { %2265 = vmatprep.subr.mxu1 %v2445_v11 }
  0xe8   : > { %2263 = vmatmul.mubr.msk.f32.vlgmr.msra.gmra.mrb[2].mxu1 %vm588_vm2, %v2577_v17 }
  0xe9   : > { %752 = vrot.lane.b32.xlu1 %v2577_v17, %s2446_s12  ;;  %2267 = vmatprep.mubr.msk.f32.mxu1 %vm2444_vm0, %v2445_v11 }
  0xed   : > { %920 = vrot.lane.b32.xlu1 %v2577_v17, %s2447_s13  ;;  %v2632_v44 = vpop.f32.mrb[2].mxu0 }
  0xee   : > { %2266 = vmatpush3.msra.mxu1 %v2632_v44  ;;  %v2259_v45 = vpop.f32.mrb[3].mxu0 }
  0xef   : > { %2270 = vmatprep.subr.mxu1 %v2445_v11 }
  0xf1   : > { %1089 = vrot.lane.b32.xlu1 %v2571_v15, %s2448_s14 }
  0xf5   : > { %1087 = vrot.lane.b32.xlu1 %v2577_v17, %s2448_s14 }
  0xf9   : > { %1256 = vrot.lane.b32.xlu1 %v2571_v15, %s2449_s15 }
  0xfd   : > { %1254 = vrot.lane.b32.xlu1 %v2577_v17, %s2449_s15 }
 0x101   : > { %1423 = vrot.lane.b32.xlu1 %v2571_v15, %s2450_s16 }
 0x105   : > { %1590 = vrot.lane.b32.xlu1 %v2571_v15, %s2451_s17 }
 0x109   : > { %1757 = vrot.lane.b32.xlu1 %v2571_v15, %s2452_s18 }
 0x157   : > { %v755_v46 = vpop.permute.xlu1 %754 }
 0x15b   : > { %v753_v47 = vpop.permute.xlu1 %752 }
 0x15f   : > { %v921_v48 = vpop.permute.xlu1 %920 }
 0x163   : > { %v1090_v49 = vpop.permute.xlu1 %1089 }
 0x167   : > { %v1088_v50 = vpop.permute.xlu1 %1087 }
 0x16b   : > { %v1257_v51 = vpop.permute.xlu1 %1256 }
 0x16f   : > { %v1255_v54 = vpop.permute.xlu1 %1254 }
 0x173   : > { %v1424_v56 = vpop.permute.xlu1 %1423 }
 0x177   : > { %v1591_v59 = vpop.permute.xlu1 %1590 }
 0x17b   : > { %v1758_v61 = vpop.permute.xlu1 %1757 }
 0x1bb   : > { %v661_v34 = vpop.f32.mrb[2].mxu1 }
 0x1bc   : > { %v665_v35 = vsel %vm2624_vm6, %v661_v34, -1e+20  ;;  %v2264_v36 = vpop.f32.mrb[3].mxu1 }
 0x1bd   : > { %v666_v37 = vmul.f32 0.17677669, %v665_v35 }
 0x1bf   : > { %v668_v38 = vsel %vm667_vm7, %v666_v37, -inf }
 0x1c0   : > { %669 = vmax.xlane.f32.xlu0 %v668_v38 }
 0x24d   : > { %v670_v39 = vpop.xlane.xlu0 %669 }
 0x24e   : > { %v671_v40 = vsub.f32 %v666_v37, %v670_v39 }
 0x250   : > { %v672_v41 = vmul.f32 1.442695, %v671_v40 }
 0x252   : > { %2401 = vpow2.f32 %v672_v41 }
 0x25c   : > { %v2402_v42 = vpop.eup %2401 }
 0x25d   : > { %v674_v43 = vsel %vm667_vm7, %v2402_v42, 0.0 }
 0x25e   : > { %675 = vadd.xlane.f32.xlu0 %v674_v43 }
 0x274   : > { %922 = vrot.lane.b32.xlu0 %v2571_v15, %s2447_s13 }
 0x278   : > { %1421 = vrot.lane.b32.xlu0 %v2577_v17, %s2450_s16 }
 0x27c   : > { %1588 = vrot.lane.b32.xlu0 %v2577_v17, %s2451_s17 }
 0x280   : > { %1755 = vrot.lane.b32.xlu0 %v2577_v17, %s2452_s18 }
 0x2eb   : > { %v676_v52 = vpop.xlane.xlu0 %675 }
 0x2ec   : > { %2403 = vrcp.f32 %v676_v52 }
 0x2ef   : > { %v923_v53 = vpop.permute.xlu0 %922 }
 0x2f0   : > { %2281 = vmatpush3.xpose.msk.msra.mxu0 %vm588_vm2, %v923_v53 }
 0x2f1   : > { %2290 = vmatprep.subr.mxu0 %v2445_v11 }
 0x2f3   : > { %2283 = vmatmul.mubr.msk.f32.vlgmr.msra.gmra.mrb[4].mxu0 %vm588_vm2, %v921_v48  ;;  %v1422_v58 = vpop.permute.xlu0 %1421 }
 0x2f4   : > { %2291 = vmatpush3.xpose.msk.msra.mxu0 %vm588_vm2, %v1090_v49  ;;  %2292 = vmatprep.mubr.msk.f32.mxu0 %vm2444_vm0, %v2445_v11 }
 0x2f5   : > { %2300 = vmatprep.subr.mxu0 %v2445_v11 }
 0x2f6   : > { %v2404_v55 = vpop.eup %2403 }
 0x2f7   : > { %v678_v57 = vmul.f32 %v2404_v55, %v2402_v42  ;;  %2293 = vmatmul.mubr.msk.f32.vlgmr.msra.gmra.mrb[6].mxu0 %vm588_vm2, %v1088_v50  ;;  %v1589_v60 = vpop.permute.xlu0 %1588 }
 0x2f8   : > { %2301 = vmatpush3.xpose.msk.msra.mxu0 %vm588_vm2, %v1257_v51  ;;  %2302 = vmatprep.mubr.msk.f32.mxu0 %vm2444_vm0, %v2445_v11 }
 0x2f9   : > { %2268 = vmatmul.mubr.msk.f32.vlgmr.msra.gmra.mrb[4].mxu1 %vm667_vm7, %v678_v57  ;;  %2310 = vmatprep.subr.mxu0 %v2445_v11 }
 0x2fa   : > { %2271 = vmatpush3.xpose.msk.msra.mxu1 %vm588_vm2, %v755_v46  ;;  %2272 = vmatprep.mubr.msk.f32.mxu1 %vm2444_vm0, %v2445_v11 }
 0x2fb   : > { %2303 = vmatmul.mubr.msk.f32.vlgmr.msra.gmra.mrb[8].mxu0 %vm588_vm2, %v1255_v54  ;;  %2275 = vmatprep.subr.mxu1 %v2445_v11  ;;  %v1756_v62 = vpop.permute.xlu0 %1755 }
 0x2fc   : > { %2311 = vmatpush3.xpose.msk.msra.mxu0 %vm588_vm2, %v1424_v56  ;;  %2312 = vmatprep.mubr.msk.f32.mxu0 %vm2444_vm0, %v2445_v11 }
 0x2fd   : > { %2273 = vmatmul.mubr.msk.f32.vlgmr.msra.gmra.mrb[6].mxu1 %vm588_vm2, %v753_v47  ;;  %2320 = vmatprep.subr.mxu0 %v2445_v11 }
 0x2fe   : > { %2277 = vmatprep.mubr.msk.f32.mxu1 %vm2444_vm0, %v2445_v11 }
 0x2ff   : > { %2313 = vmatmul.mubr.msk.f32.vlgmr.msra.gmra.mrb[10].mxu0 %vm588_vm2, %v1422_v58 }
 0x300   : > { %2321 = vmatpush3.xpose.msk.msra.mxu0 %vm588_vm2, %v1591_v59  ;;  %2322 = vmatprep.mubr.msk.f32.mxu0 %vm2444_vm0, %v2445_v11 }
 0x301   : > { %2330 = vmatprep.subr.mxu0 %v2445_v11 }
 0x303   : > { %2323 = vmatmul.mubr.msk.f32.vlgmr.msra.gmra.mrb[12].mxu0 %vm588_vm2, %v1589_v60 }
 0x304   : > { %2331 = vmatpush3.xpose.msk.msra.mxu0 %vm588_vm2, %v1758_v61  ;;  %2332 = vmatprep.mubr.msk.f32.mxu0 %vm2444_vm0, %v2445_v11 }
 0x305   : > { %2369 = vmatprep.subr.bf16.mxu0 %v2443_v3 }
 0x307   : > { %2333 = vmatmul.mubr.msk.f32.vlgmr.msra.gmra.mrb[14].mxu0 %vm588_vm2, %v1756_v62 }
 0x308   : > { %2348 = vmatprep.mubr.msk.f32.mxu0 %vm2444_vm0, %v2445_v11 }
 0x3c6   : > { %v994_v63 = vpop.f32.mrb[4].mxu0 }
 0x3c7   : > { %v998_v0 = vsel %vm2624_vm6, %v994_v63, -1e+20  ;;  %v2284_v1 = vpop.f32.mrb[5].mxu0 }
 0x3c8   : > { %v999_v2 = vmul.f32 0.17677669, %v998_v0 }
 0x3ca   : > { %v1161_v4 = vpop.f32.mrb[6].mxu0  ;;  %v1000_v5 = vsel %vm667_vm7, %v999_v2, -inf }
 0x3cb   : > { %v1165_v6 = vsel %vm2624_vm6, %v1161_v4, -1e+20  ;;  %1001 = vmax.xlane.f32.xlu0 %v1000_v5  ;;  %v2294_v7 = vpop.f32.mrb[7].mxu0 }
 0x3cc   : > { %v1166_v8 = vmul.f32 0.17677669, %v1165_v6  ;;  %v2687_v9 = vpop.f32.mrb[4].mxu1 }
 0x3cd   : > { %v2269_v10 = vpop.f32.mrb[5].mxu1 }
 0x3ce   : > { %v1328_v12 = vpop.f32.mrb[8].mxu0  ;;  %v1167_v13 = vsel %vm667_vm7, %v1166_v8, -inf }
 0x3cf   : > { %1168 = vmax.xlane.f32.xlu0 %v1167_v13  ;;  %v2304_v15 = vpop.f32.mrb[9].mxu0  ;;  %v1332_v17 = vsel %vm2624_vm6, %v1328_v12, -1e+20 }
 0x3d0   : > { %v826_v16 = vpop.f32.mrb[6].mxu1  ;;  %v1333_v24 = vmul.f32 0.17677669, %v1332_v17 }
 0x3d1   : > { %v830_v18 = vsel %vm2624_vm6, %v826_v16, -1e+20  ;;  %v2274_v19 = vpop.f32.mrb[7].mxu1 }
 0x3d2   : > { %v2694_v20 = vmul.f32 0.17677669, %v830_v18  ;;  %v1495_v21 = vpop.f32.mrb[10].mxu0  ;;  %v1334_v32 = vsel %vm667_vm7, %v1333_v24, -inf }
 0x3d3   : > { %v1499_v22 = vsel %vm2624_vm6, %v1495_v21, -1e+20  ;;  %v2314_v23 = vpop.f32.mrb[11].mxu0 }
 0x3d4   : > { %v1500_v25 = vmul.f32 0.17677669, %v1499_v22  ;;  %v832_v26 = vsel %vm667_vm7, %v2694_v20, -inf }
 0x3d5   : > { %833 = vmax.xlane.f32.xlu1 %v832_v26 }
 0x3d6   : > { %v1662_v27 = vpop.f32.mrb[12].mxu0  ;;  %v1501_v28 = vsel %vm667_vm7, %v1500_v25, -inf }
 0x3d7   : > { %v1666_v29 = vsel %vm2624_vm6, %v1662_v27, -1e+20  ;;  %1502 = vmax.xlane.f32.xlu0 %v1501_v28  ;;  %v2324_v30 = vpop.f32.mrb[13].mxu0 }
 0x3d8   : > { %v1667_v31 = vmul.f32 0.17677669, %v1666_v29 }
 0x3d9   : > { %1335 = vmax.xlane.f32.xlu1 %v1334_v32 }
 0x3da   : > { %v1829_v34 = vpop.f32.mrb[14].mxu0  ;;  %v1668_v38 = vsel %vm667_vm7, %v1667_v31, -inf }
 0x3db   : > { %v1833_v35 = vsel %vm2624_vm6, %v1829_v34, -1e+20  ;;  %v2334_v36 = vpop.f32.mrb[15].mxu0 }
 0x3dc   : > { %v1834_v37 = vmul.f32 0.17677669, %v1833_v35 }
 0x3dd   : > { %1669 = vmax.xlane.f32.xlu1 %v1668_v38 }
 0x3de   : > { %v1835_v39 = vsel %vm667_vm7, %v1834_v37, -inf }
 0x3df   : > { %1836 = vmax.xlane.f32.xlu0 %v1835_v39 }
 0x458   : > { %v1002_v40 = vpop.xlane.xlu0 %1001 }
 0x459   : > { %v1003_v41 = vsub.f32 %v999_v2, %v1002_v40 }
 0x45b   : > { %v1004_v42 = vmul.f32 1.442695, %v1003_v41 }
 0x45c   : > { %v1169_v43 = vpop.xlane.xlu0 %1168 }
 0x45d   : > { %2405 = vpow2.f32 %v1004_v42  ;;  %v1170_v45 = vsub.f32 %v1166_v8, %v1169_v43 }
 0x45f   : > { %v1171_v46 = vmul.f32 1.442695, %v1170_v45 }
 0x461   : > { %2407 = vpow2.f32 %v1171_v46 }
 0x462   : > { %v834_v47 = vpop.xlane.xlu1 %833 }
 0x463   : > { %v835_v8 = vsub.f32 %v2694_v20, %v834_v47  ;;  %v356_v47 = vld [vmem:[%s2818_s5] sm:$0xff] }
 0x464   : > { %v1503_v48 = vpop.xlane.xlu0 %1502 }
 0x465   : > { %v1504_v33 = vsub.f32 %v1500_v25, %v1503_v48  ;;  %v836_v10 = vmul.f32 1.442695, %v835_v8  ;;  %v357_v48 = vld [vmem:[%s2818_s5 + $0x8] sm:$0xff] }
 0x466   : > { %v1336_v49 = vpop.xlane.xlu1 %1335 }
 0x467   : > { %v2708_v50 = vpop.eup %2405  ;;  %v1505_v51 = vmul.f32 1.442695, %v1504_v33  ;;  %v1337_v52 = vsub.f32 %v1333_v24, %v1336_v49  ;;  %v2370_v33 = vpack.c.bf16 %v357_v48, %v356_v47 }
 0x468   : > { %v1006_v53 = vsel %vm667_vm7, %v2708_v50, 0.0 }
 0x469   : > { %2409 = vpow2.f32 %v1505_v51  ;;  %v1338_v54 = vmul.f32 1.442695, %v1337_v52  ;;  %1007 = vadd.xlane.f32.xlu0 %v1006_v53  ;;  %2371 = vmatpush3.bf16.msra.mxu0 %v2370_v33  ;;  %v359_v51 = vld [vmem:[%s2818_s5 + $0x18] sm:$0xff] }
 0x46a   : > { %v1670_v55 = vpop.xlane.xlu1 %1669  ;;  %2372 = vmatprep.subr.bf16.mxu0 %v2443_v3 }
 0x46b   : > { %v2712_v56 = vpop.eup %2407  ;;  %2411 = vpow2.f32 %v1338_v54  ;;  %v1671_v57 = vsub.f32 %v1667_v31, %v1670_v55 }
 0x46c   : > { %v1837_v58 = vpop.xlane.xlu0 %1836  ;;  %v1173_v59 = vsel %vm667_vm7, %v2712_v56, 0.0 }
 0x46d   : > { %v1672_v60 = vmul.f32 1.442695, %v1671_v57  ;;  %v1838_v61 = vsub.f32 %v1834_v37, %v1837_v58  ;;  %1174 = vadd.xlane.f32.xlu1 %v1173_v59 }
 0x46f   : > { %2413 = vpow2.f32 %v1672_v60  ;;  %v1839_v62 = vmul.f32 1.442695, %v1838_v61 }
 0x471   : > { %2415 = vpow2.f32 %v1839_v62 }
 0x472   : > { %2417 = vpow2.f32 %v836_v10 }
 0x473   : > { %v2716_v63 = vpop.eup %2409 }
 0x474   : > { %v1507_v0 = vsel %vm667_vm7, %v2716_v63, 0.0 }
 0x475   : > { %v2412_v1 = vpop.eup %2411  ;;  %1508 = vadd.xlane.f32.xlu1 %v1507_v0 }
 0x476   : > { %v1340_v2 = vsel %vm667_vm7, %v2412_v1, 0.0 }
 0x477   : > { %1341 = vadd.xlane.f32.xlu0 %v1340_v2 }
 0x479   : > { %v2721_v4 = vpop.eup %2413 }
 0x47a   : > { %v1674_v5 = vsel %vm667_vm7, %v2721_v4, 0.0 }
 0x47b   : > { %v2725_v6 = vpop.eup %2415  ;;  %1675 = vadd.xlane.f32.xlu0 %v1674_v5 }
 0x47c   : > { %v1841_v7 = vsel %vm667_vm7, %v2725_v6, 0.0  ;;  %v2418_v12 = vpop.eup %2417 }
 0x47d   : > { %1842 = vadd.xlane.f32.xlu1 %v1841_v7  ;;  %v838_v13 = vsel %vm667_vm7, %v2418_v12, 0.0 }
 0x48e   : > { %1011 = vrot.lane.b32.xlu1 %v2632_v44, %s2447_s13 }
 0x491   : > { %844 = vrot.lane.b32.xlu0 %v2632_v44, %s2446_s12  ;;  %s2454_s12 = smov 4  }
 0x495   : > { %1345 = vrot.lane.b32.xlu0 %v2632_v44, %s2449_s15 }
 0x499   : > { %1679 = vrot.lane.b32.xlu0 %v2632_v44, %s2451_s17  ;;  %s2455_s17 = smov 8  }
 0x4b2   : > { %839 = vadd.xlane.f32.xlu1 %v838_v13 }
 0x4c3   : > { %1178 = vrot.lane.b32.xlu1 %v2632_v44, %s2448_s14 }
 0x4c7   : > { %1512 = vrot.lane.b32.xlu1 %v2632_v44, %s2450_s16 }
 0x4cb   : > { %1846 = vrot.lane.b32.xlu1 %v2632_v44, %s2452_s18 }
 0x4f6   : > { %v1008_v15 = vpop.xlane.xlu0 %1007 }
 0x4fa   : > { %v1175_v19 = vpop.xlane.xlu1 %1174 }
 0x502   : > { %v1509_v20 = vpop.xlane.xlu1 %1508 }
 0x504   : > { %v1342_v16 = vpop.xlane.xlu0 %1341 }
 0x508   : > { %v1676_v17 = vpop.xlane.xlu0 %1675 }
 0x50a   : > { %v1843_v21 = vpop.xlane.xlu1 %1842 }
 0x50c   : > { %v845_v18 = vpop.permute.xlu0 %844 }
 0x50d   : > { %2276 = vmatpush3.msra.mxu1 %v845_v18 }
 0x50e   : > { %2285 = vmatprep.subr.mxu1 %v2445_v11  ;;  %v1012_v22 = vpop.permute.xlu1 %1011 }
 0x510   : > { %v1346_v31 = vpop.permute.xlu0 %1345 }
 0x514   : > { %v1680_v38 = vpop.permute.xlu0 %1679 }
 0x53f   : > { %v840_v23 = vpop.xlane.xlu1 %839 }
 0x540   : > { %2419 = vrcp.f32 %v840_v23 }
 0x541   : > { %2421 = vrcp.f32 %v1008_v15 }
 0x542   : > { %2423 = vrcp.f32 %v1175_v19 }
 0x543   : > { %2425 = vrcp.f32 %v1342_v16  ;;  %v1179_v28 = vpop.permute.xlu1 %1178 }
 0x544   : > { %2427 = vrcp.f32 %v1509_v20 }
 0x545   : > { %2429 = vrcp.f32 %v1676_v17 }
 0x546   : > { %2431 = vrcp.f32 %v1843_v21 }
 0x547   : > { %v1513_v35 = vpop.permute.xlu1 %1512 }
 0x54a   : > { %v2420_v24 = vpop.eup %2419 }
 0x54b   : > { %v842_v25 = vmul.f32 %v2420_v24, %v2418_v12  ;;  %v2422_v26 = vpop.eup %2421  ;;  %v1847_v41 = vpop.permute.xlu1 %1846 }
 0x54c   : > { %v1010_v44 = vmul.f32 %v2422_v26, %v2708_v50  ;;  %v2424_v27 = vpop.eup %2423  ;;  %v358_v50 = vld [vmem:[%s2818_s5 + $0x10] sm:$0xff] }
 0x54d   : > { %2278 = vmatmul.mubr.msk.f32.vlgmr.msra.gmra.mrb[8].mxu1 %vm667_vm7, %v842_v25  ;;  %v1177_v29 = vmul.f32 %v2424_v27, %v2712_v56  ;;  %v2426_v30 = vpop.eup %2425  ;;  %v2373_v53 = vpack.c.bf16 %v359_v51, %v358_v50 }
 0x54e   : > { %2286 = vmatpush3.msra.mxu1 %v1012_v22  ;;  %2287 = vmatprep.mubr.msk.f32.mxu1 %vm2444_vm0, %v2445_v11  ;;  %v1344_v32 = vmul.f32 %v2426_v30, %v2412_v1  ;;  %v2428_v34 = vpop.eup %2427 }
 0x54f   : > { %2295 = vmatprep.subr.mxu1 %v2445_v11  ;;  %v1511_v36 = vmul.f32 %v2428_v34, %v2716_v63  ;;  %v2430_v37 = vpop.eup %2429  ;;  %2374 = vmatpush3.bf16.msra.mxu0 %v2373_v53 }
 0x550   : > { %v1678_v39 = vmul.f32 %v2430_v37, %v2721_v4  ;;  %v2432_v40 = vpop.eup %2431 }
 0x551   : > { %2288 = vmatmul.mubr.msk.f32.vlgmr.msra.gmra.mrb[10].mxu1 %vm667_vm7, %v1010_v44  ;;  %v1845_v42 = vmul.f32 %v2432_v40, %v2725_v6 }
 0x552   : > { %2296 = vmatpush3.msra.mxu1 %v1179_v28  ;;  %2297 = vmatprep.mubr.msk.f32.mxu1 %vm2444_vm0, %v2445_v11 }
 0x553   : > { %2305 = vmatprep.subr.mxu1 %v2445_v11 }
 0x555   : > { %2298 = vmatmul.mubr.msk.f32.vlgmr.msra.gmra.mrb[12].mxu1 %vm667_vm7, %v1177_v29  ;;  %v2172_v29 = vld [vmem:[%s2821_s8] ss:$0 sm:$0xff] }
 0x556   : > { %2306 = vmatpush3.msra.mxu1 %v1346_v31  ;;  %2307 = vmatprep.mubr.msk.f32.mxu1 %vm2444_vm0, %v2445_v11 }
 0x557   : > { %2315 = vmatprep.subr.mxu1 %v2445_v11 }
 0x559   : > { %2308 = vmatmul.mubr.msk.f32.vlgmr.msra.gmra.mrb[14].mxu1 %vm667_vm7, %v1344_v32 }
 0x55a   : > { %2316 = vmatpush3.msra.mxu1 %v1513_v35  ;;  %2317 = vmatprep.mubr.msk.f32.mxu1 %vm2444_vm0, %v2445_v11 }
 0x55b   : > { %2325 = vmatprep.subr.mxu1 %v2445_v11 }
 0x55d   : > { %2318 = vmatmul.mubr.msk.f32.vlgmr.msra.gmra.mrb[16].mxu1 %vm667_vm7, %v1511_v36 }
 0x55e   : > { %2326 = vmatpush3.msra.mxu1 %v1680_v38  ;;  %2327 = vmatprep.mubr.msk.f32.mxu1 %vm2444_vm0, %v2445_v11 }
 0x55f   : > { %2335 = vmatprep.subr.mxu1 %v2445_v11 }
 0x561   : > { %2328 = vmatmul.mubr.msk.f32.vlgmr.msra.gmra.mrb[18].mxu1 %vm667_vm7, %v1678_v39 }
 0x562   : > { %2336 = vmatpush3.msra.mxu1 %v1847_v41  ;;  %2337 = vmatprep.mubr.msk.f32.mxu1 %vm2444_vm0, %v2445_v11 }
 0x565   : > { %2338 = vmatmul.mubr.msk.f32.vlgmr.msra.gmra.mrb[20].mxu1 %vm667_vm7, %v1845_v42 }
 0x620   : > { %v916_v43 = vpop.f32.mrb[8].mxu1 }
 0x621   : > { %1923 = vrot.lane.b32.xlu0 %v916_v43, %s2454_s12  ;;  %v2279_v45 = vpop.f32.mrb[9].mxu1 }
 0x624   : > { %v1083_v46 = vpop.f32.mrb[10].mxu1 }
 0x625   : > { %1927 = vrot.lane.b32.xlu1 %v1083_v46, %s2455_s17  ;;  %v2289_v11 = vpop.f32.mrb[11].mxu1  ;;  %s341_s17 = scalar_lea.vmem %s2822_s9, %s2140_s27 }
 0x628   : > { %v1250_v49 = vpop.f32.mrb[12].mxu1 }
 0x629   : > { %1931 = vrot.lane.b32.xlu0 %v1250_v49, %s2456_s22  ;;  %v2299_v52 = vpop.f32.mrb[13].mxu1 }
 0x62c   : > { %v1417_v54 = vpop.f32.mrb[14].mxu1 }
 0x62d   : > { %1935 = vrot.lane.b32.xlu1 %v1417_v54, %s2457_s23  ;;  %v2309_v55 = vpop.f32.mrb[15].mxu1 }
 0x630   : > { %v1584_v56 = vpop.f32.mrb[16].mxu1 }
 0x631   : > { %1939 = vrot.lane.b32.xlu0 %v1584_v56, %s2458_s24  ;;  %v2319_v3 = vpop.f32.mrb[17].mxu1 }
 0x634   : > { %v1751_v57 = vpop.f32.mrb[18].mxu1 }
 0x635   : > { %1943 = vrot.lane.b32.xlu1 %v1751_v57, %s2459_s25  ;;  %v2329_v58 = vpop.f32.mrb[19].mxu1 }
 0x638   : > { %v1918_v59 = vpop.f32.mrb[20].mxu1 }
 0x639   : > { %1947 = vrot.lane.b32.xlu0 %v1918_v59, %s2460_s26  ;;  %v2339_v60 = vpop.f32.mrb[21].mxu1 }
 0x693   : > { %v1924_v61 = vpop.permute.xlu0 %1923 }
 0x694   : > { %v1950_v1 = vsel %vm588_vm2, %v2687_v9, %v1924_v61  ;;  %v2169_v9 = vld [vmem:[%s2819_s6] ss:$0 sm:$0xff] }
 0x697   : > { %v1928_v62 = vpop.permute.xlu1 %1927 }
 0x698   : > { %v1951_v2 = vsel %vm667_vm7, %v1950_v1, %v1928_v62 }
 0x69b   : > { %v1932_v63 = vpop.permute.xlu0 %1931 }
 0x69c   : > { %v1953_v5 = vsel %vm1952_vm8, %v1951_v2, %v1932_v63 }
 0x69f   : > { %v1936_v0 = vpop.permute.xlu1 %1935 }
 0x6a0   : > { %v1955_v7 = vsel %vm1954_vm9, %v1953_v5, %v1936_v0 }
 0x6a3   : > { %v1940_v4 = vpop.permute.xlu0 %1939 }
 0x6a4   : > { %v1957_v8 = vsel %vm1956_vm10, %v1955_v7, %v1940_v4 }
 0x6a7   : > { %v1944_v6 = vpop.permute.xlu1 %1943 }
 0x6a8   : > { %v1959_v10 = vsel %vm1958_vm11, %v1957_v8, %v1944_v6 }
 0x6ab   : > { %v1948_v12 = vpop.permute.xlu0 %1947 }
 0x6ac   : > { %v1961_v13 = vsel %vm1960_vm12, %v1959_v10, %v1948_v12 }
 0x6ad   : > { %2349 = vmatmul.mubr.msk.f32.vlgmr.msra.gmra.mrb[16].mxu0 %vm361_vm1, %v1961_v13 }
 0x780   : > { %v2037_v15 = vpop.f32.mrb[16].mxu0 }
 0x781   : > { %v2038_v16 = vadd.f32 %v2169_v9, %v2037_v15  ;;  %v2350_v17 = vpop.f32.mrb[17].mxu0 }
 0x783   : > { %v2043_v18 = vadd.f32 %v2038_v16, %v2559_v14  ;;  %v2171_v14 = vld [vmem:[%s2820_s7] ss:$0 sm:$0xff] }
 0x785   : > { %v2044_v19 = vsel %vm361_vm1, %v2043_v18, 0.0 }
 0x786   : > { %2045 = vadd.xlane.f32.xlu1 %v2044_v19 }
 0x813   : > { %v2046_v20 = vpop.xlane.xlu1 %2045 }
 0x814   : > { %v2048_v21 = vmul.f32 0.03125, %v2046_v20 }
 0x816   : > { %v2049_v22 = vsub.f32 %v2043_v18, %v2048_v21 }
 0x818   : > { %v2050_v23 = vmul.f32 %v2049_v22, %v2049_v22 }
 0x81a   : > { %v2051_v24 = vsel %vm361_vm1, %v2050_v23, 0.0 }
 0x81b   : > { %2052 = vadd.xlane.f32.xlu0 %v2051_v24 }
 0x8a8   : > { %v2053_v25 = vpop.xlane.xlu0 %2052 }
 0x8a9   : > { %v2054_v26 = vmul.f32 0.03125, %v2053_v25 }
 0x8ab   : > { %v2055_v44 = vadd.f32 1e-05, %v2054_v26 }
 0x8ad   : > { %2433 = vrsqrt.f32 %v2055_v44 }
 0x8b7   : > { %v2434_v27 = vpop.eup %2433 }
 0x8b8   : > { %v2057_v28 = vmul.f32 %v2434_v27, %v2049_v22 }
 0x8ba   : > { %v2064_v30 = vmul.f32 %v2171_v14, %v2057_v28 }
 0x8bc   : > { %v2071_v31 = vadd.f32 %v2172_v29, %v2064_v30 }
 0x8be   : > { %2072 = vst.msk [vmem:[%s341_s17] sm:$0xff] %vm361_vm1, %v2071_v31 }
 0x8bf PF: > { %s19_s30 = sadd.s32 1, %s2441_s30  }
 0x8c0   : > { %p16_p4 = scmp.ge.s32.totalorder %s19_s30, 4  }
 0x8c2   :  { %18 = sbr.rel (!%p16_p4) target bundleno = 1 (0x1), region = 89 }

// kernel: transformer_forward.7
= control target key start
LH: loop header
LB: loop body
LE: loop exit
PB: predicated region body
PF: predicated region fallthrough
CT: control target
= control target key end

     0   :  { %s3835_s21 = smov 0   ;;  %s4304_s0 = inlined_call_operand.vmem [shape: f32[2,10,32], index: 0, kind: input, shape index: {}, may-alias: {0,1}]   ;;  %s4305_s1 = inlined_call_operand.vmem [shape: f32[2,10,32], index: 1, kind: input, shape index: {}, may-alias: {0,1}]   ;;  %s4306_s2 = inlined_call_operand.vmem [shape: f32[2,1,10], index: 2, kind: input, shape index: {}]   ;;  %s4307_s3 = inlined_call_operand.vmem [shape: f32[32,32], index: 3, kind: input, shape index: {}]   ;;  %s4308_s4 = inlined_call_operand.vmem [shape: f32[32,32], index: 4, kind: input, shape index: {}]   ;;  %s4309_s5 = inlined_call_operand.vmem [shape: f32[32,32], index: 5, kind: input, shape index: {}]   ;;  %s4310_s6 = inlined_call_operand.vmem [shape: f32[32,32], index: 6, kind: input, shape index: {}]   ;;  %s4311_s7 = inlined_call_operand.vmem [shape: f32[1,32], index: 7, kind: input, shape index: {}]   ;;  %s4312_s8 = inlined_call_operand.vmem [shape: f32[1,32], index: 8, kind: input, shape index: {}]   ;;  %s4313_s9 = inlined_call_operand.vmem [shape: f32[1,32], index: 9, kind: input, shape index: {}]   ;;  %s4314_s10 = inlined_call_operand.vmem [shape: f32[32,128], index: 10, kind: input, shape index: {}]   ;;  %s4315_s11 = inlined_call_operand.vmem [shape: f32[1,128], index: 11, kind: input, shape index: {}]   ;;  %s4316_s12 = inlined_call_operand.vmem [shape: f32[128,32], index: 12, kind: input, shape index: {}]   ;;  %s4317_s13 = inlined_call_operand.vmem [shape: f32[1,32], index: 13, kind: input, shape index: {}]   ;;  %s4318_s14 = inlined_call_operand.vmem [shape: f32[1,32], index: 14, kind: input, shape index: {}]   ;;  %s4319_s15 = inlined_call_operand.vmem [shape: f32[1,32], index: 15, kind: input, shape index: {}]   ;;  %s4320_s16 = inlined_call_operand.vmem [shape: f32[2,10,32], index: 16, kind: output, shape index: {}]  }
   0x1   :  { %4321 = sst [smem:[#allocation2_spill]] %s4304_s0 }
   0x2 LB: > { %s2987_s22 = sadd.s32 4294967295, %s3732_s21   ;;  %p2991_p0 = scmp.ge.s32.totalorder %s3732_s21, 1  ;;  %s3732_s21 = sphi %s3835_s21, %s26_s21  }
   0x3   : > { %p480_p1 = scmp.lt.s32.totalorder %s3732_s21, 3 }
   0x5   : > { %p481_p2 = pnand %p2991_p0, %p480_p1 }
   0x6   : > { %v561_v0 = vld [vmem:[%s4307_s3] sm:$0xff] (!%p481_p2)  ;;  %v562_v1 = vld [vmem:[%s4307_s3 + $0x8] sm:$0xff] (!%p481_p2)  ;;  %v563_v2 = vld [vmem:[%s4307_s3 + $0x10] sm:$0xff] (!%p481_p2)  ;;  %p538_p3 = scmp.lt.s32.totalorder (!%p481_p2), %s2987_s22, 1  ;;  %vm578_vm0 = vcmask (!%p481_p2), 261120   ;;  %s4322_s25 = sld [smem:[#allocation2_spill]] (!%p481_p2)  ;;  %v818_v40 = vlaneseq (!%p481_p2) }
   0x7   : > { %484 = sbr.rel (%p481_p2) target bundleno = 5765 (0x1685), region = 84  ;;  %v3390_v3 = vpack.c.bf16 (!%p481_p2), %v562_v1, %v561_v0  ;;  %v564_v4 = vld [vmem:[%s4307_s3 + $0x18] sm:$0xff] (!%p481_p2)  ;;  %v565_v6 = vld [vmem:[%s4308_s4] sm:$0xff] (!%p481_p2)  ;;  %v566_v7 = vld [vmem:[%s4308_s4 + $0x8] sm:$0xff] (!%p481_p2)  ;;  %vm823_vm1 = vcmask (!%p481_p2), 31744   ;;  %s3734_s0 = smov (!%p481_p2), 124  }
   0x8   : > { %v3394_v5 = vpack.c.bf16 (!%p481_p2), %v564_v4, %v563_v2  ;;  %v3398_v8 = vpack.c.bf16 (!%p481_p2), %v566_v7, %v565_v6  ;;  %v567_v10 = vld [vmem:[%s4308_s4 + $0x10] sm:$0xff] (!%p481_p2)  ;;  %v568_v11 = vld [vmem:[%s4308_s4 + $0x18] sm:$0xff] (!%p481_p2)  ;;  %v569_v15 = vld [vmem:[%s4309_s5] sm:$0xff] (!%p481_p2)  ;;  %vm945_vm3 = vcmask (!%p481_p2), 1041408   ;;  %vm3735_vm4 = vmmov (!%p481_p2), 1   ;;  %s3738_s23 = smov (!%p481_p2), 116  }
   0x9   : > { %3391 = vmatprep.subr.bf16.mxu1 (!%p481_p2), %v3390_v3  ;;  %v3402_v13 = vpack.c.bf16 (!%p481_p2), %v568_v11, %v567_v10  ;;  %v570_v16 = vld [vmem:[%s4309_s5 + $0x8] sm:$0xff] (!%p481_p2)  ;;  %v571_v18 = vld [vmem:[%s4309_s5 + $0x10] sm:$0xff] (!%p481_p2)  ;;  %v572_v19 = vld [vmem:[%s4309_s5 + $0x18] sm:$0xff] (!%p481_p2)  ;;  %v819_v42 = vshrl.u32 (!%p481_p2), %v818_v40, 7  ;;  %v3736_v44 = vmov (!%p481_p2), 0   ;;  %vm919_vm8 = vcmask (!%p481_p2), 74752  }
   0xa   : > { %3393 = vmatpush3.bf16.msra.mxu1 (!%p481_p2), %v3390_v3  ;;  %v3406_v17 = vpack.c.bf16 (!%p481_p2), %v570_v16, %v569_v15  ;;  %v3410_v21 = vpack.c.bf16 (!%p481_p2), %v572_v19, %v571_v18  ;;  %vm3912_vm2 = vmpackc.low (!%p481_p2), %vm823_vm1, %vm823_vm1  ;;  %vm915_vm9 = vcmask (!%p481_p2), 80896   ;;  %s3739_s24 = smov (!%p481_p2), 112   ;;  %s3741_s27 = smov (!%p481_p2), 104   ;;  %v575_v32 = vld [vmem:[%s4310_s6 + $0x10] sm:$0xff] (!%p481_p2)  ;;  %vm2518_vm10 = vcmask (!%p481_p2), 64512  }
   0xb   : > { %3395 = vmatprep.subr.bf16.mxu1 (!%p481_p2), %v3394_v5  ;;  %vm3928_vm5 = vmpackc.low (!%p481_p2), %vm945_vm3, %vm3735_vm4  ;;  %v820_v43 = vsub.s32 (!%p481_p2), 0, %v819_v42  ;;  %s3742_s28 = smov (!%p481_p2), 100   ;;  %s3743_s29 = smov (!%p481_p2), 4   ;;  %vm2521_vm11 = vcmask (!%p481_p2), 97280   ;;  %vm2524_vm12 = vcmask (!%p481_p2), 130048   ;;  %vm2527_vm13 = vcmask (!%p481_p2), 162816  }
   0xc   : > { %s3744_s30 = smov (!%p481_p2), 8   ;;  %s3746_s17 = smov (!%p481_p2), 16   ;;  %vm2530_vm14 = vcmask (!%p481_p2), 195584   ;;  %vm2533_vm15 = vcmask (!%p481_p2), 228352  }
   0xe   : > { %s4328_s22 = smov (!%p538_p3, %s2987_s22), 1  ;;  %3397 = vmatpush3.bf16.msra.mxu1 %v3394_v5 }
   0xf   : > { %s3864_s20 = sshll.u32 %s4328_s22, 4  ;;  %3399 = vmatprep.subr.bf16.mxu1 %v3398_v8  ;;  %s550_s19 = scalar_lea.vmem %s4306_s2, %s4328_s22 }
  0x10   : > { %s3870_s26 = scalar_lea.vmem %s4322_s25, %s3864_s20  ;;  %s547_s18 = scalar_lea.vmem %s4305_s1, %s3864_s20  ;;  %v560_v41 = vld [vmem:[%s550_s19] sm:$0x1] }
  0x11   : > { %v556_v9 = vld [vmem:[%s3870_s26] sm:$0xff]  ;;  %v557_v12 = vld [vmem:[%s3870_s26 + $0x8] sm:$0x3]  ;;  %vm816_vm6 = vcmp.gt.f32.partialorder %v560_v41, 0.0  ;;  %s3737_s22 = smov 120   ;;  %s3740_s25 = smov 108  }
  0x12   : > { %3196 = vmatprep.mubr.msk.f32.mxu1 %vm578_vm0, %v556_v9  ;;  %v558_v14 = vld [vmem:[%s547_s18] sm:$0xff]  ;;  %v559_v20 = vld [vmem:[%s547_s18 + $0x8] sm:$0x3]  ;;  %v817_v45 = vsel %vm816_vm6, 1, %v3736_v44  ;;  %s3747_s18 = smov 20   ;;  %s3748_s19 = smov 24  }
  0x13   : > { %3197 = vmatmul.mubr.msk.f32.vlgmr.msra.gmra.mrb[0].mxu1 %vm578_vm0, %v557_v12  ;;  %v3948_v46 = vrot.slane %v817_v45, %v820_v43 }
  0x14   : > { %3401 = vmatpush3.bf16.msra.mxu1 %v3398_v8  ;;  %3207 = vmatprep.mubr.msk.f32.mxu1 %vm578_vm0, %v558_v14 }
  0x15   : > { %3403 = vmatprep.subr.bf16.mxu1 %v3402_v13  ;;  %vm822_vm7 = vcmp.eq.s32.totalorder %v3948_v46, 1 }
  0x18   : > { %3405 = vmatpush3.bf16.msra.mxu1 %v3402_v13 }
  0x19   : > { %3407 = vmatprep.subr.bf16.mxu1 %v3406_v17 }
  0x1b   : > { %3208 = vmatmul.mubr.msk.f32.vlgmr.msra.gmra.mrb[2].mxu1 %vm578_vm0, %v559_v20 }
  0x1c   : > { %3409 = vmatpush3.bf16.msra.mxu1 %v3406_v17  ;;  %3218 = vmatprep.mubr.msk.f32.mxu1 %vm578_vm0, %v558_v14 }
  0x1d   : > { %3411 = vmatprep.subr.bf16.mxu1 %v3410_v21 }
  0x20   : > { %3413 = vmatpush3.bf16.msra.mxu1 %v3410_v21 }
  0x23   : > { %3219 = vmatmul.mubr.msk.f32.vlgmr.msra.gmra.mrb[4].mxu1 %vm578_vm0, %v559_v20 }
  0xe6   : > { %v3902_v22 = vpop.f32.mrb[0].mxu1 }
  0xe7   : > { %v3904_v23 = vpop.f32.mrb[1].mxu1  ;;  %1026 = vrot.lane.b32.xlu1 %v3902_v22, %s3734_s0 }
  0xe8   : > { %3225 = vmatprep.mubr.msk.f32.mxu1 %vm823_vm1, %v3904_v23 }
  0xee   : > { %v3209_v24 = vpop.f32.mrb[2].mxu1 }
  0xef   : > { %v732_v25 = vpop.f32.mrb[3].mxu1 }
  0xf0   : > { %v3916_v27 = vpack.i.bf16 %v3209_v24, %v732_v25  ;;  %v3414_v28 = vpack.c.bf16 %v3209_v24, %v732_v25 }
  0xf2   : > { %3583 = vrot.lane.b32.xlu0 %v3916_v27, %s3734_s0  ;;  %3416 = vmatprep.subr.msk.bf16.mxu1 %vm3912_vm2, %v3414_v28 }
  0xf3   : > { %3419 = vmatpush3.bf16.xpose.msk.msra.mxu1 %vm3912_vm2, %v3414_v28 }
  0xf6   : > { %1024 = vrot.lane.b32.xlu0 %v3904_v23, %s3734_s0  ;;  %v3220_v29 = vpop.f32.mrb[4].mxu1 }
  0xf7   : > { %v807_v30 = vpop.f32.mrb[5].mxu1 }
  0xf8   : > { %v3420_v31 = vpack.c.bf16 %v3220_v29, %v807_v30  ;;  %v3942_v39 = vpack.i.bf16 %v3220_v29, %v807_v30 }
  0xfa   : > { %3226 = vmatmul.mubr.msk.f32.vlgmr.msra.gmra.mrb[6].mxu1 %vm823_vm1, %v3902_v22  ;;  %3422 = vmatprep.subr.msk.bf16.mxu0 %vm3928_vm5, %v3420_v31 }
  0xfb   : > { %3425 = vmatpush3.bf16.msk.msra.mxu0 %vm3928_vm5, %v3420_v31 }
 0x159   : > { %v1027_v38 = vpop.permute.xlu1 %1026 }
 0x164   : > { %v3584_v33 = vpop.permute.xlu0 %3583 }
 0x165   : > { %v3586_v34 = vunpack.i.h.bf16 %v3584_v33  ;;  %v3585_v35 = vunpack.i.l.bf16 %v3584_v33 }
 0x167   : > { %v3426_v36 = vpack.c.bf16 %v3586_v34, %v3585_v35 }
 0x168   : > { %v1025_v37 = vpop.permute.xlu0 %1024 }
 0x169   : > { %3428 = vmatprep.subr.msk.bf16.mxu1 %vm3912_vm2, %v3426_v36  ;;  %3239 = vmatprep.mubr.msk.f32.mxu1 %vm823_vm1, %v1025_v37 }
 0x16a   : > { %3431 = vmatpush3.bf16.xpose.msk.msra.mxu1 %vm3912_vm2, %v3426_v36 }
 0x171   : > { %3240 = vmatmul.mubr.msk.f32.vlgmr.msra.gmra.mrb[8].mxu1 %vm823_vm1, %v1027_v38 }
 0x1cd   : > { %v3227_v47 = vpop.f32.mrb[6].mxu1 }
 0x1ce   : > { %v912_v48 = vsel %vm822_vm7, %v3227_v47, -1e+20  ;;  %v902_v49 = vpop.f32.mrb[7].mxu1 }
 0x1cf   : > { %v914_v50 = vmul.f32 0.17677669, %v912_v48  ;;  %v911_v51 = vsel %vm822_vm7, %v902_v49, -1e+20 }
 0x1d0   : > { %v913_v52 = vmul.f32 0.17677669, %v911_v51 }
 0x1d1   : > { %v920_v53 = vsel %vm919_vm8, %v914_v50, -inf }
 0x1d2   : > { %921 = vmax.xlane.f32.xlu0 %v920_v53  ;;  %v916_v54 = vsel %vm915_vm9, %v913_v52, -inf }
 0x1d3   : > { %917 = vmax.xlane.f32.xlu1 %v916_v54 }
 0x244   : > { %v3241_v55 = vpop.f32.mrb[8].mxu1 }
 0x245   : > { %v1116_v56 = vsel %vm822_vm7, %v3241_v55, -1e+20  ;;  %v1106_v57 = vpop.f32.mrb[9].mxu1 }
 0x246   : > { %v1118_v58 = vmul.f32 0.17677669, %v1116_v56  ;;  %v1115_v59 = vsel %vm822_vm7, %v1106_v57, -1e+20 }
 0x247   : > { %v1117_v60 = vmul.f32 0.17677669, %v1115_v59 }
 0x248   : > { %v1122_v61 = vsel %vm919_vm8, %v1118_v58, -inf }
 0x249   : > { %1123 = vmax.xlane.f32.xlu1 %v1122_v61  ;;  %v1119_v62 = vsel %vm915_vm9, %v1117_v60, -inf }
 0x24a   : > { %1120 = vmax.xlane.f32.xlu0 %v1119_v62 }
 0x25f   : > { %v922_v63 = vpop.xlane.xlu0 %921 }
 0x260   : > { %v924_v0 = vsub.f32 %v914_v50, %v922_v63  ;;  %v918_v1 = vpop.xlane.xlu1 %917 }
 0x261   : > { %v923_v2 = vsub.f32 %v913_v52, %v918_v1 }
 0x262   : > { %v927_v3 = vmul.f32 1.442695, %v924_v0 }
 0x263   : > { %v925_v4 = vmul.f32 1.442695, %v923_v2 }
 0x264   : > { %3652 = vpow2.f32 %v927_v3 }
 0x265   : > { %3654 = vpow2.f32 %v925_v4 }
 0x26e   : > { %v3653_v5 = vpop.eup %3652 }
 0x26f   : > { %v3655_v6 = vpop.eup %3654  ;;  %v932_v7 = vsel %vm919_vm8, %v3653_v5, 0.0 }
 0x270   : > { %933 = vadd.xlane.f32.xlu1 %v932_v7  ;;  %v929_v8 = vsel %vm915_vm9, %v3655_v6, 0.0 }
 0x271   : > { %930 = vadd.xlane.f32.xlu0 %v929_v8 }
 0x2d6   : > { %v1124_v9 = vpop.xlane.xlu1 %1123 }
 0x2d7   : > { %v1126_v10 = vsub.f32 %v1118_v58, %v1124_v9  ;;  %v1121_v11 = vpop.xlane.xlu0 %1120 }
 0x2d8   : > { %v1125_v12 = vsub.f32 %v1117_v60, %v1121_v11 }
 0x2d9   : > { %v1129_v13 = vmul.f32 1.442695, %v1126_v10 }
 0x2da   : > { %v1127_v14 = vmul.f32 1.442695, %v1125_v12 }
 0x2db   : > { %3656 = vpow2.f32 %v1129_v13 }
 0x2dc   : > { %3658 = vpow2.f32 %v1127_v14 }
 0x2e5   : > { %v3657_v15 = vpop.eup %3656 }
 0x2e6   : > { %v3659_v16 = vpop.eup %3658  ;;  %v1134_v17 = vsel %vm919_vm8, %v3657_v15, 0.0 }
 0x2e7   : > { %1135 = vadd.xlane.f32.xlu1 %v1134_v17  ;;  %v1131_v18 = vsel %vm915_vm9, %v3659_v16, 0.0 }
 0x2e8   : > { %1132 = vadd.xlane.f32.xlu0 %v1131_v18 }
 0x2f8   : > { %3593 = vrot.lane.b32.xlu1 %v3916_v27, %s3737_s22 }
 0x2fc   : > { %1230 = vrot.lane.b32.xlu1 %v3904_v23, %s3737_s22 }
 0x2fd   : > { %v934_v19 = vpop.xlane.xlu1 %933 }
 0x2fe   : > { %3660 = vrcp.f32 %v934_v19  ;;  %3588 = vrot.lane.b32.xlu0 %v3942_v39, %s3734_s0  ;;  %v931_v20 = vpop.xlane.xlu0 %930  ;;  %s3745_s0 = smov 12  }
 0x2ff   : > { %3662 = vrcp.f32 %v931_v20 }
 0x302   : > { %1232 = vrot.lane.b32.xlu0 %v3902_v22, %s3737_s22 }
 0x308   : > { %v3661_v21 = vpop.eup %3660 }
 0x309   : > { %v3663_v24 = vpop.eup %3662  ;;  %v938_v28 = vmul.f32 %v3661_v21, %v3653_v5 }
 0x30a   : > { %v937_v25 = vmul.f32 %v3663_v24, %v3655_v6 }
 0x30c   : > { %3232 = vmatprep.mubr.msk.f32.mxu0 %vm915_vm9, %v937_v25 }
 0x30d   : > { %3233 = vmatmul.mubr.msk.f32.vlgmr.msra.gmra.mrb[0].mxu0 %vm915_vm9, %v938_v28 }
 0x374   : > { %v1136_v29 = vpop.xlane.xlu1 %1135 }
 0x375   : > { %3664 = vrcp.f32 %v1136_v29  ;;  %v1133_v30 = vpop.xlane.xlu0 %1132 }
 0x376   : > { %3666 = vrcp.f32 %v1133_v30 }
 0x378   : > { %v3594_v31 = vpop.permute.xlu1 %3593 }
 0x379   : > { %v3589_v33 = vpop.permute.xlu0 %3588  ;;  %v3596_v34 = vunpack.i.h.bf16 %v3594_v31  ;;  %v3595_v35 = vunpack.i.l.bf16 %v3594_v31 }
 0x37a   : > { %v3591_v36 = vunpack.i.h.bf16 %v3589_v33  ;;  %v3590_v37 = vunpack.i.l.bf16 %v3589_v33 }
 0x37b   : > { %v3438_v40 = vpack.c.bf16 %v3596_v34, %v3595_v35 }
 0x37c   : > { %v3432_v38 = vpack.c.bf16 %v3591_v36, %v3590_v37  ;;  %v1231_v45 = vpop.permute.xlu1 %1230 }
 0x37d   : > { %v1233_v47 = vpop.permute.xlu0 %1232 }
 0x37e   : > { %3434 = vmatprep.subr.msk.bf16.mxu0 %vm3928_vm5, %v3432_v38 }
 0x37f   : > { %v3665_v41 = vpop.eup %3664  ;;  %3437 = vmatpush3.bf16.msk.msra.mxu0 %vm3928_vm5, %v3432_v38 }
 0x380   : > { %v3667_v42 = vpop.eup %3666  ;;  %3440 = vmatprep.subr.msk.bf16.mxu0 %vm3912_vm2, %v3438_v40  ;;  %v1140_v44 = vmul.f32 %v3665_v41, %v3657_v15 }
 0x381   : > { %v1139_v43 = vmul.f32 %v3667_v42, %v3659_v16 }
 0x383   : > { %3246 = vmatprep.mubr.msk.f32.mxu0 %vm915_vm9, %v1139_v43 }
 0x384   : > { %3247 = vmatmul.mubr.msk.f32.vlgmr.msra.gmra.mrb[2].mxu0 %vm915_vm9, %v1140_v44 }
 0x385   : > { %3253 = vmatprep.mubr.msk.f32.mxu0 %vm823_vm1, %v1231_v45 }
 0x388   : > { %3443 = vmatpush3.bf16.xpose.msk.msra.mxu0 %vm3912_vm2, %v3438_v40 }
 0x38f   : > { %3254 = vmatmul.mubr.msk.f32.vlgmr.msra.gmra.mrb[4].mxu0 %vm823_vm1, %v1233_v47 }
 0x3e0   : > { %v3989_v48 = vpop.f32.mrb[0].mxu0 }
 0x3e1   : > { %v3991_v49 = vpop.f32.mrb[1].mxu0 }
 0x457   : > { %v3993_v50 = vpop.f32.mrb[2].mxu0 }
 0x458   : > { %v3995_v51 = vpop.f32.mrb[3].mxu0 }
 0x462   : > { %v3255_v52 = vpop.f32.mrb[4].mxu0 }
 0x463   : > { %v1322_v53 = vsel %vm822_vm7, %v3255_v52, -1e+20  ;;  %v1312_v54 = vpop.f32.mrb[5].mxu0 }
 0x464   : > { %v1324_v55 = vmul.f32 0.17677669, %v1322_v53  ;;  %v1321_v56 = vsel %vm822_vm7, %v1312_v54, -1e+20 }
 0x465   : > { %v1323_v57 = vmul.f32 0.17677669, %v1321_v56 }
 0x466   : > { %v1328_v58 = vsel %vm919_vm8, %v1324_v55, -inf }
 0x467   : > { %1329 = vmax.xlane.f32.xlu0 %v1328_v58  ;;  %v1325_v59 = vsel %vm915_vm9, %v1323_v57, -inf }
 0x468   : > { %1326 = vmax.xlane.f32.xlu1 %v1325_v59 }
 0x4f4   : > { %v1330_v60 = vpop.xlane.xlu0 %1329 }
 0x4f5   : > { %v1332_v61 = vsub.f32 %v1324_v55, %v1330_v60  ;;  %v1327_v62 = vpop.xlane.xlu1 %1326 }
 0x4f6   : > { %v1331_v63 = vsub.f32 %v1323_v57, %v1327_v62 }
 0x4f7   : > { %v1335_v0 = vmul.f32 1.442695, %v1332_v61 }
 0x4f8   : > { %v1333_v1 = vmul.f32 1.442695, %v1331_v63 }
 0x4f9   : > { %3668 = vpow2.f32 %v1335_v0 }
 0x4fa   : > { %3670 = vpow2.f32 %v1333_v1 }
 0x503   : > { %v3669_v2 = vpop.eup %3668 }
 0x504   : > { %v3671_v3 = vpop.eup %3670  ;;  %v1340_v4 = vsel %vm919_vm8, %v3669_v2, 0.0 }
 0x505   : > { %1341 = vadd.xlane.f32.xlu1 %v1340_v4  ;;  %v1337_v5 = vsel %vm915_vm9, %v3671_v3, 0.0 }
 0x506   : > { %1338 = vadd.xlane.f32.xlu0 %v1337_v5 }
 0x516   : > { %3603 = vrot.lane.b32.xlu1 %v3916_v27, %s3738_s23 }
 0x51a   : > { %1435 = vrot.lane.b32.xlu1 %v3904_v23, %s3738_s23 }
 0x51c   : > { %3598 = vrot.lane.b32.xlu0 %v3942_v39, %s3737_s22  ;;  %s555_s22 = scalar_lea.vmem %s4320_s16, %s3864_s20 }
 0x520   : > { %1437 = vrot.lane.b32.xlu0 %v3902_v22, %s3738_s23 }
 0x592   : > { %v1342_v6 = vpop.xlane.xlu1 %1341 }
 0x593   : > { %3672 = vrcp.f32 %v1342_v6  ;;  %v1339_v7 = vpop.xlane.xlu0 %1338 }
 0x594   : > { %3674 = vrcp.f32 %v1339_v7 }
 0x596   : > { %v3604_v8 = vpop.permute.xlu1 %3603 }
 0x597   : > { %v3599_v9 = vpop.permute.xlu0 %3598  ;;  %v3606_v10 = vunpack.i.h.bf16 %v3604_v8  ;;  %v3605_v11 = vunpack.i.l.bf16 %v3604_v8 }
 0x598   : > { %v3601_v12 = vunpack.i.h.bf16 %v3599_v9  ;;  %v3600_v13 = vunpack.i.l.bf16 %v3599_v9 }
 0x599   : > { %v3450_v15 = vpack.c.bf16 %v3606_v10, %v3605_v11 }
 0x59a   : > { %v3444_v14 = vpack.c.bf16 %v3601_v12, %v3600_v13  ;;  %v1436_v20 = vpop.permute.xlu1 %1435 }
 0x59b   : > { %v1438_v21 = vpop.permute.xlu0 %1437 }
 0x59c   : > { %3446 = vmatprep.subr.msk.bf16.mxu1 %vm3928_vm5, %v3444_v14 }
 0x59d   : > { %v3673_v16 = vpop.eup %3672  ;;  %3449 = vmatpush3.bf16.msk.msra.mxu1 %vm3928_vm5, %v3444_v14 }
 0x59e   : > { %v3675_v17 = vpop.eup %3674  ;;  %3452 = vmatprep.subr.msk.bf16.mxu1 %vm3912_vm2, %v3450_v15  ;;  %v1346_v19 = vmul.f32 %v3673_v16, %v3669_v2 }
 0x59f   : > { %v1345_v18 = vmul.f32 %v3675_v17, %v3671_v3 }
 0x5a1   : > { %3260 = vmatprep.mubr.msk.f32.mxu1 %vm915_vm9, %v1345_v18 }
 0x5a2   : > { %3261 = vmatmul.mubr.msk.f32.vlgmr.msra.gmra.mrb[10].mxu1 %vm915_vm9, %v1346_v19 }
 0x5a3   : > { %3267 = vmatprep.mubr.msk.f32.mxu1 %vm823_vm1, %v1436_v20 }
 0x5a6   : > { %3455 = vmatpush3.bf16.xpose.msk.msra.mxu1 %vm3912_vm2, %v3450_v15 }
 0x5ad   : > { %3268 = vmatmul.mubr.msk.f32.vlgmr.msra.gmra.mrb[12].mxu1 %vm823_vm1, %v1438_v21 }
 0x675   : > { %v4025_v24 = vpop.f32.mrb[10].mxu1 }
 0x676   : > { %v4027_v25 = vpop.f32.mrb[11].mxu1 }
 0x680   : > { %v3269_v28 = vpop.f32.mrb[12].mxu1 }
 0x681   : > { %v1527_v29 = vsel %vm822_vm7, %v3269_v28, -1e+20  ;;  %v1517_v30 = vpop.f32.mrb[13].mxu1 }
 0x682   : > { %v1529_v31 = vmul.f32 0.17677669, %v1527_v29  ;;  %v1526_v33 = vsel %vm822_vm7, %v1517_v30, -1e+20 }
 0x683   : > { %v1528_v34 = vmul.f32 0.17677669, %v1526_v33 }
 0x684   : > { %v1533_v35 = vsel %vm919_vm8, %v1529_v31, -inf }
 0x685   : > { %1534 = vmax.xlane.f32.xlu0 %v1533_v35  ;;  %v1530_v36 = vsel %vm915_vm9, %v1528_v34, -inf }
 0x686   : > { %1531 = vmax.xlane.f32.xlu1 %v1530_v36 }
 0x712   : > { %v1535_v37 = vpop.xlane.xlu0 %1534 }
 0x713   : > { %v1537_v38 = vsub.f32 %v1529_v31, %v1535_v37  ;;  %v1532_v40 = vpop.xlane.xlu1 %1531 }
 0x714   : > { %v1536_v41 = vsub.f32 %v1528_v34, %v1532_v40 }
 0x715   : > { %v1540_v42 = vmul.f32 1.442695, %v1537_v38 }
 0x716   : > { %v1538_v43 = vmul.f32 1.442695, %v1536_v41 }
 0x717   : > { %3676 = vpow2.f32 %v1540_v42 }
 0x718   : > { %3678 = vpow2.f32 %v1538_v43 }
 0x721   : > { %v3677_v44 = vpop.eup %3676 }
 0x722   : > { %v3679_v45 = vpop.eup %3678  ;;  %v1545_v47 = vsel %vm919_vm8, %v3677_v44, 0.0 }
 0x723   : > { %1546 = vadd.xlane.f32.xlu1 %v1545_v47  ;;  %v1542_v52 = vsel %vm915_vm9, %v3679_v45, 0.0 }
 0x724   : > { %1543 = vadd.xlane.f32.xlu0 %v1542_v52 }
 0x734   : > { %3613 = vrot.lane.b32.xlu1 %v3916_v27, %s3739_s24 }
 0x738   : > { %1640 = vrot.lane.b32.xlu1 %v3904_v23, %s3739_s24 }
 0x73a   : > { %3608 = vrot.lane.b32.xlu0 %v3942_v39, %s3738_s23 }
 0x73e   : > { %1642 = vrot.lane.b32.xlu0 %v3902_v22, %s3739_s24 }
 0x7b0   : > { %v1547_v53 = vpop.xlane.xlu1 %1546 }
 0x7b1   : > { %3680 = vrcp.f32 %v1547_v53  ;;  %v1544_v54 = vpop.xlane.xlu0 %1543 }
 0x7b2   : > { %3682 = vrcp.f32 %v1544_v54 }
 0x7b4   : > { %v3614_v55 = vpop.permute.xlu1 %3613 }
 0x7b5   : > { %v3609_v56 = vpop.permute.xlu0 %3608  ;;  %v3616_v57 = vunpack.i.h.bf16 %v3614_v55  ;;  %v3615_v58 = vunpack.i.l.bf16 %v3614_v55 }
 0x7b6   : > { %v3611_v59 = vunpack.i.h.bf16 %v3609_v56  ;;  %v3610_v60 = vunpack.i.l.bf16 %v3609_v56 }
 0x7b7   : > { %v3462_v62 = vpack.c.bf16 %v3616_v57, %v3615_v58 }
 0x7b8   : > { %v3456_v61 = vpack.c.bf16 %v3611_v59, %v3610_v60  ;;  %v1641_v3 = vpop.permute.xlu1 %1640 }
 0x7b9   : > { %v1643_v4 = vpop.permute.xlu0 %1642 }
 0x7ba   : > { %3458 = vmatprep.subr.msk.bf16.mxu0 %vm3928_vm5, %v3456_v61 }
 0x7bb   : > { %v3681_v63 = vpop.eup %3680  ;;  %3461 = vmatpush3.bf16.msk.msra.mxu0 %vm3928_vm5, %v3456_v61 }
 0x7bc   : > { %v3683_v0 = vpop.eup %3682  ;;  %3464 = vmatprep.subr.msk.bf16.mxu0 %vm3912_vm2, %v3462_v62  ;;  %v1551_v2 = vmul.f32 %v3681_v63, %v3677_v44 }
 0x7bd   : > { %v1550_v1 = vmul.f32 %v3683_v0, %v3679_v45 }
 0x7bf   : > { %3274 = vmatprep.mubr.msk.f32.mxu0 %vm915_vm9, %v1550_v1 }
 0x7c0   : > { %3275 = vmatmul.mubr.msk.f32.vlgmr.msra.gmra.mrb[6].mxu0 %vm915_vm9, %v1551_v2 }
 0x7c1   : > { %3281 = vmatprep.mubr.msk.f32.mxu0 %vm823_vm1, %v1641_v3 }
 0x7c4   : > { %3467 = vmatpush3.bf16.xpose.msk.msra.mxu0 %vm3912_vm2, %v3462_v62 }
 0x7cb   : > { %3282 = vmatmul.mubr.msk.f32.vlgmr.msra.gmra.mrb[8].mxu0 %vm823_vm1, %v1643_v4 }
 0x893   : > { %v4057_v5 = vpop.f32.mrb[6].mxu0 }
 0x894   : > { %v4059_v6 = vpop.f32.mrb[7].mxu0 }
 0x89e   : > { %v3283_v7 = vpop.f32.mrb[8].mxu0 }
 0x89f   : > { %v1732_v8 = vsel %vm822_vm7, %v3283_v7, -1e+20  ;;  %v1722_v9 = vpop.f32.mrb[9].mxu0 }
 0x8a0   : > { %v1734_v10 = vmul.f32 0.17677669, %v1732_v8  ;;  %v1731_v11 = vsel %vm822_vm7, %v1722_v9, -1e+20 }
 0x8a1   : > { %v1733_v12 = vmul.f32 0.17677669, %v1731_v11 }
 0x8a2   : > { %v1738_v13 = vsel %vm919_vm8, %v1734_v10, -inf }
 0x8a3   : > { %1739 = vmax.xlane.f32.xlu0 %v1738_v13  ;;  %v1735_v14 = vsel %vm915_vm9, %v1733_v12, -inf }
 0x8a4   : > { %1736 = vmax.xlane.f32.xlu1 %v1735_v14 }
 0x930   : > { %v1740_v15 = vpop.xlane.xlu0 %1739 }
 0x931   : > { %v1742_v16 = vsub.f32 %v1734_v10, %v1740_v15  ;;  %v1737_v17 = vpop.xlane.xlu1 %1736 }
 0x932   : > { %v1741_v18 = vsub.f32 %v1733_v12, %v1737_v17 }
 0x933   : > { %v1745_v19 = vmul.f32 1.442695, %v1742_v16 }
 0x934   : > { %v1743_v20 = vmul.f32 1.442695, %v1741_v18 }
 0x935   : > { %3684 = vpow2.f32 %v1745_v19 }
 0x936   : > { %3686 = vpow2.f32 %v1743_v20 }
 0x93f   : > { %v3685_v21 = vpop.eup %3684 }
 0x940   : > { %v3687_v28 = vpop.eup %3686  ;;  %v1750_v29 = vsel %vm919_vm8, %v3685_v21, 0.0 }
 0x941   : > { %1751 = vadd.xlane.f32.xlu1 %v1750_v29  ;;  %v1747_v30 = vsel %vm915_vm9, %v3687_v28, 0.0 }
 0x942   : > { %1748 = vadd.xlane.f32.xlu0 %v1747_v30 }
 0x952   : > { %3623 = vrot.lane.b32.xlu1 %v3916_v27, %s3740_s25 }
 0x956   : > { %1845 = vrot.lane.b32.xlu1 %v3904_v23, %s3740_s25 }
 0x958   : > { %3618 = vrot.lane.b32.xlu0 %v3942_v39, %s3739_s24 }
 0x95c   : > { %1847 = vrot.lane.b32.xlu0 %v3902_v22, %s3740_s25 }
 0x9ce   : > { %v1752_v31 = vpop.xlane.xlu1 %1751 }
 0x9cf   : > { %3688 = vrcp.f32 %v1752_v31  ;;  %v1749_v33 = vpop.xlane.xlu0 %1748 }
 0x9d0   : > { %3690 = vrcp.f32 %v1749_v33 }
 0x9d2   : > { %v3624_v34 = vpop.permute.xlu1 %3623 }
 0x9d3   : > { %v3619_v35 = vpop.permute.xlu0 %3618  ;;  %v3626_v36 = vunpack.i.h.bf16 %v3624_v34  ;;  %v3625_v37 = vunpack.i.l.bf16 %v3624_v34 }
 0x9d4   : > { %v3621_v38 = vunpack.i.h.bf16 %v3619_v35  ;;  %v3620_v40 = vunpack.i.l.bf16 %v3619_v35 }
 0x9d5   : > { %v3474_v42 = vpack.c.bf16 %v3626_v36, %v3625_v37 }
 0x9d6   : > { %v3468_v41 = vpack.c.bf16 %v3621_v38, %v3620_v40  ;;  %v1846_v52 = vpop.permute.xlu1 %1845 }
 0x9d7   : > { %v1848_v53 = vpop.permute.xlu0 %1847 }
 0x9d8   : > { %3470 = vmatprep.subr.msk.bf16.mxu1 %vm3928_vm5, %v3468_v41 }
 0x9d9   : > { %v3689_v43 = vpop.eup %3688  ;;  %3473 = vmatpush3.bf16.msk.msra.mxu1 %vm3928_vm5, %v3468_v41 }
 0x9da   : > { %v3691_v44 = vpop.eup %3690  ;;  %3476 = vmatprep.subr.msk.bf16.mxu1 %vm3912_vm2, %v3474_v42  ;;  %v1756_v47 = vmul.f32 %v3689_v43, %v3685_v21 }
 0x9db   : > { %v1755_v45 = vmul.f32 %v3691_v44, %v3687_v28 }
 0x9dd   : > { %3288 = vmatprep.mubr.msk.f32.mxu1 %vm915_vm9, %v1755_v45 }
 0x9de   : > { %3289 = vmatmul.mubr.msk.f32.vlgmr.msra.gmra.mrb[14].mxu1 %vm915_vm9, %v1756_v47 }
 0x9df   : > { %3295 = vmatprep.mubr.msk.f32.mxu1 %vm823_vm1, %v1846_v52 }
 0x9e2   : > { %3479 = vmatpush3.bf16.xpose.msk.msra.mxu1 %vm3912_vm2, %v3474_v42 }
 0x9e9   : > { %3296 = vmatmul.mubr.msk.f32.vlgmr.msra.gmra.mrb[16].mxu1 %vm823_vm1, %v1848_v53 }
 0xab1   : > { %v4089_v54 = vpop.f32.mrb[14].mxu1 }
 0xab2   : > { %v4091_v55 = vpop.f32.mrb[15].mxu1 }
 0xabc   : > { %v3297_v56 = vpop.f32.mrb[16].mxu1 }
 0xabd   : > { %v1937_v57 = vsel %vm822_vm7, %v3297_v56, -1e+20  ;;  %v1927_v58 = vpop.f32.mrb[17].mxu1 }
 0xabe   : > { %v1939_v59 = vmul.f32 0.17677669, %v1937_v57  ;;  %v1936_v60 = vsel %vm822_vm7, %v1927_v58, -1e+20 }
 0xabf   : > { %v1938_v61 = vmul.f32 0.17677669, %v1936_v60 }
 0xac0   : > { %v1943_v62 = vsel %vm919_vm8, %v1939_v59, -inf }
 0xac1   : > { %1944 = vmax.xlane.f32.xlu0 %v1943_v62  ;;  %v1940_v63 = vsel %vm915_vm9, %v1938_v61, -inf }
 0xac2   : > { %1941 = vmax.xlane.f32.xlu1 %v1940_v63 }
 0xb4e   : > { %v1945_v0 = vpop.xlane.xlu0 %1944 }
 0xb4f   : > { %v1947_v1 = vsub.f32 %v1939_v59, %v1945_v0  ;;  %v1942_v2 = vpop.xlane.xlu1 %1941 }
 0xb50   : > { %v1946_v3 = vsub.f32 %v1938_v61, %v1942_v2 }
 0xb51   : > { %v1950_v4 = vmul.f32 1.442695, %v1947_v1 }
 0xb52   : > { %v1948_v7 = vmul.f32 1.442695, %v1946_v3 }
 0xb53   : > { %3692 = vpow2.f32 %v1950_v4 }
 0xb54   : > { %3694 = vpow2.f32 %v1948_v7 }
 0xb5d   : > { %v3693_v8 = vpop.eup %3692 }
 0xb5e   : > { %v3695_v9 = vpop.eup %3694  ;;  %v1955_v10 = vsel %vm919_vm8, %v3693_v8, 0.0 }
 0xb5f   : > { %1956 = vadd.xlane.f32.xlu1 %v1955_v10  ;;  %v1952_v11 = vsel %vm915_vm9, %v3695_v9, 0.0 }
 0xb60   : > { %1953 = vadd.xlane.f32.xlu0 %v1952_v11 }
 0xb70   : > { %3633 = vrot.lane.b32.xlu1 %v3916_v27, %s3741_s27 }
 0xb74   : > { %2050 = vrot.lane.b32.xlu1 %v3904_v23, %s3741_s27 }
 0xb76   : > { %3628 = vrot.lane.b32.xlu0 %v3942_v39, %s3740_s25 }
 0xb7a   : > { %2052 = vrot.lane.b32.xlu0 %v3902_v22, %s3741_s27 }
 0xbec   : > { %v1957_v12 = vpop.xlane.xlu1 %1956 }
 0xbed   : > { %3696 = vrcp.f32 %v1957_v12  ;;  %v1954_v13 = vpop.xlane.xlu0 %1953 }
 0xbee   : > { %3698 = vrcp.f32 %v1954_v13 }
 0xbf0   : > { %v3634_v14 = vpop.permute.xlu1 %3633 }
 0xbf1   : > { %v3629_v15 = vpop.permute.xlu0 %3628  ;;  %v3636_v16 = vunpack.i.h.bf16 %v3634_v14  ;;  %v3635_v17 = vunpack.i.l.bf16 %v3634_v14 }
 0xbf2   : > { %v3631_v18 = vunpack.i.h.bf16 %v3629_v15  ;;  %v3630_v19 = vunpack.i.l.bf16 %v3629_v15 }
 0xbf3   : > { %v3486_v21 = vpack.c.bf16 %v3636_v16, %v3635_v17 }
 0xbf4   : > { %v3480_v20 = vpack.c.bf16 %v3631_v18, %v3630_v19  ;;  %v2051_v33 = vpop.permute.xlu1 %2050 }
 0xbf5   : > { %v2053_v34 = vpop.permute.xlu0 %2052 }
 0xbf6   : > { %3482 = vmatprep.subr.msk.bf16.mxu0 %vm3928_vm5, %v3480_v20 }
 0xbf7   : > { %v3697_v28 = vpop.eup %3696  ;;  %3485 = vmatpush3.bf16.msk.msra.mxu0 %vm3928_vm5, %v3480_v20 }
 0xbf8   : > { %v3699_v29 = vpop.eup %3698  ;;  %3488 = vmatprep.subr.msk.bf16.mxu0 %vm3912_vm2, %v3486_v21  ;;  %v1961_v31 = vmul.f32 %v3697_v28, %v3693_v8 }
 0xbf9   : > { %v1960_v30 = vmul.f32 %v3699_v29, %v3695_v9 }
 0xbfb   : > { %3302 = vmatprep.mubr.msk.f32.mxu0 %vm915_vm9, %v1960_v30 }
 0xbfc   : > { %3303 = vmatmul.mubr.msk.f32.vlgmr.msra.gmra.mrb[10].mxu0 %vm915_vm9, %v1961_v31 }
 0xbfd   : > { %3309 = vmatprep.mubr.msk.f32.mxu0 %vm823_vm1, %v2051_v33 }
 0xc00   : > { %3491 = vmatpush3.bf16.xpose.msk.msra.mxu0 %vm3912_vm2, %v3486_v21 }
 0xc07   : > { %3310 = vmatmul.mubr.msk.f32.vlgmr.msra.gmra.mrb[12].mxu0 %vm823_vm1, %v2053_v34 }
 0xccf   : > { %v4121_v35 = vpop.f32.mrb[10].mxu0 }
 0xcd0   : > { %v4123_v36 = vpop.f32.mrb[11].mxu0 }
 0xcda   : > { %v3311_v37 = vpop.f32.mrb[12].mxu0 }
 0xcdb   : > { %v2142_v38 = vsel %vm822_vm7, %v3311_v37, -1e+20  ;;  %v2132_v40 = vpop.f32.mrb[13].mxu0 }
 0xcdc   : > { %v2144_v41 = vmul.f32 0.17677669, %v2142_v38  ;;  %v2141_v42 = vsel %vm822_vm7, %v2132_v40, -1e+20 }
 0xcdd   : > { %v2143_v43 = vmul.f32 0.17677669, %v2141_v42  ;;  %v574_v42 = vld [vmem:[%s4310_s6 + $0x8] sm:$0xff] }
 0xcde   : > { %v2148_v44 = vsel %vm919_vm8, %v2144_v41, -inf }
 0xcdf   : > { %2149 = vmax.xlane.f32.xlu0 %v2148_v44  ;;  %v2145_v45 = vsel %vm915_vm9, %v2143_v43, -inf  ;;  %v576_v44 = vld [vmem:[%s4310_s6 + $0x18] sm:$0xff] }
 0xce0   : > { %2146 = vmax.xlane.f32.xlu1 %v2145_v45  ;;  %v3514_v45 = vpack.c.bf16 %v576_v44, %v575_v32 }
 0xd6c   : > { %v2150_v47 = vpop.xlane.xlu0 %2149 }
 0xd6d   : > { %v2152_v52 = vsub.f32 %v2144_v41, %v2150_v47  ;;  %v2147_v53 = vpop.xlane.xlu1 %2146 }
 0xd6e   : > { %v2151_v56 = vsub.f32 %v2143_v43, %v2147_v53 }
 0xd6f   : > { %v2155_v57 = vmul.f32 1.442695, %v2152_v52 }
 0xd70   : > { %v2153_v58 = vmul.f32 1.442695, %v2151_v56 }
 0xd71   : > { %3700 = vpow2.f32 %v2155_v57 }
 0xd72   : > { %3702 = vpow2.f32 %v2153_v58 }
 0xd7b   : > { %v3701_v59 = vpop.eup %3700 }
 0xd7c   : > { %v3703_v60 = vpop.eup %3702  ;;  %v2160_v61 = vsel %vm919_vm8, %v3701_v59, 0.0 }
 0xd7d   : > { %2161 = vadd.xlane.f32.xlu1 %v2160_v61  ;;  %v2157_v62 = vsel %vm915_vm9, %v3703_v60, 0.0 }
 0xd7e   : > { %2158 = vadd.xlane.f32.xlu0 %v2157_v62 }
 0xd8e   : > { %3643 = vrot.lane.b32.xlu1 %v3916_v27, %s3742_s28 }
 0xd92   : > { %2255 = vrot.lane.b32.xlu1 %v3904_v23, %s3742_s28 }
 0xd94   : > { %3638 = vrot.lane.b32.xlu0 %v3942_v39, %s3741_s27 }
 0xd98   : > { %2257 = vrot.lane.b32.xlu0 %v3902_v22, %s3742_s28 }
 0xe0a   : > { %v2162_v63 = vpop.xlane.xlu1 %2161 }
 0xe0b   : > { %3704 = vrcp.f32 %v2162_v63  ;;  %v2159_v0 = vpop.xlane.xlu0 %2158 }
 0xe0c   : > { %3706 = vrcp.f32 %v2159_v0 }
 0xe0e   : > { %v3644_v1 = vpop.permute.xlu1 %3643 }
 0xe0f   : > { %v3639_v2 = vpop.permute.xlu0 %3638  ;;  %v3646_v3 = vunpack.i.h.bf16 %v3644_v1  ;;  %v3645_v4 = vunpack.i.l.bf16 %v3644_v1 }
 0xe10   : > { %v3641_v7 = vunpack.i.h.bf16 %v3639_v2  ;;  %v3640_v8 = vunpack.i.l.bf16 %v3639_v2 }
 0xe11   : > { %v3498_v9 = vpack.c.bf16 %v3646_v3, %v3645_v4 }
 0xe12   : > { %v3492_v27 = vpack.c.bf16 %v3641_v7, %v3640_v8  ;;  %v2256_v12 = vpop.permute.xlu1 %2255 }
 0xe13   : > { %v2258_v13 = vpop.permute.xlu0 %2257 }
 0xe14   : > { %3494 = vmatprep.subr.msk.bf16.mxu1 %vm3928_vm5, %v3492_v27 }
 0xe15   : > { %v3705_v23 = vpop.eup %3704  ;;  %3497 = vmatpush3.bf16.msk.msra.mxu1 %vm3928_vm5, %v3492_v27 }
 0xe16   : > { %v3707_v22 = vpop.eup %3706  ;;  %3500 = vmatprep.subr.msk.bf16.mxu1 %vm3912_vm2, %v3498_v9  ;;  %v2166_v11 = vmul.f32 %v3705_v23, %v3701_v59 }
 0xe17   : > { %v2165_v10 = vmul.f32 %v3707_v22, %v3703_v60 }
 0xe19   : > { %3316 = vmatprep.mubr.msk.f32.mxu1 %vm915_vm9, %v2165_v10 }
 0xe1a   : > { %3317 = vmatmul.mubr.msk.f32.vlgmr.msra.gmra.mrb[18].mxu1 %vm915_vm9, %v2166_v11 }
 0xe1b   : > { %3323 = vmatprep.mubr.msk.f32.mxu1 %vm823_vm1, %v2256_v12 }
 0xe1e   : > { %3503 = vmatpush3.bf16.xpose.msk.msra.mxu1 %vm3912_vm2, %v3498_v9 }
 0xe25   : > { %3324 = vmatmul.mubr.msk.f32.vlgmr.msra.gmra.mrb[20].mxu1 %vm823_vm1, %v2258_v13 }
 0xeed   : > { %v3318_v14 = vpop.f32.mrb[18].mxu1 }
 0xeee   : > { %v2246_v15 = vpop.f32.mrb[19].mxu1 }
 0xef8   : > { %v3325_v16 = vpop.f32.mrb[20].mxu1 }
 0xef9   : > { %v2347_v17 = vsel %vm822_vm7, %v3325_v16, -1e+20  ;;  %v2337_v18 = vpop.f32.mrb[21].mxu1  ;;  %v3060_v16 = vld [vmem:[%s4311_s7] ss:$0 sm:$0xff] }
 0xefa   : > { %v2349_v19 = vmul.f32 0.17677669, %v2347_v17  ;;  %v2346_v20 = vsel %vm822_vm7, %v2337_v18, -1e+20 }
 0xefb   : > { %v2348_v21 = vmul.f32 0.17677669, %v2346_v20 }
 0xefc   : > { %v2353_v28 = vsel %vm919_vm8, %v2349_v19, -inf }
 0xefd   : > { %2354 = vmax.xlane.f32.xlu0 %v2353_v28  ;;  %v2350_v26 = vsel %vm915_vm9, %v2348_v21, -inf }
 0xefe   : > { %2351 = vmax.xlane.f32.xlu1 %v2350_v26  ;;  %v3725_v26 = vld [vmem:[%s3870_s26] sm:$0xff] }
 0xf8a   : > { %v2355_v29 = vpop.xlane.xlu0 %2354 }
 0xf8b   : > { %v2357_v30 = vsub.f32 %v2349_v19, %v2355_v29  ;;  %v2352_v31 = vpop.xlane.xlu1 %2351 }
 0xf8c   : > { %v2356_v33 = vsub.f32 %v2348_v21, %v2352_v31  ;;  %v3724_v21 = vld [vmem:[%s3870_s26 + $0x8] sm:$0x3] }
 0xf8d   : > { %v2360_v34 = vmul.f32 1.442695, %v2357_v30 }
 0xf8e   : > { %v2358_v37 = vmul.f32 1.442695, %v2356_v33 }
 0xf8f   : > { %3708 = vpow2.f32 %v2360_v34 }
 0xf90   : > { %3710 = vpow2.f32 %v2358_v37 }
 0xf99   : > { %v3709_v38 = vpop.eup %3708 }
 0xf9a   : > { %v3711_v40 = vpop.eup %3710  ;;  %v2365_v46 = vsel %vm919_vm8, %v3709_v38, 0.0 }
 0xf9b   : > { %2366 = vadd.xlane.f32.xlu1 %v2365_v46  ;;  %v2362_v41 = vsel %vm915_vm9, %v3711_v40, 0.0 }
 0xf9c   : > { %2363 = vadd.xlane.f32.xlu0 %v2362_v41 }
 0xfac   : > { %2462 = vrot.lane.b32.xlu1 %v3995_v51, %s3743_s29 }
 0xfb0   : > { %2464 = vrot.lane.b32.xlu1 %v3993_v50, %s3743_s29 }
 0xfb2   : > { %3648 = vrot.lane.b32.xlu0 %v3942_v39, %s3742_s28 }
 0xfb4   : > { %2472 = vrot.lane.b32.xlu1 %v4025_v24, %s3744_s30 }
 0xfb6   : > { %2470 = vrot.lane.b32.xlu0 %v4027_v25, %s3744_s30 }
 0xfb8   : > { %2480 = vrot.lane.b32.xlu1 %v4057_v5, %s3745_s0 }
 0xfba   : > { %2478 = vrot.lane.b32.xlu0 %v4059_v6, %s3745_s0  ;;  %s3749_s0 = smov 28  }
 0xfbc   : > { %2488 = vrot.lane.b32.xlu1 %v4089_v54, %s3746_s17 }
 0xfbe   : > { %2486 = vrot.lane.b32.xlu0 %v4091_v55, %s3746_s17 }
 0xfc0   : > { %2496 = vrot.lane.b32.xlu1 %v4121_v35, %s3747_s18 }
 0xfc2   : > { %2494 = vrot.lane.b32.xlu0 %v4123_v36, %s3747_s18  ;;  %v573_v36 = vld [vmem:[%s4310_s6] sm:$0xff] }
 0xfc3   : > { %v3510_v43 = vpack.c.bf16 %v574_v42, %v573_v36  ;;  %v2766_v36 = vld [vmem:[%s4316_s12 + $0x8] sm:$0xff]  ;;  %v2767_v42 = vld [vmem:[%s4316_s12 + $0x10] sm:$0xff] }
 0xfc4   : > { %2504 = vrot.lane.b32.xlu1 %v3318_v14, %s3748_s19 }
 0xfc6   : > { %2502 = vrot.lane.b32.xlu0 %v2246_v15, %s3748_s19 }
0x1028   : > { %v2367_v39 = vpop.xlane.xlu1 %2366 }
0x1029   : > { %3712 = vrcp.f32 %v2367_v39  ;;  %v2364_v50 = vpop.xlane.xlu0 %2363 }
0x102a   : > { %3714 = vrcp.f32 %v2364_v50 }
0x102c   : > { %v2463_v53 = vpop.permute.xlu1 %2462 }
0x102d   : > { %v3649_v51 = vpop.permute.xlu0 %3648  ;;  %v2516_v1 = vsel %vm823_vm1, %v3991_v49, %v2463_v53  ;;  %v2771_v53 = vld [vmem:[%s4316_s12 + $0x30] sm:$0xff] }
0x102e   : > { %v3651_v24 = vunpack.i.h.bf16 %v3649_v51  ;;  %v3650_v25 = vunpack.i.l.bf16 %v3649_v51 }
0x1030   : > { %v3504_v5 = vpack.c.bf16 %v3651_v24, %v3650_v25  ;;  %v2465_v56 = vpop.permute.xlu1 %2464  ;;  %v2671_v24 = vld [vmem:[%s4314_s10] sm:$0xff]  ;;  %v2672_v25 = vld [vmem:[%s4314_s10 + $0x8] sm:$0xff] }
0x1031   : > { %v2471_v58 = vpop.permute.xlu0 %2470  ;;  %v2517_v3 = vsel %vm823_vm1, %v3989_v48, %v2465_v56  ;;  %vm2630_vm1 = vcmask 254976   ;;  %v2772_v56 = vld [vmem:[%s4316_s12 + $0x38] sm:$0xff] }
0x1032   : > { %3506 = vmatprep.subr.msk.bf16.mxu0 %vm3928_vm5, %v3504_v5  ;;  %v2519_v4 = vsel %vm2518_vm10, %v2516_v1, %v2471_v58  ;;  %v2773_v58 = vld [vmem:[%s4316_s12 + $0x40] sm:$0xff]  ;;  %v2778_v1 = vld [vmem:[%s4316_s12 + $0x68] sm:$0xff] }
0x1033   : > { %v3713_v6 = vpop.eup %3712  ;;  %3509 = vmatpush3.bf16.msk.msra.mxu0 %vm3928_vm5, %v3504_v5  ;;  %v3518_v5 = vpack.c.bf16 %v2672_v25, %v2671_v24 }
0x1034   : > { %v3715_v54 = vpop.eup %3714  ;;  %v2371_v35 = vmul.f32 %v3713_v6, %v3709_v38  ;;  %3511 = vmatprep.subr.bf16.mxu0 %v3510_v43  ;;  %v2473_v57 = vpop.permute.xlu1 %2472  ;;  %v2673_v6 = vld [vmem:[%s4314_s10 + $0x10] sm:$0xff] }
0x1035   : > { %v2370_v55 = vmul.f32 %v3715_v54, %v3711_v40  ;;  %v2479_v60 = vpop.permute.xlu0 %2478  ;;  %v2520_v8 = vsel %vm2518_vm10, %v2517_v3, %v2473_v57  ;;  %3519 = vmatprep.subr.bf16.mxu1 %v3518_v5  ;;  %v2674_v54 = vld [vmem:[%s4314_s10 + $0x18] sm:$0xff]  ;;  %v3538_v57 = vpack.c.bf16 %v2772_v56, %v2771_v53  ;;  %v3069_v53 = vld [vmem:[%s4318_s14] ss:$0 sm:$0xff] }
0x1036   : > { %v2522_v27 = vsel %vm2521_vm11, %v2519_v4, %v2479_v60  ;;  %3521 = vmatpush3.bf16.msra.mxu1 %v3518_v5 }
0x1037   : > { %3330 = vmatprep.mubr.msk.f32.mxu0 %vm915_vm9, %v2370_v55  ;;  %v3522_v55 = vpack.c.bf16 %v2674_v54, %v2673_v6 }
0x1038   : > { %3331 = vmatmul.mubr.msk.f32.vlgmr.msra.gmra.mrb[14].mxu0 %vm915_vm9, %v2371_v35  ;;  %v2481_v59 = vpop.permute.xlu1 %2480  ;;  %v2765_v35 = vld [vmem:[%s4316_s12] sm:$0xff] }
0x1039   : > { %3513 = vmatpush3.bf16.msra.mxu0 %v3510_v43  ;;  %v2487_v62 = vpop.permute.xlu0 %2486  ;;  %v2523_v9 = vsel %vm2521_vm11, %v2520_v8, %v2481_v59  ;;  %3523 = vmatprep.subr.bf16.mxu1 %v3522_v55  ;;  %v3526_v32 = vpack.c.bf16 %v2766_v36, %v2765_v35  ;;  %v2768_v43 = vld [vmem:[%s4316_s12 + $0x18] sm:$0xff]  ;;  %v2774_v59 = vld [vmem:[%s4316_s12 + $0x48] sm:$0xff] }
0x103a   : > { %3515 = vmatprep.subr.bf16.mxu0 %v3514_v45  ;;  %v2525_v23 = vsel %vm2524_vm12, %v2522_v27, %v2487_v62  ;;  %3525 = vmatpush3.bf16.msra.mxu1 %v3522_v55  ;;  %v3530_v44 = vpack.c.bf16 %v2768_v43, %v2767_v42  ;;  %v3542_v60 = vpack.c.bf16 %v2774_v59, %v2773_v58  ;;  %v2776_v62 = vld [vmem:[%s4316_s12 + $0x58] sm:$0xff]  ;;  %v3070_v58 = vld [vmem:[%s4319_s15] ss:$0 sm:$0xff] }
0x103c   : > { %v2489_v61 = vpop.permute.xlu1 %2488 }
0x103d   : > { %3517 = vmatpush3.bf16.msra.mxu0 %v3514_v45  ;;  %v2495_v0 = vpop.permute.xlu0 %2494  ;;  %v2526_v22 = vsel %vm2524_vm12, %v2523_v9, %v2489_v61  ;;  %v2769_v45 = vld [vmem:[%s4316_s12 + $0x20] sm:$0xff]  ;;  %v2775_v61 = vld [vmem:[%s4316_s12 + $0x50] sm:$0xff] }
0x103e   : > { %v2528_v10 = vsel %vm2527_vm13, %v2525_v23, %v2495_v0  ;;  %3527 = vmatprep.subr.bf16.mxu0 %v3526_v32  ;;  %v2777_v0 = vld [vmem:[%s4316_s12 + $0x60] sm:$0xff] }
0x1040   : > { %v2497_v63 = vpop.permute.xlu1 %2496 }
0x1041   : > { %v2503_v7 = vpop.permute.xlu0 %2502  ;;  %v2529_v12 = vsel %vm2527_vm13, %v2526_v22, %v2497_v63  ;;  %v3546_v63 = vpack.c.bf16 %v2776_v62, %v2775_v61  ;;  %v3063_v22 = vld [vmem:[%s4312_s8] ss:$0 sm:$0xff] }
0x1042   : > { %v2531_v49 = vsel %vm2530_vm14, %v2528_v10, %v2503_v7 }
0x1044   : > { %v2505_v2 = vpop.permute.xlu1 %2504 }
0x1045   : > { %v2532_v14 = vsel %vm2530_vm14, %v2529_v12, %v2505_v2  ;;  %v3550_v2 = vpack.c.bf16 %v2778_v1, %v2777_v0 }
0x110b   : > { %v3332_v47 = vpop.f32.mrb[14].mxu0 }
0x110c   : > { %2512 = vrot.lane.b32.xlu1 %v3332_v47, %s3749_s0  ;;  %v2451_v52 = vpop.f32.mrb[15].mxu0  ;;  %v2770_v47 = vld [vmem:[%s4316_s12 + $0x28] sm:$0xff] }
0x110d   : > { %2510 = vrot.lane.b32.xlu0 %v2451_v52, %s3749_s0  ;;  %v3534_v52 = vpack.c.bf16 %v2770_v47, %v2769_v45 }
0x117e   : > { %v2513_v11 = vpop.permute.xlu1 %2512 }
0x117f   : > { %v2511_v13 = vpop.permute.xlu0 %2510  ;;  %v2535_v48 = vsel %vm2533_vm15, %v2532_v14, %v2513_v11  ;;  %v3064_v11 = vld [vmem:[%s4313_s9] ss:$0 sm:$0xff] }
0x1180   : > { %v2534_v15 = vsel %vm2533_vm15, %v2531_v49, %v2511_v13 }
0x1181   : > { %3341 = vmatprep.mubr.msk.f32.mxu0 %vm578_vm0, %v2534_v15 }
0x1182   : > { %3342 = vmatmul.mubr.msk.f32.vlgmr.msra.gmra.mrb[16].mxu0 %vm578_vm0, %v2535_v48 }
0x1183   : > { %3529 = vmatpush3.bf16.msra.mxu0 %v3526_v32 }
0x1184   : > { %3531 = vmatprep.subr.bf16.mxu0 %v3530_v44 }
0x1187   : > { %3533 = vmatpush3.bf16.msra.mxu0 %v3530_v44 }
0x1188   : > { %3535 = vmatprep.subr.bf16.mxu0 %v3534_v52 }
0x118b   : > { %3537 = vmatpush3.bf16.msra.mxu0 %v3534_v52 }
0x118c   : > { %3539 = vmatprep.subr.bf16.mxu0 %v3538_v57 }
0x118f   : > { %3541 = vmatpush3.bf16.msra.mxu0 %v3538_v57 }
0x1190   : > { %3543 = vmatprep.subr.bf16.mxu0 %v3542_v60 }
0x1193   : > { %3545 = vmatpush3.bf16.msra.mxu0 %v3542_v60 }
0x1194   : > { %3547 = vmatprep.subr.bf16.mxu0 %v3546_v63 }
0x1197   : > { %3549 = vmatpush3.bf16.msra.mxu0 %v3546_v63 }
0x1198   : > { %3551 = vmatprep.subr.bf16.mxu0 %v3550_v2 }
0x119b   : > { %3553 = vmatpush3.bf16.msra.mxu0 %v3550_v2 }
0x1255   : > { %v3343_v17 = vpop.f32.mrb[16].mxu0 }
0x1256   : > { %v2620_v18 = vadd.f32 %v3343_v17, %v3060_v16  ;;  %v2614_v19 = vpop.f32.mrb[17].mxu0  ;;  %v2780_v17 = vld [vmem:[%s4316_s12 + $0x78] sm:$0xff] }
0x1257   : > { %v2615_v20 = vadd.f32 %v3060_v16, %v2614_v19  ;;  %v2779_v16 = vld [vmem:[%s4316_s12 + $0x70] sm:$0xff]  ;;  %v3065_v19 = vld [vmem:[%s4315_s11] ss:$0 sm:$0xff] }
0x1258   : > { %v2626_v28 = vadd.f32 %v3724_v21, %v2620_v18  ;;  %v3554_v18 = vpack.c.bf16 %v2780_v17, %v2779_v16 }
0x1259   : > { %v2625_v29 = vadd.f32 %v3725_v26, %v2615_v20 }
0x125a   : > { %v2631_v30 = vsel %vm2630_vm1, %v2626_v28, 0.0  ;;  %3555 = vmatprep.subr.bf16.mxu0 %v3554_v18 }
0x125b   : > { %2632 = vadd.xlane.f32.xlu1 %v2631_v30  ;;  %v2627_v31 = vsel %vm578_vm0, %v2625_v29, 0.0  ;;  %3557 = vmatpush3.bf16.msra.mxu0 %v3554_v18 }
0x125c   : > { %2628 = vadd.xlane.f32.xlu0 %v2627_v31  ;;  %v3068_v31 = vld [vmem:[%s4317_s13] ss:$0 sm:$0xff] }
0x12e8   : > { %v2633_v33 = vpop.xlane.xlu1 %2632 }
0x12e9   : > { %v2636_v34 = vmul.f32 0.03125, %v2633_v33  ;;  %v2629_v37 = vpop.xlane.xlu0 %2628 }
0x12ea   : > { %v2635_v38 = vmul.f32 0.03125, %v2629_v37 }
0x12eb   : > { %v4204_v40 = vsub.f32 %v2626_v28, %v2636_v34 }
0x12ec   : > { %v2637_v46 = vsub.f32 %v2625_v29, %v2635_v38 }
0x12ed   : > { %v2640_v50 = vmul.f32 %v4204_v40, %v4204_v40 }
0x12ee   : > { %v2639_v41 = vmul.f32 %v2637_v46, %v2637_v46 }
0x12ef   : > { %v2644_v51 = vsel %vm2630_vm1, %v2640_v50, 0.0 }
0x12f0   : > { %v2641_v39 = vsel %vm578_vm0, %v2639_v41, 0.0 }
0x12f1   : > { %2642 = vadd.xlane.f32.xlu0 %v2641_v39 }
0x12f5   : > { %2645 = vadd.xlane.f32.xlu0 %v2644_v51 }
0x137e   : > { %v2643_v3 = vpop.xlane.xlu0 %2642 }
0x137f   : > { %v2647_v4 = vmul.f32 0.03125, %v2643_v3 }
0x1381   : > { %v2649_v7 = vadd.f32 1e-05, %v2647_v4 }
0x1382   : > { %v2646_v8 = vpop.xlane.xlu0 %2645 }
0x1383   : > { %3716 = vrsqrt.f32 %v2649_v7  ;;  %v2648_v27 = vmul.f32 0.03125, %v2646_v8 }
0x1385   : > { %v2650_v9 = vadd.f32 1e-05, %v2648_v27 }
0x1387   : > { %3718 = vrsqrt.f32 %v2650_v9 }
0x138d   : > { %v3717_v23 = vpop.eup %3716 }
0x138e   : > { %v2653_v10 = vmul.f32 %v3717_v23, %v2637_v46 }
0x1390   : > { %v2661_v12 = vmul.f32 %v3063_v22, %v2653_v10 }
0x1391   : > { %v3719_v49 = vpop.eup %3718 }
0x1392   : > { %v2654_v13 = vmul.f32 %v3719_v49, %v4204_v40  ;;  %v2669_v14 = vadd.f32 %v3064_v11, %v2661_v12 }
0x1394   : > { %v2662_v15 = vmul.f32 %v3063_v22, %v2654_v13  ;;  %3352 = vmatprep.mubr.msk.f32.mxu1 %vm578_vm0, %v2669_v14 }
0x1396   : > { %v2670_v48 = vadd.f32 %v3064_v11, %v2662_v15 }
0x1398   : > { %3353 = vmatmul.mubr.msk.f32.vlgmr.msra.gmra.mrb[22].mxu1 %vm578_vm0, %v2670_v48 }
0x146b   : > { %v3354_v20 = vpop.f32.mrb[22].mxu1 }
0x146c   : > { %v2760_v21 = vadd.f32 %v3354_v20, %v3065_v19  ;;  %v2754_v28 = vpop.f32.mrb[23].mxu1 }
0x146d   : > { %v2755_v26 = vadd.f32 %v3065_v19, %v2754_v28 }
0x146e   : > { %v2764_v30 = vmax.f32 %v2760_v21, 0.0 }
0x146f   : > { %v2763_v29 = vmax.f32 %v2755_v26, 0.0 }
0x1471   : > { %3387 = vmatprep.mubr.f32.mxu0 %v2763_v29 }
0x1472   : > { %3388 = vmatmul.mubr.f32.vlgmr.msra.gmra.mrb[18].mxu0 %v2764_v30 }
0x1545   : > { %v3389_v33 = vpop.f32.mrb[18].mxu0 }
0x1546   : > { %v2860_v34 = vadd.f32 %v3389_v33, %v3068_v31  ;;  %v2854_v37 = vpop.f32.mrb[19].mxu0 }
0x1547   : > { %v2855_v38 = vadd.f32 %v3068_v31, %v2854_v37 }
0x1548   : > { %v2866_v40 = vadd.f32 %v2860_v34, %v2670_v48 }
0x1549   : > { %v2865_v46 = vadd.f32 %v2855_v38, %v2669_v14 }
0x154a   : > { %v2870_v41 = vsel %vm2630_vm1, %v2866_v40, 0.0 }
0x154b   : > { %2871 = vadd.xlane.f32.xlu0 %v2870_v41  ;;  %v2867_v39 = vsel %vm578_vm0, %v2865_v46, 0.0 }
0x154c   : > { %2868 = vadd.xlane.f32.xlu1 %v2867_v39 }
0x15d8   : > { %v2872_v50 = vpop.xlane.xlu0 %2871 }
0x15d9   : > { %v2874_v51 = vmul.f32 0.03125, %v2872_v50  ;;  %v2869_v24 = vpop.xlane.xlu1 %2868 }
0x15da   : > { %v2873_v25 = vmul.f32 0.03125, %v2869_v24 }
0x15db   : > { %v2876_v5 = vsub.f32 %v2866_v40, %v2874_v51 }
0x15dc   : > { %v2875_v6 = vsub.f32 %v2865_v46, %v2873_v25 }
0x15dd   : > { %v2878_v54 = vmul.f32 %v2876_v5, %v2876_v5 }
0x15de   : > { %v2877_v55 = vmul.f32 %v2875_v6, %v2875_v6 }
0x15df   : > { %v2882_v35 = vsel %vm2630_vm1, %v2878_v54, 0.0 }
0x15e0   : > { %2883 = vadd.xlane.f32.xlu0 %v2882_v35  ;;  %v2879_v36 = vsel %vm578_vm0, %v2877_v55, 0.0 }
0x15e1   : > { %2880 = vadd.xlane.f32.xlu1 %v2879_v36 }
0x166d   : > { %v2884_v42 = vpop.xlane.xlu0 %2883 }
0x166e   : > { %v2886_v32 = vmul.f32 0.03125, %v2884_v42  ;;  %v2881_v43 = vpop.xlane.xlu1 %2880 }
0x166f   : > { %v2885_v44 = vmul.f32 0.03125, %v2881_v43 }
0x1670   : > { %v2888_v45 = vadd.f32 1e-05, %v2886_v32 }
0x1671   : > { %v2887_v47 = vadd.f32 1e-05, %v2885_v44 }
0x1672   : > { %3720 = vrsqrt.f32 %v2888_v45 }
0x1673   : > { %3722 = vrsqrt.f32 %v2887_v47 }
0x167c   : > { %v3721_v52 = vpop.eup %3720 }
0x167d   : > { %v3723_v56 = vpop.eup %3722  ;;  %v2892_v57 = vmul.f32 %v3721_v52, %v2876_v5 }
0x167e   : > { %v2891_v59 = vmul.f32 %v3723_v56, %v2875_v6 }
0x167f   : > { %v2900_v60 = vmul.f32 %v3069_v53, %v2892_v57 }
0x1680   : > { %v2899_v61 = vmul.f32 %v3069_v53, %v2891_v59 }
0x1681   : > { %v2908_v62 = vadd.f32 %v3070_v58, %v2900_v60 }
0x1682   : > { %v2907_v63 = vadd.f32 %v3070_v58, %v2899_v61 }
0x1683   : > { %2910 = vst.msk [vmem:[%s555_s22 + $0x8] sm:$0x3] %vm2630_vm1, %v2908_v62 }
0x1684   : > { %2909 = vst.msk [vmem:[%s555_s22] sm:$0xff] %vm578_vm0, %v2907_v63 }
0x1685 PF: > { %s26_s21 = sadd.s32 1, %s3732_s21  }
0x1686   : > { %p23_p4 = scmp.ge.s32.totalorder %s26_s21, 4  }
0x1688   :  { %25 = sbr.rel (!%p23_p4) target bundleno = 2 (0x2), region = 120 }

// kernel: transformer_forward.10
= control target key start
LH: loop header
LB: loop body
LE: loop exit
PB: predicated region body
PF: predicated region fallthrough
CT: control target
= control target key end

     0   :  { %s3367_s21 = smov 0   ;;  %s3763_s0 = inlined_call_operand.vmem [shape: f32[2,8,32], index: 0, kind: input, shape index: {}]   ;;  %s3764_s1 = inlined_call_operand.vmem [shape: f32[2,10,32], index: 1, kind: input, shape index: {}]   ;;  %s3765_s2 = inlined_call_operand.vmem [shape: f32[2,1,10], index: 2, kind: input, shape index: {}]   ;;  %s3766_s3 = inlined_call_operand.vmem [shape: f32[32,32], index: 3, kind: input, shape index: {}]   ;;  %s3767_s4 = inlined_call_operand.vmem [shape: f32[32,32], index: 4, kind: input, shape index: {}]   ;;  %s3768_s5 = inlined_call_operand.vmem [shape: f32[32,32], index: 5, kind: input, shape index: {}]   ;;  %s3769_s6 = inlined_call_operand.vmem [shape: f32[32,32], index: 6, kind: input, shape index: {}]   ;;  %s3770_s7 = inlined_call_operand.vmem [shape: f32[1,32], index: 7, kind: input, shape index: {}]   ;;  %s3771_s8 = inlined_call_operand.vmem [shape: f32[1,32], index: 8, kind: input, shape index: {}]   ;;  %s3772_s9 = inlined_call_operand.vmem [shape: f32[1,32], index: 9, kind: input, shape index: {}]   ;;  %s3773_s10 = inlined_call_operand.vmem [shape: f32[32,128], index: 10, kind: input, shape index: {}]   ;;  %s3774_s11 = inlined_call_operand.vmem [shape: f32[1,128], index: 11, kind: input, shape index: {}]   ;;  %s3775_s12 = inlined_call_operand.vmem [shape: f32[128,32], index: 12, kind: input, shape index: {}]   ;;  %s3776_s13 = inlined_call_operand.vmem [shape: f32[1,32], index: 13, kind: input, shape index: {}]   ;;  %s3777_s14 = inlined_call_operand.vmem [shape: f32[1,32], index: 14, kind: input, shape index: {}]   ;;  %s3778_s15 = inlined_call_operand.vmem [shape: f32[1,32], index: 15, kind: input, shape index: {}]   ;;  %s3779_s16 = inlined_call_operand.vmem [shape: f32[2,8,32], index: 16, kind: output, shape index: {}]  }
   0x1   :  { %3780 = sst [smem:[#allocation2_spill]] %s3763_s0 }
   0x2 LB: > { %s2640_s22 = sadd.s32 4294967295, %s3261_s21   ;;  %p2644_p0 = scmp.ge.s32.totalorder %s3261_s21, 1  ;;  %s3261_s21 = sphi %s3367_s21, %s26_s21  }
   0x3   : > { %p479_p1 = scmp.lt.s32.totalorder %s3261_s21, 3 }
   0x5   : > { %p480_p2 = pnand %p2644_p0, %p479_p1 }
   0x6   : > { %v555_v0 = vld [vmem:[%s3766_s3] sm:$0xff] (!%p480_p2)  ;;  %v556_v1 = vld [vmem:[%s3766_s3 + $0x8] sm:$0xff] (!%p480_p2)  ;;  %v557_v2 = vld [vmem:[%s3766_s3 + $0x10] sm:$0xff] (!%p480_p2)  ;;  %v3263_v3 = vmov (!%p480_p2), 0.0|0.0   ;;  %vm3264_vm0 = vmmov (!%p480_p2), 0   ;;  %v3265_v6 = vmov (!%p480_p2), 0.0   ;;  %v804_v40 = vlaneseq (!%p480_p2) }
   0x7   : > { %483 = sbr.rel (%p480_p2) target bundleno = 5721 (0x1659), region = 84  ;;  %3000 = vmatprep.subr.bf16.mxu1 (!%p480_p2), %v3263_v3  ;;  %v3001_v4 = vpack.c.bf16 (!%p480_p2), %v556_v1, %v555_v0  ;;  %v558_v5 = vld [vmem:[%s3766_s3 + $0x18] sm:$0xff] (!%p480_p2)  ;;  %2806 = vmatprep.mubr.msk.f32.mxu1 (!%p480_p2), %vm3264_vm0, %v3265_v6  ;;  %p535_p3 = scmp.lt.s32.totalorder (!%p480_p2), %s2640_s22, 1  ;;  %v559_v7 = vld [vmem:[%s3767_s4] sm:$0xff] (!%p480_p2)  ;;  %v560_v8 = vld [vmem:[%s3767_s4 + $0x8] sm:$0xff] (!%p480_p2)  ;;  %vm572_vm1 = vcmask (!%p480_p2), 261120  }
   0x8   : > { %3026 = vmatprep.subr.bf16.mxu0 (!%p480_p2), %v3263_v3  ;;  %2842 = vmatprep.mubr.msk.f32.mxu0 (!%p480_p2), %vm3264_vm0, %v3265_v6  ;;  %v3004_v9 = vpack.c.bf16 (!%p480_p2), %v558_v5, %v557_v2  ;;  %v3006_v10 = vpack.c.bf16 (!%p480_p2), %v560_v8, %v559_v7  ;;  %v561_v11 = vld [vmem:[%s3767_s4 + $0x10] sm:$0xff] (!%p480_p2)  ;;  %v562_v12 = vld [vmem:[%s3767_s4 + $0x18] sm:$0xff] (!%p480_p2)  ;;  %s3781_s29 = sld [smem:[#allocation2_spill]] (!%p480_p2)  ;;  %v563_v16 = vld [vmem:[%s3768_s5] sm:$0xff] (!%p480_p2)  ;;  %vm809_vm2 = vcmask (!%p480_p2), 31744   ;;  %vm906_vm4 = vcmask (!%p480_p2), 1041408  }
   0x9   : > { %3002 = vmatpush3.bf16.msra.mxu1 (!%p480_p2), %v3001_v4  ;;  %v3010_v14 = vpack.c.bf16 (!%p480_p2), %v562_v12, %v561_v11  ;;  %v564_v17 = vld [vmem:[%s3768_s5 + $0x8] sm:$0xff] (!%p480_p2)  ;;  %v565_v20 = vld [vmem:[%s3768_s5 + $0x10] sm:$0xff] (!%p480_p2)  ;;  %v566_v21 = vld [vmem:[%s3768_s5 + $0x18] sm:$0xff] (!%p480_p2)  ;;  %vm3267_vm5 = vmmov (!%p480_p2), 1   ;;  %v805_v42 = vshrl.u32 (!%p480_p2), %v804_v40, 7  ;;  %v3268_v44 = vmov (!%p480_p2), 0  }
   0xa   : > { %3003 = vmatprep.subr.bf16.mxu1 (!%p480_p2), %v3263_v3  ;;  %v3014_v18 = vpack.c.bf16 (!%p480_p2), %v564_v17, %v563_v16  ;;  %v3018_v22 = vpack.c.bf16 (!%p480_p2), %v566_v21, %v565_v20  ;;  %vm3445_vm3 = vmpackc.low (!%p480_p2), %vm809_vm2, %vm809_vm2  ;;  %vm891_vm9 = vcmask (!%p480_p2), 80896   ;;  %s3269_s23 = smov (!%p480_p2), 120   ;;  %s3270_s24 = smov (!%p480_p2), 116   ;;  %v569_v33 = vld [vmem:[%s3769_s6 + $0x10] sm:$0xff] (!%p480_p2)  ;;  %vm2235_vm10 = vcmask (!%p480_p2), 64512  }
   0xb   : > { %vm3462_vm6 = vmpackc.low (!%p480_p2), %vm906_vm4, %vm3267_vm5  ;;  %v806_v43 = vsub.s32 (!%p480_p2), 0, %v805_v42  ;;  %s3271_s25 = smov (!%p480_p2), 112   ;;  %s3272_s26 = smov (!%p480_p2), 108   ;;  %vm2237_vm11 = vcmask (!%p480_p2), 97280   ;;  %vm2239_vm12 = vcmask (!%p480_p2), 130048   ;;  %vm2241_vm13 = vcmask (!%p480_p2), 162816  }
   0xc   : > { %s3273_s27 = smov (!%p480_p2), 104   ;;  %s3274_s28 = smov (!%p480_p2), 100   ;;  %vm2243_vm14 = vcmask (!%p480_p2), 195584   ;;  %vm2245_vm15 = vcmask (!%p480_p2), 228352  }
   0xd   : > { %3005 = vmatpush3.bf16.msra.mxu1 (!%p480_p2), %v3004_v9  ;;  %s3278_s17 = smov (!%p480_p2), 12   ;;  %s3279_s18 = smov (!%p480_p2), 20  }
   0xe   : > { %s3787_s22 = smov (!%p535_p3, %s2640_s22), 1  ;;  %3007 = vmatprep.subr.bf16.mxu1 %v3006_v10 }
   0xf   : > { %s2645_s20 = sshll.u32 %s3787_s22, 3  ;;  %s2705_s0 = sshll.u32 %s3787_s22, 4 }
  0x10   : > { %s538_s30 = scalar_lea.vmem %s3781_s29, %s2645_s20  ;;  %s543_s19 = scalar_lea.vmem %s3764_s1, %s2705_s0 }
  0x11   : > { %v3414_v13 = vld [vmem:[%s538_s30] sm:$0xff]  ;;  %v553_v19 = vld [vmem:[%s543_s19 + $0x8] sm:$0x3]  ;;  %s3266_s0 = smov 124   ;;  %s3275_s29 = smov 16  }
  0x12   : > { %v552_v15 = vld [vmem:[%s543_s19] sm:$0xff]  ;;  %2807 = vmatmul.mubr.msk.f32.vlgmr.msra.gmra.mrb[0].mxu1 %vm572_vm1, %v3414_v13  ;;  %s546_s19 = scalar_lea.vmem %s3765_s2, %s3787_s22  ;;  %s3276_s30 = smov 4  }
  0x13   : > { %3009 = vmatpush3.bf16.msra.mxu1 %v3006_v10  ;;  %2817 = vmatprep.mubr.msk.f32.mxu1 %vm572_vm1, %v552_v15  ;;  %v554_v41 = vld [vmem:[%s546_s19] sm:$0x1]  ;;  %s3280_s19 = smov 24  }
  0x14   : > { %3011 = vmatprep.subr.bf16.mxu1 %v3010_v14  ;;  %vm802_vm7 = vcmp.gt.f32.partialorder %v554_v41, 0.0 }
  0x15   : > { %v803_v45 = vsel %vm802_vm7, 1, %v3268_v44 }
  0x16   : > { %v3481_v46 = vrot.slane %v803_v45, %v806_v43 }
  0x17   : > { %3013 = vmatpush3.bf16.msra.mxu1 %v3010_v14 }
  0x18   : > { %3015 = vmatprep.subr.bf16.mxu1 %v3014_v18  ;;  %vm808_vm8 = vcmp.eq.s32.totalorder %v3481_v46, 1 }
  0x1a   : > { %2818 = vmatmul.mubr.msk.f32.vlgmr.msra.gmra.mrb[2].mxu1 %vm572_vm1, %v553_v19 }
  0x1b   : > { %3017 = vmatpush3.bf16.msra.mxu1 %v3014_v18  ;;  %2828 = vmatprep.mubr.msk.f32.mxu1 %vm572_vm1, %v552_v15 }
  0x1c   : > { %3019 = vmatprep.subr.bf16.mxu1 %v3018_v22 }
  0x1f   : > { %3021 = vmatpush3.bf16.msra.mxu1 %v3018_v22 }
  0x20   : > { %3022 = vmatprep.subr.bf16.mxu1 %v3263_v3 }
  0x22   : > { %2829 = vmatmul.mubr.msk.f32.vlgmr.msra.gmra.mrb[4].mxu1 %vm572_vm1, %v553_v19 }
  0x23   : > { %2835 = vmatprep.mubr.msk.f32.mxu1 %vm3264_vm0, %v3265_v6 }
  0xe5   : > { %v3441_v23 = vpop.f32.mrb[0].mxu1 }
  0xe6   : > { %v2808_v24 = vpop.f32.mrb[1].mxu1 }
  0xed   : > { %v2819_v25 = vpop.f32.mrb[2].mxu1 }
  0xee   : > { %v718_v26 = vpop.f32.mrb[3].mxu1 }
  0xef   : > { %v3449_v28 = vpack.i.bf16 %v2819_v25, %v718_v26  ;;  %v3023_v29 = vpack.c.bf16 %v2819_v25, %v718_v26 }
  0xf1   : > { %3150 = vrot.lane.b32.xlu0 %v3449_v28, %s3266_s0  ;;  %3025 = vmatpush3.bf16.xpose.msk.msra.mxu1 %vm3445_vm3, %v3023_v29 }
  0xf2   : > { %3030 = vmatprep.subr.bf16.mxu1 %v3263_v3 }
  0xf5   : > { %980 = vrot.lane.b32.xlu0 %v3441_v23, %s3266_s0  ;;  %v2830_v30 = vpop.f32.mrb[4].mxu1 }
  0xf6   : > { %v793_v31 = vpop.f32.mrb[5].mxu1 }
  0xf7   : > { %v3027_v32 = vpack.c.bf16 %v2830_v30, %v793_v31  ;;  %v3475_v39 = vpack.i.bf16 %v2830_v30, %v793_v31 }
  0xf8   : > { %2836 = vmatmul.mubr.msk.f32.vlgmr.msra.gmra.mrb[6].mxu1 %vm809_vm2, %v3441_v23 }
  0xf9   : > { %2849 = vmatprep.mubr.msk.f32.mxu1 %vm3264_vm0, %v3265_v6  ;;  %3029 = vmatpush3.bf16.msk.msra.mxu0 %vm3462_vm6, %v3027_v32 }
  0xfa   : > { %3034 = vmatprep.subr.bf16.mxu0 %v3263_v3 }
 0x163   : > { %v3151_v34 = vpop.permute.xlu0 %3150 }
 0x164   : > { %v3153_v35 = vunpack.i.h.bf16 %v3151_v34  ;;  %v3152_v36 = vunpack.i.l.bf16 %v3151_v34 }
 0x166   : > { %v3031_v37 = vpack.c.bf16 %v3153_v35, %v3152_v36 }
 0x167   : > { %v981_v38 = vpop.permute.xlu0 %980 }
 0x168   : > { %3033 = vmatpush3.bf16.xpose.msk.msra.mxu1 %vm3445_vm3, %v3031_v37 }
 0x169   : > { %3042 = vmatprep.subr.bf16.mxu1 %v3263_v3 }
 0x16f   : > { %2850 = vmatmul.mubr.msk.f32.vlgmr.msra.gmra.mrb[8].mxu1 %vm809_vm2, %v981_v38 }
 0x170   : > { %2870 = vmatprep.mubr.msk.f32.mxu1 %vm3264_vm0, %v3265_v6 }
 0x1cb   : > { %v885_v47 = vpop.f32.mrb[6].mxu1 }
 0x1cc   : > { %v889_v48 = vsel %vm808_vm8, %v885_v47, -1e+20  ;;  %v2837_v49 = vpop.f32.mrb[7].mxu1 }
 0x1cd   : > { %v890_v50 = vmul.f32 0.17677669, %v889_v48 }
 0x1cf   : > { %v892_v51 = vsel %vm891_vm9, %v890_v50, -inf }
 0x1d0   : > { %893 = vmax.xlane.f32.xlu1 %v892_v51 }
 0x242   : > { %v1058_v52 = vpop.f32.mrb[8].mxu1 }
 0x243   : > { %v1062_v53 = vsel %vm808_vm8, %v1058_v52, -1e+20  ;;  %v2851_v54 = vpop.f32.mrb[9].mxu1 }
 0x244   : > { %v1063_v55 = vmul.f32 0.17677669, %v1062_v53 }
 0x246   : > { %v1064_v56 = vsel %vm891_vm9, %v1063_v55, -inf }
 0x247   : > { %1065 = vmax.xlane.f32.xlu1 %v1064_v56 }
 0x258   : > { %3155 = vrot.lane.b32.xlu1 %v3475_v39, %s3266_s0  ;;  %s3277_s0 = smov 8  }
 0x25c   : > { %3160 = vrot.lane.b32.xlu1 %v3449_v28, %s3269_s23 }
 0x25d   : > { %v894_v57 = vpop.xlane.xlu1 %893 }
 0x25e   : > { %v895_v58 = vsub.f32 %v890_v50, %v894_v57 }
 0x260   : > { %v896_v59 = vmul.f32 1.442695, %v895_v58 }
 0x262   : > { %3219 = vpow2.f32 %v896_v59 }
 0x26c   : > { %v3220_v60 = vpop.eup %3219 }
 0x26d   : > { %v898_v61 = vsel %vm891_vm9, %v3220_v60, 0.0 }
 0x26e   : > { %899 = vadd.xlane.f32.xlu0 %v898_v61 }
 0x284   : > { %3165 = vrot.lane.b32.xlu0 %v3475_v39, %s3269_s23 }
 0x2d4   : > { %v1066_v62 = vpop.xlane.xlu1 %1065 }
 0x2d5   : > { %v1067_v63 = vsub.f32 %v1063_v55, %v1066_v62 }
 0x2d7   : > { %v1068_v0 = vmul.f32 1.442695, %v1067_v63 }
 0x2d8   : > { %v3156_v9 = vpop.permute.xlu1 %3155 }
 0x2d9   : > { %3221 = vpow2.f32 %v1068_v0  ;;  %v3158_v11 = vunpack.i.h.bf16 %v3156_v9  ;;  %v3157_v12 = vunpack.i.l.bf16 %v3156_v9 }
 0x2db   : > { %v3035_v16 = vpack.c.bf16 %v3158_v11, %v3157_v12 }
 0x2dc   : > { %v3161_v17 = vpop.permute.xlu1 %3160 }
 0x2dd   : > { %v3163_v19 = vunpack.i.h.bf16 %v3161_v17  ;;  %v3162_v20 = vunpack.i.l.bf16 %v3161_v17 }
 0x2df   : > { %v3039_v24 = vpack.c.bf16 %v3163_v19, %v3162_v20 }
 0x2e3   : > { %v3222_v1 = vpop.eup %3221 }
 0x2e4   : > { %v1070_v2 = vsel %vm891_vm9, %v3222_v1, 0.0 }
 0x2e5   : > { %1071 = vadd.xlane.f32.xlu1 %v1070_v2 }
 0x2f6   : > { %1156 = vrot.lane.b32.xlu1 %v3441_v23, %s3269_s23 }
 0x2fb   : > { %v900_v4 = vpop.xlane.xlu0 %899 }
 0x2fc   : > { %3223 = vrcp.f32 %v900_v4 }
 0x2ff   : > { %v3166_v5 = vpop.permute.xlu0 %3165 }
 0x300   : > { %v3168_v7 = vunpack.i.h.bf16 %v3166_v5  ;;  %v3167_v8 = vunpack.i.l.bf16 %v3166_v5 }
 0x302   : > { %v3043_v10 = vpack.c.bf16 %v3168_v7, %v3167_v8 }
 0x304   : > { %3045 = vmatpush3.bf16.msk.msra.mxu1 %vm3462_vm6, %v3043_v10 }
 0x305   : > { %3046 = vmatprep.subr.bf16.mxu1 %v3263_v3 }
 0x306   : > { %v3224_v14 = vpop.eup %3223 }
 0x307   : > { %v902_v15 = vmul.f32 %v3224_v14, %v3220_v60 }
 0x309   : > { %2843 = vmatmul.mubr.msk.f32.vlgmr.msra.gmra.mrb[0].mxu0 %vm891_vm9, %v902_v15 }
 0x30a   : > { %3037 = vmatpush3.bf16.msk.msra.mxu0 %vm3462_vm6, %v3035_v16  ;;  %2856 = vmatprep.mubr.msk.f32.mxu0 %vm3264_vm0, %v3265_v6 }
 0x30b   : > { %3038 = vmatprep.subr.bf16.mxu0 %v3263_v3 }
 0x372   : > { %v1072_v18 = vpop.xlane.xlu1 %1071 }
 0x373   : > { %3225 = vrcp.f32 %v1072_v18 }
 0x376   : > { %v1157_v25 = vpop.permute.xlu1 %1156 }
 0x37d   : > { %v3226_v21 = vpop.eup %3225 }
 0x37e   : > { %v1074_v22 = vmul.f32 %v3226_v21, %v3222_v1 }
 0x380   : > { %2857 = vmatmul.mubr.msk.f32.vlgmr.msra.gmra.mrb[2].mxu0 %vm891_vm9, %v1074_v22 }
 0x381   : > { %3041 = vmatpush3.bf16.xpose.msk.msra.mxu0 %vm3445_vm3, %v3039_v24  ;;  %2863 = vmatprep.mubr.msk.f32.mxu0 %vm3264_vm0, %v3265_v6 }
 0x382   : > { %3050 = vmatprep.subr.bf16.mxu0 %v3263_v3 }
 0x388   : > { %2864 = vmatmul.mubr.msk.f32.vlgmr.msra.gmra.mrb[4].mxu0 %vm809_vm2, %v1157_v25 }
 0x389   : > { %2884 = vmatprep.mubr.msk.f32.mxu0 %vm3264_vm0, %v3265_v6 }
 0x3dc   : > { %v3515_v26 = vpop.f32.mrb[0].mxu0 }
 0x3dd   : > { %v2844_v29 = vpop.f32.mrb[1].mxu0 }
 0x453   : > { %v3517_v30 = vpop.f32.mrb[2].mxu0 }
 0x454   : > { %v2858_v31 = vpop.f32.mrb[3].mxu0 }
 0x45b   : > { %v1234_v32 = vpop.f32.mrb[4].mxu0 }
 0x45c   : > { %v1238_v34 = vsel %vm808_vm8, %v1234_v32, -1e+20  ;;  %v2865_v35 = vpop.f32.mrb[5].mxu0 }
 0x45d   : > { %v1239_v36 = vmul.f32 0.17677669, %v1238_v34 }
 0x45f   : > { %v1240_v37 = vsel %vm891_vm9, %v1239_v36, -inf }
 0x460   : > { %1241 = vmax.xlane.f32.xlu1 %v1240_v37 }
 0x471   : > { %3175 = vrot.lane.b32.xlu1 %v3475_v39, %s3270_s24 }
 0x475   : > { %3180 = vrot.lane.b32.xlu1 %v3449_v28, %s3271_s25 }
 0x4ed   : > { %v1242_v38 = vpop.xlane.xlu1 %1241 }
 0x4ee   : > { %v1243_v40 = vsub.f32 %v1239_v36, %v1242_v38 }
 0x4f0   : > { %v1244_v41 = vmul.f32 1.442695, %v1243_v40 }
 0x4f1   : > { %v3176_v42 = vpop.permute.xlu1 %3175 }
 0x4f2   : > { %3227 = vpow2.f32 %v1244_v41  ;;  %v3178_v43 = vunpack.i.h.bf16 %v3176_v42  ;;  %v3177_v44 = vunpack.i.l.bf16 %v3176_v42 }
 0x4f4   : > { %v3051_v45 = vpack.c.bf16 %v3178_v43, %v3177_v44 }
 0x4f5   : > { %v3181_v11 = vpop.permute.xlu1 %3180 }
 0x4f6   : > { %3053 = vmatpush3.bf16.msk.msra.mxu0 %vm3462_vm6, %v3051_v45  ;;  %v3183_v14 = vunpack.i.h.bf16 %v3181_v11  ;;  %v3182_v15 = vunpack.i.l.bf16 %v3181_v11 }
 0x4f7   : > { %3054 = vmatprep.subr.bf16.mxu0 %v3263_v3 }
 0x4f8   : > { %v3055_v18 = vpack.c.bf16 %v3183_v14, %v3182_v15 }
 0x4fc   : > { %v3228_v47 = vpop.eup %3227 }
 0x4fd   : > { %v1246_v48 = vsel %vm891_vm9, %v3228_v47, 0.0 }
 0x4fe   : > { %1247 = vadd.xlane.f32.xlu0 %v1246_v48 }
 0x514   : > { %3170 = vrot.lane.b32.xlu0 %v3449_v28, %s3270_s24 }
 0x518   : > { %1331 = vrot.lane.b32.xlu0 %v3441_v23, %s3270_s24 }
 0x58b   : > { %v1248_v49 = vpop.xlane.xlu0 %1247 }
 0x58c   : > { %3229 = vrcp.f32 %v1248_v49 }
 0x58f   : > { %v3171_v50 = vpop.permute.xlu0 %3170 }
 0x590   : > { %v3173_v51 = vunpack.i.h.bf16 %v3171_v50  ;;  %v3172_v52 = vunpack.i.l.bf16 %v3171_v50 }
 0x592   : > { %v3047_v55 = vpack.c.bf16 %v3173_v51, %v3172_v52 }
 0x593   : > { %v1332_v56 = vpop.permute.xlu0 %1331 }
 0x596   : > { %v3230_v53 = vpop.eup %3229 }
 0x597   : > { %v1250_v54 = vmul.f32 %v3230_v53, %v3228_v47 }
 0x599   : > { %2871 = vmatmul.mubr.msk.f32.vlgmr.msra.gmra.mrb[10].mxu1 %vm891_vm9, %v1250_v54 }
 0x59a   : > { %3049 = vmatpush3.bf16.xpose.msk.msra.mxu1 %vm3445_vm3, %v3047_v55  ;;  %2877 = vmatprep.mubr.msk.f32.mxu1 %vm3264_vm0, %v3265_v6 }
 0x59b   : > { %3058 = vmatprep.subr.bf16.mxu1 %v3263_v3 }
 0x5a1   : > { %2878 = vmatmul.mubr.msk.f32.vlgmr.msra.gmra.mrb[12].mxu1 %vm809_vm2, %v1332_v56 }
 0x5a2   : > { %2898 = vmatprep.mubr.msk.f32.mxu1 %vm3264_vm0, %v3265_v6 }
 0x66c   : > { %v3540_v57 = vpop.f32.mrb[10].mxu1 }
 0x66d   : > { %v2872_v58 = vpop.f32.mrb[11].mxu1 }
 0x674   : > { %v1409_v59 = vpop.f32.mrb[12].mxu1 }
 0x675   : > { %v1413_v60 = vsel %vm808_vm8, %v1409_v59, -1e+20  ;;  %v2879_v61 = vpop.f32.mrb[13].mxu1 }
 0x676   : > { %v1414_v62 = vmul.f32 0.17677669, %v1413_v60 }
 0x678   : > { %v1415_v63 = vsel %vm891_vm9, %v1414_v62, -inf }
 0x679   : > { %1416 = vmax.xlane.f32.xlu0 %v1415_v63 }
 0x68f   : > { %3185 = vrot.lane.b32.xlu0 %v3475_v39, %s3271_s25 }
 0x706   : > { %v1417_v0 = vpop.xlane.xlu0 %1416 }
 0x707   : > { %v1418_v1 = vsub.f32 %v1414_v62, %v1417_v0 }
 0x709   : > { %v1419_v2 = vmul.f32 1.442695, %v1418_v1 }
 0x70a   : > { %v3186_v4 = vpop.permute.xlu0 %3185 }
 0x70b   : > { %3231 = vpow2.f32 %v1419_v2  ;;  %v3188_v5 = vunpack.i.h.bf16 %v3186_v4  ;;  %v3187_v7 = vunpack.i.l.bf16 %v3186_v4 }
 0x70d   : > { %v3059_v8 = vpack.c.bf16 %v3188_v5, %v3187_v7 }
 0x70f   : > { %3061 = vmatpush3.bf16.msk.msra.mxu1 %vm3462_vm6, %v3059_v8 }
 0x710   : > { %3062 = vmatprep.subr.bf16.mxu1 %v3263_v3 }
 0x715   : > { %v3232_v9 = vpop.eup %3231 }
 0x716   : > { %v1421_v10 = vsel %vm891_vm9, %v3232_v9, 0.0 }
 0x717   : > { %1422 = vadd.xlane.f32.xlu1 %v1421_v10 }
 0x728   : > { %1506 = vrot.lane.b32.xlu1 %v3441_v23, %s3271_s25 }
 0x7a4   : > { %v1423_v12 = vpop.xlane.xlu1 %1422 }
 0x7a5   : > { %3233 = vrcp.f32 %v1423_v12 }
 0x7a8   : > { %v1507_v19 = vpop.permute.xlu1 %1506 }
 0x7af   : > { %v3234_v16 = vpop.eup %3233 }
 0x7b0   : > { %v1425_v17 = vmul.f32 %v3234_v16, %v3232_v9 }
 0x7b2   : > { %2885 = vmatmul.mubr.msk.f32.vlgmr.msra.gmra.mrb[6].mxu0 %vm891_vm9, %v1425_v17 }
 0x7b3   : > { %3057 = vmatpush3.bf16.xpose.msk.msra.mxu0 %vm3445_vm3, %v3055_v18  ;;  %2891 = vmatprep.mubr.msk.f32.mxu0 %vm3264_vm0, %v3265_v6 }
 0x7b4   : > { %3066 = vmatprep.subr.bf16.mxu0 %v3263_v3 }
 0x7ba   : > { %2892 = vmatmul.mubr.msk.f32.vlgmr.msra.gmra.mrb[8].mxu0 %vm809_vm2, %v1507_v19 }
 0x7bb   : > { %2912 = vmatprep.mubr.msk.f32.mxu0 %vm3264_vm0, %v3265_v6 }
 0x885   : > { %v3562_v20 = vpop.f32.mrb[6].mxu0 }
 0x886   : > { %v2886_v21 = vpop.f32.mrb[7].mxu0 }
 0x88d   : > { %v1584_v22 = vpop.f32.mrb[8].mxu0 }
 0x88e   : > { %v1588_v24 = vsel %vm808_vm8, %v1584_v22, -1e+20  ;;  %v2893_v25 = vpop.f32.mrb[9].mxu0 }
 0x88f   : > { %v1589_v29 = vmul.f32 0.17677669, %v1588_v24 }
 0x891   : > { %v1590_v31 = vsel %vm891_vm9, %v1589_v29, -inf }
 0x892   : > { %1591 = vmax.xlane.f32.xlu1 %v1590_v31 }
 0x8a3   : > { %3195 = vrot.lane.b32.xlu1 %v3475_v39, %s3272_s26 }
 0x8a7   : > { %3200 = vrot.lane.b32.xlu1 %v3449_v28, %s3273_s27 }
 0x91f   : > { %v1592_v32 = vpop.xlane.xlu1 %1591 }
 0x920   : > { %v1593_v34 = vsub.f32 %v1589_v29, %v1592_v32 }
 0x922   : > { %v1594_v35 = vmul.f32 1.442695, %v1593_v34 }
 0x923   : > { %v3196_v36 = vpop.permute.xlu1 %3195 }
 0x924   : > { %3235 = vpow2.f32 %v1594_v35  ;;  %v3198_v37 = vunpack.i.h.bf16 %v3196_v36  ;;  %v3197_v38 = vunpack.i.l.bf16 %v3196_v36 }
 0x926   : > { %v3067_v40 = vpack.c.bf16 %v3198_v37, %v3197_v38 }
 0x927   : > { %v3201_v7 = vpop.permute.xlu1 %3200 }
 0x928   : > { %3069 = vmatpush3.bf16.msk.msra.mxu0 %vm3462_vm6, %v3067_v40  ;;  %v3203_v9 = vunpack.i.h.bf16 %v3201_v7  ;;  %v3202_v10 = vunpack.i.l.bf16 %v3201_v7 }
 0x929   : > { %3070 = vmatprep.subr.bf16.mxu0 %v3263_v3 }
 0x92a   : > { %v3071_v14 = vpack.c.bf16 %v3203_v9, %v3202_v10 }
 0x92e   : > { %v3236_v41 = vpop.eup %3235 }
 0x92f   : > { %v1596_v42 = vsel %vm891_vm9, %v3236_v41, 0.0 }
 0x930   : > { %1597 = vadd.xlane.f32.xlu0 %v1596_v42 }
 0x946   : > { %3190 = vrot.lane.b32.xlu0 %v3449_v28, %s3272_s26 }
 0x94a   : > { %1681 = vrot.lane.b32.xlu0 %v3441_v23, %s3272_s26 }
 0x9bd   : > { %v1598_v43 = vpop.xlane.xlu0 %1597 }
 0x9be   : > { %3237 = vrcp.f32 %v1598_v43 }
 0x9c1   : > { %v3191_v44 = vpop.permute.xlu0 %3190 }
 0x9c2   : > { %v3193_v45 = vunpack.i.h.bf16 %v3191_v44  ;;  %v3192_v47 = vunpack.i.l.bf16 %v3191_v44 }
 0x9c4   : > { %v3063_v50 = vpack.c.bf16 %v3193_v45, %v3192_v47 }
 0x9c5   : > { %v1682_v51 = vpop.permute.xlu0 %1681 }
 0x9c8   : > { %v3238_v48 = vpop.eup %3237 }
 0x9c9   : > { %v1600_v49 = vmul.f32 %v3238_v48, %v3236_v41 }
 0x9cb   : > { %2899 = vmatmul.mubr.msk.f32.vlgmr.msra.gmra.mrb[14].mxu1 %vm891_vm9, %v1600_v49 }
 0x9cc   : > { %3065 = vmatpush3.bf16.xpose.msk.msra.mxu1 %vm3445_vm3, %v3063_v50  ;;  %2905 = vmatprep.mubr.msk.f32.mxu1 %vm3264_vm0, %v3265_v6 }
 0x9cd   : > { %3074 = vmatprep.subr.bf16.mxu1 %v3263_v3 }
 0x9d3   : > { %2906 = vmatmul.mubr.msk.f32.vlgmr.msra.gmra.mrb[16].mxu1 %vm809_vm2, %v1682_v51 }
 0x9d4   : > { %2926 = vmatprep.mubr.msk.f32.mxu1 %vm3264_vm0, %v3265_v6 }
 0xa9e   : > { %v3585_v52 = vpop.f32.mrb[14].mxu1 }
 0xa9f   : > { %v2900_v53 = vpop.f32.mrb[15].mxu1 }
 0xaa6   : > { %v1759_v54 = vpop.f32.mrb[16].mxu1 }
 0xaa7   : > { %v1763_v55 = vsel %vm808_vm8, %v1759_v54, -1e+20  ;;  %v2907_v56 = vpop.f32.mrb[17].mxu1 }
 0xaa8   : > { %v1764_v58 = vmul.f32 0.17677669, %v1763_v55 }
 0xaaa   : > { %v1765_v59 = vsel %vm891_vm9, %v1764_v58, -inf }
 0xaab   : > { %1766 = vmax.xlane.f32.xlu0 %v1765_v59 }
 0xac1   : > { %3205 = vrot.lane.b32.xlu0 %v3475_v39, %s3273_s27 }
 0xb38   : > { %v1767_v60 = vpop.xlane.xlu0 %1766 }
 0xb39   : > { %v1768_v61 = vsub.f32 %v1764_v58, %v1767_v60  ;;  %v570_v60 = vld [vmem:[%s3769_s6 + $0x18] sm:$0xff] }
 0xb3b   : > { %v1769_v62 = vmul.f32 1.442695, %v1768_v61  ;;  %v3090_v61 = vpack.c.bf16 %v570_v60, %v569_v33 }
 0xb3c   : > { %v3206_v63 = vpop.permute.xlu0 %3205 }
 0xb3d   : > { %3239 = vpow2.f32 %v1769_v62  ;;  %v3208_v0 = vunpack.i.h.bf16 %v3206_v63  ;;  %v3207_v1 = vunpack.i.l.bf16 %v3206_v63 }
 0xb3f   : > { %v3075_v2 = vpack.c.bf16 %v3208_v0, %v3207_v1 }
 0xb41   : > { %3077 = vmatpush3.bf16.msk.msra.mxu1 %vm3462_vm6, %v3075_v2 }
 0xb42   : > { %3078 = vmatprep.subr.bf16.mxu1 %v3263_v3 }
 0xb47   : > { %v3240_v4 = vpop.eup %3239 }
 0xb48   : > { %v1771_v5 = vsel %vm891_vm9, %v3240_v4, 0.0 }
 0xb49   : > { %1772 = vadd.xlane.f32.xlu1 %v1771_v5 }
 0xb5a   : > { %1856 = vrot.lane.b32.xlu1 %v3441_v23, %s3273_s27 }
 0xbd6   : > { %v1773_v8 = vpop.xlane.xlu1 %1772 }
 0xbd7   : > { %3241 = vrcp.f32 %v1773_v8 }
 0xbda   : > { %v1857_v15 = vpop.permute.xlu1 %1856 }
 0xbe1   : > { %v3242_v11 = vpop.eup %3241 }
 0xbe2   : > { %v1775_v12 = vmul.f32 %v3242_v11, %v3240_v4 }
 0xbe4   : > { %2913 = vmatmul.mubr.msk.f32.vlgmr.msra.gmra.mrb[10].mxu0 %vm891_vm9, %v1775_v12 }
 0xbe5   : > { %3073 = vmatpush3.bf16.xpose.msk.msra.mxu0 %vm3445_vm3, %v3071_v14  ;;  %2919 = vmatprep.mubr.msk.f32.mxu0 %vm3264_vm0, %v3265_v6 }
 0xbe6   : > { %3082 = vmatprep.subr.bf16.mxu0 %v3263_v3 }
 0xbec   : > { %2920 = vmatmul.mubr.msk.f32.vlgmr.msra.gmra.mrb[12].mxu0 %vm809_vm2, %v1857_v15 }
 0xbed   : > { %2940 = vmatprep.mubr.msk.f32.mxu0 %vm3264_vm0, %v3265_v6 }
 0xcb7   : > { %v1852_v16 = vpop.f32.mrb[10].mxu0 }
 0xcb8   : > { %v2914_v17 = vpop.f32.mrb[11].mxu0 }
 0xcbf   : > { %v1934_v18 = vpop.f32.mrb[12].mxu0 }
 0xcc0   : > { %v1938_v19 = vsel %vm808_vm8, %v1934_v18, -1e+20  ;;  %v2921_v21 = vpop.f32.mrb[13].mxu0 }
 0xcc1   : > { %v1939_v22 = vmul.f32 0.17677669, %v1938_v19 }
 0xcc3   : > { %v1940_v24 = vsel %vm891_vm9, %v1939_v22, -inf }
 0xcc4   : > { %1941 = vmax.xlane.f32.xlu1 %v1940_v24 }
 0xd51   : > { %v1942_v25 = vpop.xlane.xlu1 %1941 }
 0xd52   : > { %v1943_v29 = vsub.f32 %v1939_v22, %v1942_v25 }
 0xd54   : > { %v1944_v31 = vmul.f32 1.442695, %v1943_v29 }
 0xd56   : > { %3243 = vpow2.f32 %v1944_v31 }
 0xd60   : > { %v3244_v32 = vpop.eup %3243 }
 0xd61   : > { %v1946_v34 = vsel %vm891_vm9, %v3244_v32, 0.0 }
 0xd62   : > { %1947 = vadd.xlane.f32.xlu0 %v1946_v34  ;;  %v2358_v34 = vld [vmem:[%s3773_s10 + $0x8] sm:$0xff] }
 0xd78   : > { %3210 = vrot.lane.b32.xlu0 %v3449_v28, %s3274_s28 }
 0xd7c   : > { %2031 = vrot.lane.b32.xlu0 %v3441_v23, %s3274_s28 }
 0xdef   : > { %v1948_v35 = vpop.xlane.xlu0 %1947 }
 0xdf0   : > { %3245 = vrcp.f32 %v1948_v35 }
 0xdf3   : > { %v3211_v36 = vpop.permute.xlu0 %3210 }
 0xdf4   : > { %v3213_v37 = vunpack.i.h.bf16 %v3211_v36  ;;  %v3212_v38 = vunpack.i.l.bf16 %v3211_v36  ;;  %v2360_v36 = vld [vmem:[%s3773_s10 + $0x18] sm:$0xff] }
 0xdf6   : > { %v3079_v42 = vpack.c.bf16 %v3213_v37, %v3212_v38  ;;  %v2442_v38 = vld [vmem:[%s3775_s12] sm:$0xff] }
 0xdf7   : > { %v2032_v28 = vpop.permute.xlu0 %2031 }
 0xdfa   : > { %v3246_v40 = vpop.eup %3245 }
 0xdfb   : > { %v1950_v41 = vmul.f32 %v3246_v40, %v3244_v32  ;;  %v2443_v40 = vld [vmem:[%s3775_s12 + $0x8] sm:$0xff] }
 0xdfd   : > { %2927 = vmatmul.mubr.msk.f32.vlgmr.msra.gmra.mrb[18].mxu1 %vm891_vm9, %v1950_v41  ;;  %v2444_v41 = vld [vmem:[%s3775_s12 + $0x10] sm:$0xff] }
 0xdfe   : > { %3081 = vmatpush3.bf16.xpose.msk.msra.mxu1 %vm3445_vm3, %v3079_v42  ;;  %2933 = vmatprep.mubr.msk.f32.mxu1 %vm3264_vm0, %v3265_v6  ;;  %v3099_v42 = vpack.c.bf16 %v2443_v40, %v2442_v38 }
 0xdff   : > { %3092 = vmatprep.subr.bf16.mxu1 %v3263_v3 }
 0xe05   : > { %2934 = vmatmul.mubr.msk.f32.vlgmr.msra.gmra.mrb[20].mxu1 %vm809_vm2, %v2032_v28  ;;  %v2445_v28 = vld [vmem:[%s3775_s12 + $0x18] sm:$0xff] }
 0xe06   : > { %2962 = vmatprep.mubr.msk.f32.mxu1 %vm3264_vm0, %v3265_v6 }
 0xed0   : > { %v2027_v23 = vpop.f32.mrb[18].mxu1 }
 0xed1   : > { %v2928_v43 = vpop.f32.mrb[19].mxu1 }
 0xed2   : > { %v2446_v43 = vld [vmem:[%s3775_s12 + $0x20] sm:$0xff] }
 0xed8   : > { %v2109_v44 = vpop.f32.mrb[20].mxu1 }
 0xed9   : > { %v2113_v45 = vsel %vm808_vm8, %v2109_v44, -1e+20  ;;  %v2935_v47 = vpop.f32.mrb[21].mxu1  ;;  %v2447_v44 = vld [vmem:[%s3775_s12 + $0x28] sm:$0xff] }
 0xeda   : > { %v2114_v27 = vmul.f32 0.17677669, %v2113_v45  ;;  %v3105_v45 = vpack.c.bf16 %v2447_v44, %v2446_v43  ;;  %v2448_v47 = vld [vmem:[%s3775_s12 + $0x30] sm:$0xff] }
 0xedc   : > { %v2115_v48 = vsel %vm891_vm9, %v2114_v27, -inf }
 0xedd   : > { %2116 = vmax.xlane.f32.xlu0 %v2115_v48 }
 0xef3   : > { %2219 = vrot.lane.b32.xlu0 %v3585_v52, %s3275_s29 }
 0xf6a   : > { %v2117_v49 = vpop.xlane.xlu0 %2116 }
 0xf6b   : > { %v2118_v50 = vsub.f32 %v2114_v27, %v2117_v49  ;;  %v2449_v27 = vld [vmem:[%s3775_s12 + $0x38] sm:$0xff]  ;;  %v2450_v49 = vld [vmem:[%s3775_s12 + $0x40] sm:$0xff] }
 0xf6c   : > { %v3108_v48 = vpack.c.bf16 %v2449_v27, %v2448_v47 }
 0xf6d   : > { %v2119_v51 = vmul.f32 1.442695, %v2118_v50  ;;  %v2451_v50 = vld [vmem:[%s3775_s12 + $0x48] sm:$0xff] }
 0xf6e   : > { %v2220_v10 = vpop.permute.xlu0 %2219 }
 0xf6f   : > { %3247 = vpow2.f32 %v2119_v51  ;;  %v3111_v51 = vpack.c.bf16 %v2451_v50, %v2450_v49 }
 0xf79   : > { %v3248_v53 = vpop.eup %3247 }
 0xf7a   : > { %v2121_v54 = vsel %vm891_vm9, %v3248_v53, 0.0 }
 0xf7b   : > { %2122 = vadd.xlane.f32.xlu1 %v2121_v54  ;;  %v2453_v54 = vld [vmem:[%s3775_s12 + $0x58] sm:$0xff] }
 0xf8c   : > { %3215 = vrot.lane.b32.xlu1 %v3475_v39, %s3274_s28  ;;  %s550_s28 = scalar_lea.vmem %s3779_s16, %s2645_s20 }
 0xf90   : > { %2207 = vrot.lane.b32.xlu1 %v3517_v30, %s3276_s30 }
 0xf94   : > { %2211 = vrot.lane.b32.xlu1 %v3540_v57, %s3277_s0  ;;  %v567_v57 = vld [vmem:[%s3769_s6] sm:$0xff]  ;;  %s3281_s0 = smov 28  }
 0xf98   : > { %2215 = vrot.lane.b32.xlu1 %v3562_v20, %s3278_s17  ;;  %v568_v20 = vld [vmem:[%s3769_s6 + $0x8] sm:$0xff] }
 0xf99   : > { %v3087_v59 = vpack.c.bf16 %v568_v20, %v567_v57  ;;  %v2696_v20 = vld [vmem:[%s3771_s8] ss:$0 sm:$0xff] }
 0xf9c   : > { %2223 = vrot.lane.b32.xlu1 %v1852_v16, %s3279_s18 }
 0xfa0   : > { %2227 = vrot.lane.b32.xlu1 %v2027_v23, %s3280_s19  ;;  %v3102_v23 = vpack.c.bf16 %v2445_v28, %v2444_v41 }
0x1008   : > { %v2123_v46 = vpop.xlane.xlu1 %2122 }
0x1009   : > { %3249 = vrcp.f32 %v2123_v46 }
0x100c   : > { %v3216_v52 = vpop.permute.xlu1 %3215 }
0x100d   : > { %v3218_v55 = vunpack.i.h.bf16 %v3216_v52  ;;  %v3217_v56 = vunpack.i.l.bf16 %v3216_v52  ;;  %v2454_v52 = vld [vmem:[%s3775_s12 + $0x60] sm:$0xff] }
0x100f   : > { %v3083_v58 = vpack.c.bf16 %v3218_v55, %v3217_v56  ;;  %v2455_v55 = vld [vmem:[%s3775_s12 + $0x68] sm:$0xff] }
0x1010   : > { %v2208_v0 = vpop.permute.xlu1 %2207  ;;  %v3117_v56 = vpack.c.bf16 %v2455_v55, %v2454_v52 }
0x1011   : > { %3085 = vmatpush3.bf16.msk.msra.mxu0 %vm3462_vm6, %v3083_v58  ;;  %v2234_v5 = vsel %vm809_vm2, %v3515_v26, %v2208_v0  ;;  %v2694_v26 = vld [vmem:[%s3770_s7] ss:$0 sm:$0xff] }
0x1012   : > { %3086 = vmatprep.subr.bf16.mxu0 %v3263_v3  ;;  %v2698_v0 = vld [vmem:[%s3774_s11] ss:$0 sm:$0xff] }
0x1013   : > { %v3250_v39 = vpop.eup %3249 }
0x1014   : > { %v2125_v30 = vmul.f32 %v3250_v39, %v3248_v53  ;;  %v2212_v1 = vpop.permute.xlu1 %2211  ;;  %v2452_v53 = vld [vmem:[%s3775_s12 + $0x50] sm:$0xff] }
0x1015   : > { %v2236_v7 = vsel %vm2235_vm10, %v2234_v5, %v2212_v1  ;;  %v3114_v46 = vpack.c.bf16 %v2453_v54, %v2452_v53 }
0x1016   : > { %2941 = vmatmul.mubr.msk.f32.vlgmr.msra.gmra.mrb[14].mxu0 %vm891_vm9, %v2125_v30 }
0x1017   : > { %2951 = vmatprep.mubr.msk.f32.mxu0 %vm3264_vm0, %v3265_v6  ;;  %3088 = vmatpush3.bf16.msra.mxu0 %v3087_v59  ;;  %v2697_v59 = vld [vmem:[%s3772_s9] ss:$0 sm:$0xff] }
0x1018   : > { %3089 = vmatprep.subr.bf16.mxu0 %v3263_v3  ;;  %v2216_v2 = vpop.permute.xlu1 %2215 }
0x1019   : > { %v2238_v8 = vsel %vm2237_vm11, %v2236_v7, %v2216_v2  ;;  %v2700_v7 = vld [vmem:[%s3776_s13] ss:$0 sm:$0xff] }
0x101a   : > { %v2240_v11 = vsel %vm2239_vm12, %v2238_v8, %v2220_v10 }
0x101b   : > { %3091 = vmatpush3.bf16.msra.mxu0 %v3090_v61 }
0x101c   : > { %3098 = vmatprep.subr.bf16.mxu0 %v3263_v3  ;;  %v2224_v4 = vpop.permute.xlu1 %2223 }
0x101d   : > { %v2242_v12 = vsel %vm2241_vm13, %v2240_v11, %v2224_v4 }
0x1020   : > { %v2228_v9 = vpop.permute.xlu1 %2227 }
0x1021   : > { %v2244_v14 = vsel %vm2243_vm14, %v2242_v12, %v2228_v9 }
0x10e9   : > { %v2202_v62 = vpop.f32.mrb[14].mxu0 }
0x10ea   : > { %2231 = vrot.lane.b32.xlu1 %v2202_v62, %s3281_s0  ;;  %v2942_v63 = vpop.f32.mrb[15].mxu0  ;;  %v2457_v62 = vld [vmem:[%s3775_s12 + $0x78] sm:$0xff] }
0x115c   : > { %v2232_v15 = vpop.permute.xlu1 %2231 }
0x115d   : > { %v2246_v16 = vsel %vm2245_vm15, %v2244_v14, %v2232_v15 }
0x115e   : > { %2952 = vmatmul.mubr.msk.f32.vlgmr.msra.gmra.mrb[16].mxu0 %vm572_vm1, %v2246_v16 }
0x115f   : > { %2997 = vmatprep.mubr.msk.f32.mxu0 %vm3264_vm0, %v3265_v6  ;;  %v2357_v6 = vld [vmem:[%s3773_s10] sm:$0xff]  ;;  %3100 = vmatpush3.bf16.msra.mxu0 %v3099_v42 }
0x1160   : > { %v3093_v35 = vpack.c.bf16 %v2358_v34, %v2357_v6  ;;  %3101 = vmatprep.subr.bf16.mxu0 %v3263_v3 }
0x1162   : > { %3094 = vmatpush3.bf16.msra.mxu1 %v3093_v35 }
0x1163   : > { %3095 = vmatprep.subr.bf16.mxu1 %v3263_v3  ;;  %3103 = vmatpush3.bf16.msra.mxu0 %v3102_v23 }
0x1164   : > { %3104 = vmatprep.subr.bf16.mxu0 %v3263_v3 }
0x1167   : > { %3106 = vmatpush3.bf16.msra.mxu0 %v3105_v45 }
0x1168   : > { %3107 = vmatprep.subr.bf16.mxu0 %v3263_v3 }
0x116b   : > { %3109 = vmatpush3.bf16.msra.mxu0 %v3108_v48 }
0x116c   : > { %3110 = vmatprep.subr.bf16.mxu0 %v3263_v3 }
0x116f   : > { %3112 = vmatpush3.bf16.msra.mxu0 %v3111_v51 }
0x1170   : > { %3113 = vmatprep.subr.bf16.mxu0 %v3263_v3 }
0x1173   : > { %3115 = vmatpush3.bf16.msra.mxu0 %v3114_v46 }
0x1174   : > { %3116 = vmatprep.subr.bf16.mxu0 %v3263_v3 }
0x1177   : > { %3118 = vmatpush3.bf16.msra.mxu0 %v3117_v56 }
0x1178   : > { %3119 = vmatprep.subr.bf16.mxu0 %v3263_v3  ;;  %v2456_v3 = vld [vmem:[%s3775_s12 + $0x70] sm:$0xff] }
0x1179   : > { %v3120_v63 = vpack.c.bf16 %v2457_v62, %v2456_v3 }
0x117b   : > { %3121 = vmatpush3.bf16.msra.mxu0 %v3120_v63 }
0x1231   : > { %v2322_v17 = vpop.f32.mrb[16].mxu0 }
0x1232   : > { %v2323_v18 = vadd.f32 %v2694_v26, %v2322_v17  ;;  %v2953_v19 = vpop.f32.mrb[17].mxu0 }
0x1234   : > { %v2328_v21 = vadd.f32 %v2323_v18, %v3414_v13  ;;  %v2359_v13 = vld [vmem:[%s3773_s10 + $0x10] sm:$0xff] }
0x1235   : > { %v3096_v37 = vpack.c.bf16 %v2360_v36, %v2359_v13 }
0x1236   : > { %v2329_v22 = vsel %vm572_vm1, %v2328_v21, 0.0 }
0x1237   : > { %2330 = vadd.xlane.f32.xlu1 %v2329_v22  ;;  %3097 = vmatpush3.bf16.msra.mxu1 %v3096_v37 }
0x12c4   : > { %v2331_v24 = vpop.xlane.xlu1 %2330 }
0x12c5   : > { %v2333_v25 = vmul.f32 0.03125, %v2331_v24  ;;  %v2701_v24 = vld [vmem:[%s3777_s14] ss:$0 sm:$0xff] }
0x12c7   : > { %v2334_v29 = vsub.f32 %v2328_v21, %v2333_v25 }
0x12c9   : > { %v2335_v31 = vmul.f32 %v2334_v29, %v2334_v29 }
0x12cb   : > { %v2336_v32 = vsel %vm572_vm1, %v2335_v31, 0.0 }
0x12cc   : > { %2337 = vadd.xlane.f32.xlu0 %v2336_v32 }
0x1359   : > { %v2338_v58 = vpop.xlane.xlu0 %2337 }
0x135a   : > { %v2339_v39 = vmul.f32 0.03125, %v2338_v58 }
0x135c   : > { %v2340_v30 = vadd.f32 1e-05, %v2339_v39 }
0x135e   : > { %3251 = vrsqrt.f32 %v2340_v30 }
0x1368   : > { %v3252_v57 = vpop.eup %3251 }
0x1369   : > { %v2342_v33 = vmul.f32 %v3252_v57, %v2334_v29  ;;  %v2702_v29 = vld [vmem:[%s3778_s15] ss:$0 sm:$0xff] }
0x136b   : > { %v2349_v60 = vmul.f32 %v2696_v20, %v2342_v33 }
0x136d   : > { %v2356_v61 = vadd.f32 %v2697_v59, %v2349_v60 }
0x136f   : > { %2963 = vmatmul.mubr.msk.f32.vlgmr.msra.gmra.mrb[22].mxu1 %vm572_vm1, %v2356_v61 }
0x1442   : > { %v2437_v1 = vpop.f32.mrb[22].mxu1 }
0x1443   : > { %v2438_v2 = vadd.f32 %v2698_v0, %v2437_v1  ;;  %v2964_v4 = vpop.f32.mrb[23].mxu1 }
0x1445   : > { %v2441_v5 = vmax.f32 %v2438_v2, 0.0 }
0x1447   : > { %2998 = vmatmul.mubr.f32.vlgmr.msra.gmra.mrb[18].mxu0 %v2441_v5 }
0x151a   : > { %v2531_v8 = vpop.f32.mrb[18].mxu0 }
0x151b   : > { %v2532_v9 = vadd.f32 %v2700_v7, %v2531_v8  ;;  %v2999_v10 = vpop.f32.mrb[19].mxu0 }
0x151d   : > { %v2537_v11 = vadd.f32 %v2532_v9, %v2356_v61 }
0x151f   : > { %v2538_v12 = vsel %vm572_vm1, %v2537_v11, 0.0 }
0x1520   : > { %2539 = vadd.xlane.f32.xlu1 %v2538_v12 }
0x15ad   : > { %v2540_v14 = vpop.xlane.xlu1 %2539 }
0x15ae   : > { %v2541_v15 = vmul.f32 0.03125, %v2540_v14 }
0x15b0   : > { %v2542_v16 = vsub.f32 %v2537_v11, %v2541_v15 }
0x15b2   : > { %v2543_v26 = vmul.f32 %v2542_v16, %v2542_v16 }
0x15b4   : > { %v2544_v17 = vsel %vm572_vm1, %v2543_v26, 0.0 }
0x15b5   : > { %2545 = vadd.xlane.f32.xlu0 %v2544_v17 }
0x1642   : > { %v2546_v18 = vpop.xlane.xlu0 %2545 }
0x1643   : > { %v2547_v19 = vmul.f32 0.03125, %v2546_v18 }
0x1645   : > { %v2548_v21 = vadd.f32 1e-05, %v2547_v19 }
0x1647   : > { %3253 = vrsqrt.f32 %v2548_v21 }
0x1651   : > { %v3254_v22 = vpop.eup %3253 }
0x1652   : > { %v2550_v25 = vmul.f32 %v3254_v22, %v2542_v16 }
0x1654   : > { %v2557_v31 = vmul.f32 %v2701_v24, %v2550_v25 }
0x1656   : > { %v2564_v32 = vadd.f32 %v2702_v29, %v2557_v31 }
0x1658   : > { %2565 = vst.msk [vmem:[%s550_s28] sm:$0xff] %vm572_vm1, %v2564_v32 }
0x1659 PF: > { %s26_s21 = sadd.s32 1, %s3261_s21  }
0x165a   : > { %p23_p4 = scmp.ge.s32.totalorder %s26_s21, 4  }
0x165c   :  { %25 = sbr.rel (!%p23_p4) target bundleno = 2 (0x2), region = 120 }

</bundles_post_ra>
